<compile_context>
chip_gen: v7x
topology: tpu7x:2x2x1
jax: 0.10.0
libtpu: 0.0.40
codegen_flags: <defaults>
</compile_context>

<pallas_src>
import functools

import numpy as np

import jax
import jax.numpy as jnp
from jax.experimental import pallas as pl
from jax.experimental.pallas import tpu as pltpu

NEG_SLOPE = 0.01  # F.leaky_relu default


def _leaky(x):
    return jnp.where(x > 0, x, NEG_SLOPE * x)


def _round_up(x, m):
    return (x + m - 1) // m * m


# ---------------- fused Pallas kernel ----------------

def _actor_fused_kernel(x_ref, a_ref, bc_ref, w1_ref, b1_ref, w2_ref, b2_ref,
                        w3_ref, b3_ref, o_ref):
    # x: (T, 768) bf16 raw obs flatten for this sample tile.  Upcast once; all
    # math below is f32 (v5e has no bf16 VPU/EUP).
    x = x_ref[...].astype(jnp.float32)

    # conv folded into a dense matmul + bias + leaky_relu.
    # Result is lane-dense (T, 1024) and never leaves VMEM.
    h = jnp.dot(x, a_ref[...], preferred_element_type=jnp.float32) + bc_ref[...]
    h = _leaky(h)

    # fc1 / fc2 (32-wide hidden)
    h1 = _leaky(jnp.dot(h, w1_ref[...], preferred_element_type=jnp.float32)
                + b1_ref[...])
    h2 = _leaky(jnp.dot(h1, w2_ref[...], preferred_element_type=jnp.float32)
                + b2_ref[...])

    # fc3 padded to 128 lanes; padded columns carry bias -1e30 -> exp() == 0,
    # so the softmax reductions/stores are full-width and unmasked.
    logits = (jnp.dot(h2, w3_ref[...], preferred_element_type=jnp.float32)
              + b3_ref[...])
    m = jnp.max(logits, axis=-1, keepdims=True)
    e = jnp.exp(logits - m)
    s = jnp.sum(e, axis=-1, keepdims=True)
    o_ref[...] = e * pl.reciprocal(s, approx=True)   # divide on the EUP slot


# ---------------- one-time parameter repack ----------------

def prepare_params(params, height=15, width=15):
    """Fold the conv into a dense matrix and pre-transpose/pad the fc weights.

    Done once, outside the inference hot loop (review item: no per-call
    transposes/reorders).
    """
    wc = np.asarray(params["wc"], np.float32)            # (Cout, Cin, 3, 3)
    bc = np.asarray(params["bc"], np.float32)
    w1 = np.asarray(params["w1"], np.float32)            # (32, 1014)
    b1 = np.asarray(params["b1"], np.float32)
    w2 = np.asarray(params["w2"], np.float32)
    b2 = np.asarray(params["b2"], np.float32)
    w3 = np.asarray(params["w3"], np.float32)            # (A, 32)
    b3 = np.asarray(params["b3"], np.float32)

    cout, cin, kh_sz, kw_sz = wc.shape
    ho, wo = height - kh_sz + 1, width - kw_sz + 1        # 13, 13
    f_in = height * width * cin                           # 675  (h, w, c) flatten
    f_in_pad = _round_up(f_in, 128)                       # 768
    f_conv = cout * ho * wo                               # 1014 (c, h, w) flatten
    f_conv_pad = _round_up(f_conv, 128)                   # 1024
    hidden = w1.shape[0]                                  # 32
    act = w3.shape[0]
    act_pad = _round_up(act, 128)                         # 128

    # A[m, col]: m indexes the raw obs flatten (h*W*C + w*C + c), col indexes
    # PyTorch's post-conv (c, h, w) flatten, so fc1's weight is used unmodified.
    co, ci, kh, kw, i, j = np.meshgrid(
        np.arange(cout), np.arange(cin), np.arange(kh_sz), np.arange(kw_sz),
        np.arange(ho), np.arange(wo), indexing="ij")
    rows = (i + kh) * (width * cin) + (j + kw) * cin + ci
    cols = co * (ho * wo) + i * wo + j
    a_mat = np.zeros((f_in_pad, f_conv_pad), np.float32)
    a_mat[rows.ravel(), cols.ravel()] = wc[co, ci, kh, kw].ravel()

    bc_row = np.zeros((1, f_conv_pad), np.float32)
    bc_row[0, :f_conv] = np.repeat(bc, ho * wo)

    w1p = np.zeros((f_conv_pad, hidden), np.float32)      # padded rows stay 0
    w1p[:f_conv, :] = w1.T
    w3p = np.zeros((hidden, act_pad), np.float32)
    w3p[:, :act] = w3.T
    b3p = np.full((1, act_pad), -1e30, np.float32)        # pad logits -> prob 0
    b3p[0, :act] = b3

    return {
        "A": jnp.asarray(a_mat), "bc": jnp.asarray(bc_row),
        "w1": jnp.asarray(w1p), "b1": jnp.asarray(b1.reshape(1, hidden)),
        "w2": jnp.asarray(w2.T), "b2": jnp.asarray(b2.reshape(1, hidden)),
        "w3": jnp.asarray(w3p), "b3": jnp.asarray(b3p),
    }


# ---------------- forward wrapper ----------------

@functools.partial(jax.jit, static_argnames=("action_num", "tile"))
def actor_forward(obs, prep, *, action_num, tile=512):
    B, S, H, W, C = obs.shape
    N = B * S
    f_in = H * W * C
    f_in_pad = prep["A"].shape[0]
    act_pad = prep["w3"].shape[1]

    # Sample tile: multiple of 32 sublanes, capped at `tile` (512 default keeps
    # the whole pipeline ~15 MiB of VMEM -> fits v7x's 64 MiB with headroom).
    T = min(_round_up(tile, 32), _round_up(N, 32))
    Np = _round_up(N, T)

    # Raw (h, w, c) flatten of the observations -- no permute, no XLA im2col.
    # bf16 halves the only per-sample HBM stream; in-kernel math stays f32.
    x = obs.reshape(N, f_in).astype(jnp.bfloat16)
    x = jnp.pad(x, ((0, Np - N), (0, f_in_pad - f_in)))

    full = lambda i: (0, 0)   # weights: constant block -> resident, no re-DMA
    probs = pl.pallas_call(
        _actor_fused_kernel,
        out_shape=jax.ShapeDtypeStruct((Np, act_pad), jnp.float32),
        grid=(Np // T,),
        in_specs=[
            pl.BlockSpec((T, f_in_pad), lambda i: (i, 0)),   # pipelined obs tile
            pl.BlockSpec(prep["A"].shape, full),
            pl.BlockSpec(prep["bc"].shape, full),
            pl.BlockSpec(prep["w1"].shape, full),
            pl.BlockSpec(prep["b1"].shape, full),
            pl.BlockSpec(prep["w2"].shape, full),
            pl.BlockSpec(prep["b2"].shape, full),
            pl.BlockSpec(prep["w3"].shape, full),
            pl.BlockSpec(prep["b3"].shape, full),
        ],
        out_specs=pl.BlockSpec((T, act_pad), lambda i: (i, 0)),
        compiler_params=pltpu.CompilerParams(
            dimension_semantics=("parallel",),          # shard tiles across TCs
            vmem_limit_bytes=48 * 1024 * 1024,          # explicit v7x budget
        ),
    )(x, prep["A"], prep["bc"], prep["w1"], prep["b1"],
      prep["w2"], prep["b2"], prep["w3"], prep["b3"])

    return probs[:N, :action_num].reshape(B, S, action_num)


# ---------------- pure-JAX reference (for correctness check) ----------------

def actor_reference(obs, params):
    B, S, H, W, C = obs.shape
    x = jnp.transpose(obs, (0, 1, 4, 2, 3)).reshape(B * S, C, H, W)
    y = jax.lax.conv_general_dilated(
        x, params["wc"], window_strides=(1, 1), padding="VALID",
        dimension_numbers=("NCHW", "OIHW", "NCHW"))
    y = _leaky(y + params["bc"][None, :, None, None])
    y = y.reshape(B, S, -1)
    h1 = _leaky(y @ params["w1"].T + params["b1"])
    h2 = _leaky(h1 @ params["w2"].T + params["b2"])
    logits = h2 @ params["w3"].T + params["b3"]
    return jax.nn.softmax(logits, axis=-1)


def init_params(key, action_num):
    ks = jax.random.split(key, 8)
    f32 = jnp.float32
    return {
        "wc": jax.random.normal(ks[0], (6, 3, 3, 3), f32) * 0.1,
        "bc": jax.random.normal(ks[1], (6,), f32) * 0.1,
        "w1": jax.random.normal(ks[2], (32, 169 * 6), f32) * 0.1,
        "b1": jax.random.normal(ks[3], (32,), f32) * 0.1,
        "w2": jax.random.normal(ks[4], (32, 32), f32) * 0.1,
        "b2": jax.random.normal(ks[5], (32,), f32) * 0.1,
        "w3": jax.random.normal(ks[6], (action_num, 32), f32) * 0.1,
        "b3": jax.random.normal(ks[7], (action_num,), f32) * 0.1,
    }


if __name__ == "__main__":
    key = jax.random.PRNGKey(0)
    pkey, okey = jax.random.split(key)

    action_num = 5
    batch, step = 2, 4
    params = init_params(pkey, action_num)
    obs = jax.random.uniform(okey, (batch, step, 15, 15, 3), jnp.float32)

    prep = prepare_params(params)                 # one-time weight repack
    out = jax.block_until_ready(
        actor_forward(obs, prep, action_num=action_num))

    # Reference consumes the same bf16-rounded observation stream the kernel
    # reads, so the comparison only measures kernel-side numerics (MXU default
    # bf16 passes + EUP approximate reciprocal) -> 5e-3 tolerance on probs.
    obs_q = obs.astype(jnp.bfloat16).astype(jnp.float32)
    ref = actor_reference(obs_q, params)

    assert out.shape == (batch, step, action_num), out.shape
    max_err = float(jnp.max(jnp.abs(out - ref)))
    assert max_err < 5e-3, f"max_err={max_err}"
    sum_err = float(jnp.max(jnp.abs(jnp.sum(out, axis=-1) - 1.0)))
    assert sum_err < 5e-3, f"sum_err={sum_err}"

    print("KERNEL_OK")
</pallas_src>

<mosaic_0001>
module attributes {stable_mosaic.version = 11 : i64} {
  func.func @_actor_fused_kernel(%arg0: i32, %arg1: memref<32x768xbf16, #tpu.memory_space<vmem>>, %arg2: memref<768x1024xf32, #tpu.memory_space<vmem>>, %arg3: memref<1x1024xf32, #tpu.memory_space<vmem>>, %arg4: memref<1024x32xf32, #tpu.memory_space<vmem>>, %arg5: memref<1x32xf32, #tpu.memory_space<vmem>>, %arg6: memref<32x32xf32, #tpu.memory_space<vmem>>, %arg7: memref<1x32xf32, #tpu.memory_space<vmem>>, %arg8: memref<32x128xf32, #tpu.memory_space<vmem>>, %arg9: memref<1x128xf32, #tpu.memory_space<vmem>>, %arg10: memref<32x128xf32, #tpu.memory_space<vmem>>) attributes {dimension_semantics = [#tpu.dimension_semantics<parallel>], iteration_bounds = array<i64: 1>, scalar_prefetch = 0 : i64, scratch_operands = 0 : i64, tpu.core_type = #tpu.core_type<tc>, window_params = [{transform_indices = @transform_0, window_bounds = array<i64: 32, 768>}, {pipeline_mode = #tpu.pipeline_mode<synchronous>, transform_indices = @transform_1, window_bounds = array<i64: 768, 1024>}, {pipeline_mode = #tpu.pipeline_mode<synchronous>, transform_indices = @transform_2, window_bounds = array<i64: 1, 1024>}, {pipeline_mode = #tpu.pipeline_mode<synchronous>, transform_indices = @transform_3, window_bounds = array<i64: 1024, 32>}, {pipeline_mode = #tpu.pipeline_mode<synchronous>, transform_indices = @transform_4, window_bounds = array<i64: 1, 32>}, {pipeline_mode = #tpu.pipeline_mode<synchronous>, transform_indices = @transform_5, window_bounds = array<i64: 32, 32>}, {pipeline_mode = #tpu.pipeline_mode<synchronous>, transform_indices = @transform_6, window_bounds = array<i64: 1, 32>}, {pipeline_mode = #tpu.pipeline_mode<synchronous>, transform_indices = @transform_7, window_bounds = array<i64: 32, 128>}, {pipeline_mode = #tpu.pipeline_mode<synchronous>, transform_indices = @transform_8, window_bounds = array<i64: 1, 128>}, {transform_indices = @transform_9, window_bounds = array<i64: 32, 128>}]} {
    %c0 = arith.constant 0 : index
    %c0_0 = arith.constant 0 : index
    %0 = vector.load %arg1[%c0, %c0_0] : memref<32x768xbf16, #tpu.memory_space<vmem>>, vector<32x768xbf16>
    %1 = arith.extf %0 : vector<32x768xbf16> to vector<32x768xf32>
    %c0_1 = arith.constant 0 : index
    %c0_2 = arith.constant 0 : index
    %2 = vector.load %arg2[%c0_1, %c0_2] : memref<768x1024xf32, #tpu.memory_space<vmem>>, vector<768x1024xf32>
    %cst = arith.constant dense<0.000000e+00> : vector<32x1024xf32>
    %3 = tpu.matmul %1, %2, %cst {dimension_numbers = #tpu.dot_dimension_numbers<[1], [0], [0], [1], [0, 0, 1, 1], [], []>} : vector<32x768xf32>, vector<768x1024xf32>, vector<32x1024xf32> -> vector<32x1024xf32>
    %c0_3 = arith.constant 0 : index
    %c0_4 = arith.constant 0 : index
    %4 = vector.load %arg3[%c0_3, %c0_4] : memref<1x1024xf32, #tpu.memory_space<vmem>>, vector<1x1024xf32>
    %5 = vector.broadcast %4 : vector<1x1024xf32> to vector<32x1024xf32>
    %6 = arith.addf %3, %5 : vector<32x1024xf32>
    %cst_5 = arith.constant 0.000000e+00 : f32
    %7 = vector.broadcast %cst_5 : f32 to vector<32x1024xf32>
    %8 = arith.cmpf ogt, %6, %7 : vector<32x1024xf32>
    %cst_6 = arith.constant 0.00999999977 : f32
    %9 = vector.broadcast %cst_6 : f32 to vector<32x1024xf32>
    %10 = arith.mulf %9, %6 : vector<32x1024xf32>
    %11 = arith.select %8, %6, %10 : vector<32x1024xi1>, vector<32x1024xf32>
    %c0_7 = arith.constant 0 : index
    %c0_8 = arith.constant 0 : index
    %12 = vector.load %arg4[%c0_7, %c0_8] : memref<1024x32xf32, #tpu.memory_space<vmem>>, vector<1024x32xf32>
    %cst_9 = arith.constant dense<0.000000e+00> : vector<32x32xf32>
    %13 = tpu.matmul %11, %12, %cst_9 {dimension_numbers = #tpu.dot_dimension_numbers<[1], [0], [0], [1], [0, 0, 1, 1], [], []>} : vector<32x1024xf32>, vector<1024x32xf32>, vector<32x32xf32> -> vector<32x32xf32>
    %c0_10 = arith.constant 0 : index
    %c0_11 = arith.constant 0 : index
    %14 = vector.load %arg5[%c0_10, %c0_11] : memref<1x32xf32, #tpu.memory_space<vmem>>, vector<1x32xf32>
    %15 = vector.broadcast %14 : vector<1x32xf32> to vector<32x32xf32>
    %16 = arith.addf %13, %15 : vector<32x32xf32>
    %cst_12 = arith.constant 0.000000e+00 : f32
    %17 = vector.broadcast %cst_12 : f32 to vector<32x32xf32>
    %18 = arith.cmpf ogt, %16, %17 : vector<32x32xf32>
    %cst_13 = arith.constant 0.00999999977 : f32
    %19 = vector.broadcast %cst_13 : f32 to vector<32x32xf32>
    %20 = arith.mulf %19, %16 : vector<32x32xf32>
    %21 = arith.select %18, %16, %20 : vector<32x32xi1>, vector<32x32xf32>
    %c0_14 = arith.constant 0 : index
    %c0_15 = arith.constant 0 : index
    %22 = vector.load %arg6[%c0_14, %c0_15] : memref<32x32xf32, #tpu.memory_space<vmem>>, vector<32x32xf32>
    %cst_16 = arith.constant dense<0.000000e+00> : vector<32x32xf32>
    %23 = tpu.matmul %21, %22, %cst_16 {dimension_numbers = #tpu.dot_dimension_numbers<[1], [0], [0], [1], [0, 0, 1, 1], [], []>} : vector<32x32xf32>, vector<32x32xf32>, vector<32x32xf32> -> vector<32x32xf32>
    %c0_17 = arith.constant 0 : index
    %c0_18 = arith.constant 0 : index
    %24 = vector.load %arg7[%c0_17, %c0_18] : memref<1x32xf32, #tpu.memory_space<vmem>>, vector<1x32xf32>
    %25 = vector.broadcast %24 : vector<1x32xf32> to vector<32x32xf32>
    %26 = arith.addf %23, %25 : vector<32x32xf32>
    %cst_19 = arith.constant 0.000000e+00 : f32
    %27 = vector.broadcast %cst_19 : f32 to vector<32x32xf32>
    %28 = arith.cmpf ogt, %26, %27 : vector<32x32xf32>
    %cst_20 = arith.constant 0.00999999977 : f32
    %29 = vector.broadcast %cst_20 : f32 to vector<32x32xf32>
    %30 = arith.mulf %29, %26 : vector<32x32xf32>
    %31 = arith.select %28, %26, %30 : vector<32x32xi1>, vector<32x32xf32>
    %c0_21 = arith.constant 0 : index
    %c0_22 = arith.constant 0 : index
    %32 = vector.load %arg8[%c0_21, %c0_22] : memref<32x128xf32, #tpu.memory_space<vmem>>, vector<32x128xf32>
    %cst_23 = arith.constant dense<0.000000e+00> : vector<32x128xf32>
    %33 = tpu.matmul %31, %32, %cst_23 {dimension_numbers = #tpu.dot_dimension_numbers<[1], [0], [0], [1], [0, 0, 1, 1], [], []>} : vector<32x32xf32>, vector<32x128xf32>, vector<32x128xf32> -> vector<32x128xf32>
    %c0_24 = arith.constant 0 : index
    %c0_25 = arith.constant 0 : index
    %34 = vector.load %arg9[%c0_24, %c0_25] : memref<1x128xf32, #tpu.memory_space<vmem>>, vector<1x128xf32>
    %35 = vector.broadcast %34 : vector<1x128xf32> to vector<32x128xf32>
    %36 = arith.addf %33, %35 : vector<32x128xf32>
    %cst_26 = arith.constant dense<0xFF800000> : vector<32xf32>
    %37 = vector.multi_reduction <maximumf>, %36, %cst_26 [1] : vector<32x128xf32> to vector<32xf32>
    %38 = vector.shape_cast %37 : vector<32xf32> to vector<32x1xf32>
    %39 = vector.broadcast %38 : vector<32x1xf32> to vector<32x128xf32>
    %40 = arith.subf %36, %39 : vector<32x128xf32>
    %41 = math.exp %40 : vector<32x128xf32>
    %cst_27 = arith.constant dense<0.000000e+00> : vector<32xf32>
    %42 = vector.multi_reduction <add>, %41, %cst_27 [1] : vector<32x128xf32> to vector<32xf32>
    %43 = vector.shape_cast %42 : vector<32xf32> to vector<32x1xf32>
    %44 = tpu.reciprocal %43 {approx = true} : vector<32x1xf32> -> vector<32x1xf32>
    %45 = vector.broadcast %44 : vector<32x1xf32> to vector<32x128xf32>
    %46 = arith.mulf %41, %45 : vector<32x128xf32>
    %c0_28 = arith.constant 0 : index
    %c0_29 = arith.constant 0 : index
    %47 = vector.load %arg10[%c0_28, %c0_29] : memref<32x128xf32, #tpu.memory_space<vmem>>, vector<32x128xf32>
    tpu.vector_store %arg10[%c0_28, %c0_29], %46 {strides = array<i32>} : memref<32x128xf32, #tpu.memory_space<vmem>>, vector<32x128xf32>,
    return
  }
  func.func @transform_0(%arg0: i32) -> (i32, i32) {
    %c0_i32 = arith.constant 0 : i32
    %c0_i32_0 = arith.constant 0 : i32
    return %arg0, %c0_i32 : i32, i32
  }
  func.func @transform_1(%arg0: i32) -> (i32, i32) {
    %c0_i32 = arith.constant 0 : i32
    %c0_i32_0 = arith.constant 0 : i32
    %c0_i32_1 = arith.constant 0 : i32
    return %c0_i32, %c0_i32_0 : i32, i32
  }
  func.func @transform_2(%arg0: i32) -> (i32, i32) {
    %c0_i32 = arith.constant 0 : i32
    %c0_i32_0 = arith.constant 0 : i32
    %c0_i32_1 = arith.constant 0 : i32
    return %c0_i32, %c0_i32_0 : i32, i32
  }
  func.func @transform_3(%arg0: i32) -> (i32, i32) {
    %c0_i32 = arith.constant 0 : i32
    %c0_i32_0 = arith.constant 0 : i32
    %c0_i32_1 = arith.constant 0 : i32
    return %c0_i32, %c0_i32_0 : i32, i32
  }
  func.func @transform_4(%arg0: i32) -> (i32, i32) {
    %c0_i32 = arith.constant 0 : i32
    %c0_i32_0 = arith.constant 0 : i32
    %c0_i32_1 = arith.constant 0 : i32
    return %c0_i32, %c0_i32_0 : i32, i32
  }
  func.func @transform_5(%arg0: i32) -> (i32, i32) {
    %c0_i32 = arith.constant 0 : i32
    %c0_i32_0 = arith.constant 0 : i32
    %c0_i32_1 = arith.constant 0 : i32
    return %c0_i32, %c0_i32_0 : i32, i32
  }
  func.func @transform_6(%arg0: i32) -> (i32, i32) {
    %c0_i32 = arith.constant 0 : i32
    %c0_i32_0 = arith.constant 0 : i32
    %c0_i32_1 = arith.constant 0 : i32
    return %c0_i32, %c0_i32_0 : i32, i32
  }
  func.func @transform_7(%arg0: i32) -> (i32, i32) {
    %c0_i32 = arith.constant 0 : i32
    %c0_i32_0 = arith.constant 0 : i32
    %c0_i32_1 = arith.constant 0 : i32
    return %c0_i32, %c0_i32_0 : i32, i32
  }
  func.func @transform_8(%arg0: i32) -> (i32, i32) {
    %c0_i32 = arith.constant 0 : i32
    %c0_i32_0 = arith.constant 0 : i32
    %c0_i32_1 = arith.constant 0 : i32
    return %c0_i32, %c0_i32_0 : i32, i32
  }
  func.func @transform_9(%arg0: i32) -> (i32, i32) {
    %c0_i32 = arith.constant 0 : i32
    %c0_i32_0 = arith.constant 0 : i32
    return %arg0, %c0_i32 : i32, i32
  }
}

</mosaic_0001>

<bundles_post_ra>
// kernel: actor_forward.1
= control target key start
LH: loop header
LB: loop body
LE: loop exit
PB: predicated region body
PF: predicated region fallthrough
CT: control target
= control target key end

     0   :  { %14 = vsyncpa [#allocation3], 0  ;;  %s5281_s0 = inlined_call_operand.vmem [shape: bf16[32,768], index: 0, kind: input, shape index: {}]   ;;  %s5282_s1 = inlined_call_operand.hbm [shape: f32[768,1024], index: 1, kind: input, shape index: {}]   ;;  %s5283_s2 = inlined_call_operand.hbm [shape: f32[1,1024], index: 2, kind: input, shape index: {}]   ;;  %s5284_s3 = inlined_call_operand.vmem [shape: f32[1024,32], index: 3, kind: input, shape index: {}]   ;;  %s5285_s4 = inlined_call_operand.hbm [shape: f32[1,32], index: 4, kind: input, shape index: {}]   ;;  %s5286_s5 = inlined_call_operand.hbm [shape: f32[32,32], index: 5, kind: input, shape index: {}]   ;;  %s5287_s6 = inlined_call_operand.hbm [shape: f32[1,32], index: 6, kind: input, shape index: {}]   ;;  %s5288_s7 = inlined_call_operand.hbm [shape: f32[32,128], index: 7, kind: input, shape index: {}]   ;;  %s5289_s8 = inlined_call_operand.hbm [shape: f32[1,128], index: 8, kind: input, shape index: {}]   ;;  %s5290_s9 = inlined_call_operand.vmem [shape: f32[32,128], index: 9, kind: output, shape index: {}]  }
   0x1   :  { %15 = vsyncpa [#allocation5], 0 }
   0x2   :  { %16 = vsyncpa [#allocation8], 0 }
   0x3   :  { %17 = vsyncpa [#allocation11], 0  ;;  %s4321_s30 = smov [#allocation4]   ;;  %s4322_s11 = smov [#allocation7]  }
   0x4   :  { %s38_s10 = sshll.u32 %s4321_s30, 4  ;;  %s59_s12 = sshll.u32 %s4322_s11, 4  ;;  %s39_s10 = int_to_ptr.vmem [resolvable:$true] %s38_s10  ;;  %s4382_s12 = int_to_ptr.vmem [resolvable:$true] %s59_s12 }
   0x5   :  { %s4159_s15 = scalar_lea.hbm %s5283_s2, 128 }
   0x6   :  { %p4160_p0 = scmp.ne.s32.totalorder %s5283_s2, %s4159_s15  ;;  %p4163_p1 = scmp.lt.u32.totalorder %s4159_s15, %s5283_s2 }
   0x8   :  { %p4165_p2 = pnand %p4163_p1, %p4160_p0 }
   0xa   :  { %4168 = shalt.err (!%p4165_p2)
}
   0xb   :  { %s4169_s20 = scalar_lea.vmem %s39_s10, 128  ;;  %p4174_p4 = scmp.lt.s32.totalorder %s39_s10, %s39_s10 }
   0xc   :  { %p4170_p3 = scmp.ne.s32.totalorder %s39_s10, %s4169_s20  ;;  %p4175_p5 = scmp.lt.s32.totalorder %s4169_s20, %s4169_s20 }
   0xe   :  { %p4176_p6 = por %p4175_p5, %p4174_p4 }
  0x10   :  { %p4177_p7 = pnand %p4176_p6, %p4170_p3 }
  0x12   :  { %4180 = shalt.err (!%p4177_p7)
}
  0x13   :  { %41 = dma.hbm_to_vmem [thread:$0]  %s5283_s2, 128, %s39_s10, [#allocation5]  }
  0x14   :  { %s4181_s25 = scalar_lea.hbm %s5286_s5, 512 }
  0x15   :  { %p4182_p8 = scmp.ne.s32.totalorder %s5286_s5, %s4181_s25  ;;  %p4185_p9 = scmp.lt.u32.totalorder %s4181_s25, %s5286_s5 }
  0x17   :  { %p4187_p10 = pnand %p4185_p9, %p4182_p8 }
  0x19   :  { %4190 = shalt.err (!%p4187_p10)
}
  0x1a   :  { %s4191_s30 = scalar_lea.vmem %s4382_s12, 512  ;;  %p4196_p12 = scmp.lt.s32.totalorder %s4382_s12, %s4382_s12 }
  0x1b   :  { %p4192_p11 = scmp.ne.s32.totalorder %s4382_s12, %s4191_s30  ;;  %p4197_p13 = scmp.lt.s32.totalorder %s4191_s30, %s4191_s30 }
  0x1d   :  { %p4198_p0 = por %p4197_p13, %p4196_p12 }
  0x1f   :  { %p4199_p1 = pnand %p4198_p0, %p4192_p11 }
  0x21   :  { %4202 = shalt.err (!%p4199_p1)
}
  0x22   :  { %s4323_s2 = smov 128   ;;  %s4324_s10 = smov 8  }
  0x23   :  { %65 = dma.hbm_to_vmem [thread:$0]  %s5286_s5, 512, %s4382_s12, [#allocation8], %s4323_s2, %s4323_s2, %s4324_s10  }
  0x24   :  { %s4325_s14 = smov [#allocation10]   ;;  %s4326_s16 = smov [#allocation2]  }
  0x25   :  { %s81_s15 = sshll.u32 %s4325_s14, 4  ;;  %s25_s17 = sshll.u32 %s4326_s16, 4  ;;  %s82_s15 = int_to_ptr.vmem [resolvable:$true] %s81_s15  ;;  %s4413_s17 = int_to_ptr.vmem [resolvable:$true] %s25_s17 }
  0x26   :  { %s4203_s20 = scalar_lea.hbm %s5288_s7, 512 }
  0x27   :  { %p4204_p2 = scmp.ne.s32.totalorder %s5288_s7, %s4203_s20  ;;  %p4207_p3 = scmp.lt.u32.totalorder %s4203_s20, %s5288_s7 }
  0x29   :  { %p4209_p4 = pnand %p4207_p3, %p4204_p2 }
  0x2b   :  { %4212 = shalt.err (!%p4209_p4)
}
  0x2c   :  { %s4213_s5 = scalar_lea.vmem %s82_s15, 512  ;;  %p4218_p6 = scmp.lt.s32.totalorder %s82_s15, %s82_s15 }
  0x2d   :  { %p4214_p5 = scmp.ne.s32.totalorder %s82_s15, %s4213_s5  ;;  %p4219_p7 = scmp.lt.s32.totalorder %s4213_s5, %s4213_s5 }
  0x2f   :  { %p4220_p8 = por %p4219_p7, %p4218_p6 }
  0x31   :  { %p4221_p9 = pnand %p4220_p8, %p4214_p5 }
  0x33   :  { %4224 = shalt.err (!%p4221_p9)
}
  0x34   :  { %87 = dma.hbm_to_vmem [thread:$0]  %s5288_s7, 512, %s82_s15, [#allocation11], %s4323_s2, %s4323_s2, %s4324_s10  }
  0x35   :  { %s4225_s28 = scalar_lea.hbm %s5282_s1, 98304 }
  0x36   :  { %p4226_p10 = scmp.ne.s32.totalorder %s5282_s1, %s4225_s28  ;;  %p4229_p11 = scmp.lt.u32.totalorder %s4225_s28, %s5282_s1 }
  0x38   :  { %p4231_p12 = pnand %p4229_p11, %p4226_p10 }
  0x3a   :  { %4234 = shalt.err (!%p4231_p12)
}
  0x3b   :  { %s4235_s14 = scalar_lea.vmem %s4413_s17, 98304  ;;  %p4240_p0 = scmp.lt.s32.totalorder %s4413_s17, %s4413_s17 }
  0x3c   :  { %p4236_p13 = scmp.ne.s32.totalorder %s4413_s17, %s4235_s14  ;;  %p4241_p1 = scmp.lt.s32.totalorder %s4235_s14, %s4235_s14 }
  0x3e   :  { %p4242_p2 = por %p4241_p1, %p4240_p0 }
  0x40   :  { %p4243_p3 = pnand %p4242_p2, %p4236_p13 }
  0x42   :  { %4246 = shalt.err (!%p4243_p3)
}
  0x43   :  { %s4327_s7 = smov 1024   ;;  %s4328_s2 = smov 64  }
  0x44   :  { %31 = dma.hbm_to_vmem [thread:$0]  %s5282_s1, 98304, %s4413_s17, [#allocation3], %s4327_s7, %s4327_s7, %s4328_s2  }
  0x45   :  { %s4329_s16 = smov [#allocation6]   ;;  %s4330_s19 = smov [#allocation9]  }
  0x46   :  { %s50_s18 = sshll.u32 %s4329_s16, 4  ;;  %s72_s20 = sshll.u32 %s4330_s19, 4  ;;  %s51_s18 = int_to_ptr.vmem [resolvable:$true] %s50_s18  ;;  %s73_s20 = int_to_ptr.vmem [resolvable:$true] %s72_s20 }
  0x47   :  { %s4247_s23 = scalar_lea.hbm %s5285_s4, 16 }
  0x48   :  { %p4248_p4 = scmp.ne.s32.totalorder %s5285_s4, %s4247_s23  ;;  %p4251_p5 = scmp.lt.u32.totalorder %s4247_s23, %s5285_s4 }
  0x4a   :  { %p4253_p6 = pnand %p4251_p5, %p4248_p4 }
  0x4c   :  { %4256 = shalt.err (!%p4253_p6)
}
  0x4d   :  { %s4257_s1 = scalar_lea.vmem %s51_s18, 16  ;;  %s4261_s17 = scalar_lea.vmem %s51_s18, 32 }
  0x4e   :  { %p4258_p7 = scmp.ne.s32.totalorder %s51_s18, %s4257_s1  ;;  %p4262_p8 = scmp.lt.s32.totalorder %s51_s18, %s51_s18 }
  0x4f   :  { %p4263_p9 = scmp.lt.s32.totalorder %s4261_s17, %s4257_s1 }
  0x51   :  { %p4264_p10 = por %p4263_p9, %p4262_p8 }
  0x53   :  { %p4265_p11 = pnand %p4264_p10, %p4258_p7 }
  0x55   :  { %4268 = shalt.err (!%p4265_p11)
}
  0x56   :  { %53 = dma.hbm_to_vmem [thread:$0]  %s5285_s4, 16, %s51_s18, [#allocation5]  }
  0x57   :  { %s4269_s30 = scalar_lea.hbm %s5287_s6, 16 }
  0x58   :  { %p4270_p12 = scmp.ne.s32.totalorder %s5287_s6, %s4269_s30  ;;  %p4273_p13 = scmp.lt.u32.totalorder %s4269_s30, %s5287_s6 }
  0x5a   :  { %p4275_p0 = pnand %p4273_p13, %p4270_p12 }
  0x5c   :  { %4278 = shalt.err (!%p4275_p0)
}
  0x5d   :  { %s4279_s2 = scalar_lea.vmem %s73_s20, 16  ;;  %s4283_s10 = scalar_lea.vmem %s73_s20, 32 }
  0x5e   :  { %p4280_p1 = scmp.ne.s32.totalorder %s73_s20, %s4279_s2  ;;  %p4284_p2 = scmp.lt.s32.totalorder %s73_s20, %s73_s20 }
  0x5f   :  { %p4285_p3 = scmp.lt.s32.totalorder %s4283_s10, %s4279_s2 }
  0x61   :  { %p4286_p4 = por %p4285_p3, %p4284_p2 }
  0x63   :  { %p4287_p5 = pnand %p4286_p4, %p4280_p1 }
  0x65   :  { %4290 = shalt.err (!%p4287_p5)
}
  0x66   :  { %75 = dma.hbm_to_vmem [thread:$0]  %s5287_s6, 16, %s73_s20, [#allocation8]  }
  0x67   :  { %s4331_s16 = smov [#allocation12]   ;;  %s4291_s22 = scalar_lea.hbm %s5289_s8, 16 }
  0x68   :  { %s94_s18 = sshll.u32 %s4331_s16, 4  ;;  %p4292_p6 = scmp.ne.s32.totalorder %s5289_s8, %s4291_s22  ;;  %s95_s18 = int_to_ptr.vmem [resolvable:$true] %s94_s18 }
  0x69   :  { %p4295_p7 = scmp.lt.u32.totalorder %s4291_s22, %s5289_s8 }
  0x6b   :  { %p4297_p8 = pnand %p4295_p7, %p4292_p6 }
  0x6d   :  { %4300 = shalt.err (!%p4297_p8)
}
  0x6e   :  { %s4301_s25 = scalar_lea.vmem %s95_s18, 16  ;;  %s4305_s6 = scalar_lea.vmem %s95_s18, 32 }
  0x6f   :  { %p4302_p9 = scmp.ne.s32.totalorder %s95_s18, %s4301_s25  ;;  %p4306_p10 = scmp.lt.s32.totalorder %s95_s18, %s95_s18 }
  0x70   :  { %p4307_p11 = scmp.lt.s32.totalorder %s4305_s6, %s4301_s25 }
  0x72   :  { %p4308_p12 = por %p4307_p11, %p4306_p10 }
  0x74   :  { %p4309_p13 = pnand %p4308_p12, %p4302_p9 }
  0x76   :  { %4312 = shalt.err (!%p4309_p13)
}
  0x77   :  { %97 = dma.hbm_to_vmem [thread:$0]  %s5289_s8, 16, %s95_s18, [#allocation11]  }
  0x78   :  { %4313 = dma.done.wait [#allocation3], 98304  }
  0x79   :  { %4314 = vsyncadd [#allocation3], 4294868992 }
  0x7a   :  { %4315 = dma.done.wait [#allocation5], 144  }
  0x7b   :  { %4316 = vsyncadd [#allocation5], 4294967152 }
  0x7c   :  { %4317 = dma.done.wait [#allocation8], 528  }
  0x7d   :  { %4318 = vsyncadd [#allocation8], 4294966768 }
  0x7e   :  { %4319 = dma.done.wait [#allocation11], 528  }
  0x7f   :  { %4320 = vsyncadd [#allocation11], 4294966768  ;;  %v156_v0 = vld [vmem:[#allocation2 + $0x8] sm:$0xff]  ;;  %v158_v2 = vld [vmem:[#allocation2 + $0x18] sm:$0xff] }
  0x80   :  { %v164_v1 = vld [vmem:[#allocation2 + $0x48] sm:$0xff]  ;;  %v166_v4 = vld [vmem:[#allocation2 + $0x58] sm:$0xff]  ;;  %v155_v5 = vld [vmem:[#allocation2] sm:$0xff] }
  0x81   :  { %v3124_v3 = vpack.c.bf16 %v164_v1, %v156_v0  ;;  %v163_v6 = vld [vmem:[#allocation2 + $0x40] sm:$0xff]  ;;  %v3316_v7 = vpack.c.bf16 %v166_v4, %v158_v2  ;;  %v157_v9 = vld [vmem:[#allocation2 + $0x10] sm:$0xff]  ;;  %v172_v11 = vld [vmem:[#allocation2 + $0x88] sm:$0xff] }
  0x82   :  { %v3126_v8 = vpack.c.bf16 %v163_v6, %v155_v5  ;;  %v165_v10 = vld [vmem:[#allocation2 + $0x50] sm:$0xff]  ;;  %v180_v13 = vld [vmem:[#allocation2 + $0xc8] sm:$0xff]  ;;  %v174_v14 = vld [vmem:[#allocation2 + $0x98] sm:$0xff] }
  0x83   :  { %3125 = vmatprep.subr.bf16.mxu0 %v3124_v3  ;;  %v3318_v12 = vpack.c.bf16 %v165_v10, %v157_v9  ;;  %v182_v15 = vld [vmem:[#allocation2 + $0xd8] sm:$0xff]  ;;  %3317 = vmatprep.subr.bf16.mxu1 %v3316_v7  ;;  %v3128_v16 = vpack.c.bf16 %v180_v13, %v172_v11  ;;  %v171_v18 = vld [vmem:[#allocation2 + $0x80] sm:$0xff]  ;;  %v173_v20 = vld [vmem:[#allocation2 + $0x90] sm:$0xff] }
  0x84   :  { %3127 = vmatpush1.bf16.msra.mxu0 %v3126_v8  ;;  %v3320_v17 = vpack.c.bf16 %v182_v15, %v174_v14  ;;  %v179_v19 = vld [vmem:[#allocation2 + $0xc0] sm:$0xff]  ;;  %v181_v22 = vld [vmem:[#allocation2 + $0xd0] sm:$0xff]  ;;  %v188_v23 = vld [vmem:[#allocation2 + $0x108] sm:$0xff] }
  0x85   :  { %3319 = vmatpush1.bf16.msra.mxu1 %v3318_v12  ;;  %v3130_v21 = vpack.c.bf16 %v179_v19, %v171_v18  ;;  %v196_v24 = vld [vmem:[#allocation2 + $0x148] sm:$0xff]  ;;  %3129 = vmatprep.subr.bf16.mxu0 %v3128_v16  ;;  %v3322_v25 = vpack.c.bf16 %v181_v22, %v173_v20  ;;  %v190_v27 = vld [vmem:[#allocation2 + $0x118] sm:$0xff]  ;;  %v187_v29 = vld [vmem:[#allocation2 + $0x100] sm:$0xff] }
  0x86   :  { %3321 = vmatprep.subr.bf16.mxu1 %v3320_v17  ;;  %v3132_v26 = vpack.c.bf16 %v196_v24, %v188_v23  ;;  %v198_v28 = vld [vmem:[#allocation2 + $0x158] sm:$0xff]  ;;  %v195_v31 = vld [vmem:[#allocation2 + $0x140] sm:$0xff]  ;;  %v189_v32 = vld [vmem:[#allocation2 + $0x110] sm:$0xff] }
  0x87   :  { %v3324_v30 = vpack.c.bf16 %v198_v28, %v190_v27  ;;  %v197_v33 = vld [vmem:[#allocation2 + $0x150] sm:$0xff]  ;;  %v3134_v34 = vpack.c.bf16 %v195_v31, %v187_v29  ;;  %v204_v35 = vld [vmem:[#allocation2 + $0x188] sm:$0xff]  ;;  %v206_v37 = vld [vmem:[#allocation2 + $0x198] sm:$0xff] }
  0x88   :  { %3131 = vmatpush1.bf16.msra.mxu0 %v3130_v21  ;;  %v212_v36 = vld [vmem:[#allocation2 + $0x1c8] sm:$0xff]  ;;  %v3326_v38 = vpack.c.bf16 %v197_v33, %v189_v32  ;;  %v214_v40 = vld [vmem:[#allocation2 + $0x1d8] sm:$0xff]  ;;  %v203_v41 = vld [vmem:[#allocation2 + $0x180] sm:$0xff] }
  0x89   :  { %3323 = vmatpush1.bf16.msra.mxu1 %v3322_v25  ;;  %3133 = vmatprep.subr.bf16.mxu0 %v3132_v26  ;;  %v3136_v39 = vpack.c.bf16 %v212_v36, %v204_v35  ;;  %v211_v42 = vld [vmem:[#allocation2 + $0x1c0] sm:$0xff]  ;;  %v3328_v43 = vpack.c.bf16 %v214_v40, %v206_v37  ;;  %v205_v44 = vld [vmem:[#allocation2 + $0x190] sm:$0xff]  ;;  %v220_v46 = vld [vmem:[#allocation2 + $0x208] sm:$0xff] }
  0x8a   :  { %3325 = vmatprep.subr.bf16.mxu1 %v3324_v30  ;;  %v213_v45 = vld [vmem:[#allocation2 + $0x1d0] sm:$0xff]  ;;  %v228_v47 = vld [vmem:[#allocation2 + $0x248] sm:$0xff]  ;;  %v222_v48 = vld [vmem:[#allocation2 + $0x218] sm:$0xff]  ;;  %v3138_v50 = vpack.c.bf16 %v211_v42, %v203_v41 }
  0x8b   :  { %v230_v49 = vld [vmem:[#allocation2 + $0x258] sm:$0xff]  ;;  %v3330_v51 = vpack.c.bf16 %v213_v45, %v205_v44  ;;  %v3140_v52 = vpack.c.bf16 %v228_v47, %v220_v46  ;;  %v219_v53 = vld [vmem:[#allocation2 + $0x200] sm:$0xff]  ;;  %v221_v55 = vld [vmem:[#allocation2 + $0x210] sm:$0xff] }
  0x8c   :  { %3135 = vmatpush1.bf16.msra.mxu0 %v3134_v34  ;;  %v227_v54 = vld [vmem:[#allocation2 + $0x240] sm:$0xff]  ;;  %v3332_v56 = vpack.c.bf16 %v230_v49, %v222_v48  ;;  %v229_v57 = vld [vmem:[#allocation2 + $0x250] sm:$0xff]  ;;  %v236_v58 = vld [vmem:[#allocation2 + $0x288] sm:$0xff] }
  0x8d   :  { %3327 = vmatpush1.bf16.msra.mxu1 %v3326_v38  ;;  %3137 = vmatprep.subr.bf16.mxu0 %v3136_v39  ;;  %v244_v59 = vld [vmem:[#allocation2 + $0x2c8] sm:$0xff]  ;;  %v238_v60 = vld [vmem:[#allocation2 + $0x298] sm:$0xff]  ;;  %v3142_v62 = vpack.c.bf16 %v227_v54, %v219_v53  ;;  %v3334_v63 = vpack.c.bf16 %v229_v57, %v221_v55  ;;  %v235_v1 = vld [vmem:[#allocation2 + $0x280] sm:$0xff] }
  0x8e   :  { %3329 = vmatprep.subr.bf16.mxu1 %v3328_v43  ;;  %v246_v61 = vld [vmem:[#allocation2 + $0x2d8] sm:$0xff]  ;;  %v3144_v0 = vpack.c.bf16 %v244_v59, %v236_v58  ;;  %v243_v2 = vld [vmem:[#allocation2 + $0x2c0] sm:$0xff]  ;;  %v237_v3 = vld [vmem:[#allocation2 + $0x290] sm:$0xff] }
  0x8f   :  { %v3336_v4 = vpack.c.bf16 %v246_v61, %v238_v60  ;;  %v245_v5 = vld [vmem:[#allocation2 + $0x2d0] sm:$0xff]  ;;  %v252_v6 = vld [vmem:[#allocation2 + $0x308] sm:$0xff]  ;;  %v254_v8 = vld [vmem:[#allocation2 + $0x318] sm:$0xff]  ;;  %v3146_v10 = vpack.c.bf16 %v243_v2, %v235_v1 }
  0x90   :  { %3139 = vmatpush1.bf16.msra.mxu0 %v3138_v50  ;;  %v260_v7 = vld [vmem:[#allocation2 + $0x348] sm:$0xff]  ;;  %v262_v9 = vld [vmem:[#allocation2 + $0x358] sm:$0xff]  ;;  %v3338_v11 = vpack.c.bf16 %v245_v5, %v237_v3  ;;  %v251_v13 = vld [vmem:[#allocation2 + $0x300] sm:$0xff] }
  0x91   :  { %3331 = vmatpush1.bf16.msra.mxu1 %v3330_v51  ;;  %3141 = vmatprep.subr.bf16.mxu0 %v3140_v52  ;;  %v3148_v12 = vpack.c.bf16 %v260_v7, %v252_v6  ;;  %v259_v14 = vld [vmem:[#allocation2 + $0x340] sm:$0xff]  ;;  %v253_v15 = vld [vmem:[#allocation2 + $0x310] sm:$0xff]  ;;  %v3340_v16 = vpack.c.bf16 %v262_v9, %v254_v8  ;;  %v268_v18 = vld [vmem:[#allocation2 + $0x388] sm:$0xff] }
  0x92   :  { %3333 = vmatprep.subr.bf16.mxu1 %v3332_v56  ;;  %v261_v17 = vld [vmem:[#allocation2 + $0x350] sm:$0xff]  ;;  %v276_v19 = vld [vmem:[#allocation2 + $0x3c8] sm:$0xff]  ;;  %v270_v20 = vld [vmem:[#allocation2 + $0x398] sm:$0xff]  ;;  %v3150_v22 = vpack.c.bf16 %v259_v14, %v251_v13 }
  0x93   :  { %v278_v21 = vld [vmem:[#allocation2 + $0x3d8] sm:$0xff]  ;;  %v3342_v23 = vpack.c.bf16 %v261_v17, %v253_v15  ;;  %v3152_v24 = vpack.c.bf16 %v276_v19, %v268_v18  ;;  %v267_v25 = vld [vmem:[#allocation2 + $0x380] sm:$0xff]  ;;  %v269_v27 = vld [vmem:[#allocation2 + $0x390] sm:$0xff] }
  0x94   :  { %3143 = vmatpush1.bf16.msra.mxu0 %v3142_v62  ;;  %v275_v26 = vld [vmem:[#allocation2 + $0x3c0] sm:$0xff]  ;;  %v3344_v28 = vpack.c.bf16 %v278_v21, %v270_v20  ;;  %v277_v29 = vld [vmem:[#allocation2 + $0x3d0] sm:$0xff]  ;;  %v284_v30 = vld [vmem:[#allocation2 + $0x408] sm:$0xff] }
  0x95   :  { %3335 = vmatpush1.bf16.msra.mxu1 %v3334_v63  ;;  %3145 = vmatprep.subr.bf16.mxu0 %v3144_v0  ;;  %v292_v31 = vld [vmem:[#allocation2 + $0x448] sm:$0xff]  ;;  %v286_v32 = vld [vmem:[#allocation2 + $0x418] sm:$0xff]  ;;  %v3154_v34 = vpack.c.bf16 %v275_v26, %v267_v25  ;;  %v3346_v35 = vpack.c.bf16 %v277_v29, %v269_v27  ;;  %v283_v37 = vld [vmem:[#allocation2 + $0x400] sm:$0xff] }
  0x96   :  { %3337 = vmatprep.subr.bf16.mxu1 %v3336_v4  ;;  %v294_v33 = vld [vmem:[#allocation2 + $0x458] sm:$0xff]  ;;  %v3156_v36 = vpack.c.bf16 %v292_v31, %v284_v30  ;;  %v291_v38 = vld [vmem:[#allocation2 + $0x440] sm:$0xff]  ;;  %v285_v39 = vld [vmem:[#allocation2 + $0x410] sm:$0xff] }
  0x97   :  { %v3348_v40 = vpack.c.bf16 %v294_v33, %v286_v32  ;;  %v293_v41 = vld [vmem:[#allocation2 + $0x450] sm:$0xff]  ;;  %v300_v42 = vld [vmem:[#allocation2 + $0x488] sm:$0xff]  ;;  %v302_v44 = vld [vmem:[#allocation2 + $0x498] sm:$0xff]  ;;  %v3158_v46 = vpack.c.bf16 %v291_v38, %v283_v37 }
  0x98   :  { %3147 = vmatpush1.bf16.msra.mxu0 %v3146_v10  ;;  %v308_v43 = vld [vmem:[#allocation2 + $0x4c8] sm:$0xff]  ;;  %v310_v45 = vld [vmem:[#allocation2 + $0x4d8] sm:$0xff]  ;;  %v3350_v47 = vpack.c.bf16 %v293_v41, %v285_v39  ;;  %v299_v49 = vld [vmem:[#allocation2 + $0x480] sm:$0xff] }
  0x99   :  { %3339 = vmatpush1.bf16.msra.mxu1 %v3338_v11  ;;  %3149 = vmatprep.subr.bf16.mxu0 %v3148_v12  ;;  %v3160_v48 = vpack.c.bf16 %v308_v43, %v300_v42  ;;  %v307_v50 = vld [vmem:[#allocation2 + $0x4c0] sm:$0xff]  ;;  %v301_v51 = vld [vmem:[#allocation2 + $0x490] sm:$0xff]  ;;  %v3352_v52 = vpack.c.bf16 %v310_v45, %v302_v44  ;;  %v316_v54 = vld [vmem:[#allocation2 + $0x508] sm:$0xff] }
  0x9a   :  { %3341 = vmatprep.subr.bf16.mxu1 %v3340_v16  ;;  %v309_v53 = vld [vmem:[#allocation2 + $0x4d0] sm:$0xff]  ;;  %v324_v55 = vld [vmem:[#allocation2 + $0x548] sm:$0xff]  ;;  %v318_v56 = vld [vmem:[#allocation2 + $0x518] sm:$0xff]  ;;  %v3162_v58 = vpack.c.bf16 %v307_v50, %v299_v49 }
  0x9b   :  { %v326_v57 = vld [vmem:[#allocation2 + $0x558] sm:$0xff]  ;;  %v3354_v59 = vpack.c.bf16 %v309_v53, %v301_v51  ;;  %v3164_v60 = vpack.c.bf16 %v324_v55, %v316_v54  ;;  %v315_v61 = vld [vmem:[#allocation2 + $0x500] sm:$0xff]  ;;  %v317_v63 = vld [vmem:[#allocation2 + $0x510] sm:$0xff] }
  0x9c   :  { %3151 = vmatpush1.bf16.msra.mxu0 %v3150_v22  ;;  %v323_v62 = vld [vmem:[#allocation2 + $0x540] sm:$0xff]  ;;  %v3356_v0 = vpack.c.bf16 %v326_v57, %v318_v56  ;;  %v325_v1 = vld [vmem:[#allocation2 + $0x550] sm:$0xff]  ;;  %v332_v2 = vld [vmem:[#allocation2 + $0x588] sm:$0xff] }
  0x9d   :  { %3343 = vmatpush1.bf16.msra.mxu1 %v3342_v23  ;;  %3153 = vmatprep.subr.bf16.mxu0 %v3152_v24  ;;  %v340_v3 = vld [vmem:[#allocation2 + $0x5c8] sm:$0xff]  ;;  %v334_v4 = vld [vmem:[#allocation2 + $0x598] sm:$0xff]  ;;  %v3166_v6 = vpack.c.bf16 %v323_v62, %v315_v61  ;;  %v331_v7 = vld [vmem:[#allocation2 + $0x580] sm:$0xff]  ;;  %v3358_v8 = vpack.c.bf16 %v325_v1, %v317_v63 }
  0x9e   :  { %3345 = vmatprep.subr.bf16.mxu1 %v3344_v28  ;;  %v342_v5 = vld [vmem:[#allocation2 + $0x5d8] sm:$0xff]  ;;  %v3168_v9 = vpack.c.bf16 %v340_v3, %v332_v2  ;;  %v339_v10 = vld [vmem:[#allocation2 + $0x5c0] sm:$0xff]  ;;  %v333_v11 = vld [vmem:[#allocation2 + $0x590] sm:$0xff] }
  0x9f   :  { %v341_v12 = vld [vmem:[#allocation2 + $0x5d0] sm:$0xff]  ;;  %v3360_v13 = vpack.c.bf16 %v342_v5, %v334_v4  ;;  %v348_v14 = vld [vmem:[#allocation2 + $0x608] sm:$0xff]  ;;  %v4483_v16 = vld [vmem:[%s5281_s0] sm:$0xff]  ;;  %v3170_v20 = vpack.c.bf16 %v339_v10, %v331_v7 }
  0xa0   :  { %3155 = vmatpush1.bf16.msra.mxu0 %v3154_v34  ;;  %v356_v15 = vld [vmem:[#allocation2 + $0x648] sm:$0xff]  ;;  %v350_v17 = vld [vmem:[#allocation2 + $0x618] sm:$0xff]  ;;  %v4486_v19 = vunpack.c.h.bf16 %v4483_v16  ;;  %v3362_v21 = vpack.c.bf16 %v341_v12, %v333_v11  ;;  %v347_v23 = vld [vmem:[#allocation2 + $0x600] sm:$0xff] }
  0xa1   :  { %3347 = vmatpush1.bf16.msra.mxu1 %v3346_v35  ;;  %3157 = vmatprep.subr.bf16.mxu0 %v3156_v36  ;;  %v358_v18 = vld [vmem:[#allocation2 + $0x658] sm:$0xff]  ;;  %v3172_v22 = vpack.c.bf16 %v356_v15, %v348_v14  ;;  %v355_v24 = vld [vmem:[#allocation2 + $0x640] sm:$0xff]  ;;  %v349_v25 = vld [vmem:[#allocation2 + $0x610] sm:$0xff]  ;;  %v4491_v14 = vunpack.c.l.bf16 %v4483_v16 }
  0xa2   :  { %3349 = vmatprep.subr.bf16.mxu1 %v3348_v40  ;;  %v3364_v26 = vpack.c.bf16 %v358_v18, %v350_v17  ;;  %v357_v27 = vld [vmem:[#allocation2 + $0x650] sm:$0xff]  ;;  %v364_v28 = vld [vmem:[#allocation2 + $0x688] sm:$0xff]  ;;  %1029 = vmatprep.mubr.f32.mxu0 %v4486_v19  ;;  %v366_v30 = vld [vmem:[#allocation2 + $0x698] sm:$0xff]  ;;  %v3174_v32 = vpack.c.bf16 %v355_v24, %v347_v23 }
  0xa3   :  { %v372_v29 = vld [vmem:[#allocation2 + $0x6c8] sm:$0xff]  ;;  %v374_v31 = vld [vmem:[#allocation2 + $0x6d8] sm:$0xff]  ;;  %1296 = vmatprep.mubr.f32.mxu1 %v4486_v19  ;;  %v3366_v33 = vpack.c.bf16 %v357_v27, %v349_v25  ;;  %v363_v35 = vld [vmem:[#allocation2 + $0x680] sm:$0xff] }
  0xa4   :  { %3159 = vmatpush1.bf16.msra.mxu0 %v3158_v46  ;;  %v3176_v34 = vpack.c.bf16 %v372_v29, %v364_v28  ;;  %v371_v36 = vld [vmem:[#allocation2 + $0x6c0] sm:$0xff]  ;;  %v365_v37 = vld [vmem:[#allocation2 + $0x690] sm:$0xff]  ;;  %v3368_v38 = vpack.c.bf16 %v374_v31, %v366_v30  ;;  %v380_v40 = vld [vmem:[#allocation2 + $0x708] sm:$0xff] }
  0xa5   :  { %3351 = vmatpush1.bf16.msra.mxu1 %v3350_v47  ;;  %3161 = vmatprep.subr.bf16.mxu0 %v3160_v48  ;;  %v373_v39 = vld [vmem:[#allocation2 + $0x6d0] sm:$0xff]  ;;  %v388_v41 = vld [vmem:[#allocation2 + $0x748] sm:$0xff]  ;;  %v382_v42 = vld [vmem:[#allocation2 + $0x718] sm:$0xff]  ;;  %v3178_v44 = vpack.c.bf16 %v371_v36, %v363_v35 }
  0xa6   :  { %3353 = vmatprep.subr.bf16.mxu1 %v3352_v52  ;;  %v390_v43 = vld [vmem:[#allocation2 + $0x758] sm:$0xff]  ;;  %v3370_v45 = vpack.c.bf16 %v373_v39, %v365_v37  ;;  %v3180_v46 = vpack.c.bf16 %v388_v41, %v380_v40  ;;  %v379_v47 = vld [vmem:[#allocation2 + $0x700] sm:$0xff]  ;;  %v381_v49 = vld [vmem:[#allocation2 + $0x710] sm:$0xff] }
  0xa7   :  { %v387_v48 = vld [vmem:[#allocation2 + $0x740] sm:$0xff]  ;;  %v3372_v50 = vpack.c.bf16 %v390_v43, %v382_v42  ;;  %v389_v51 = vld [vmem:[#allocation2 + $0x750] sm:$0xff]  ;;  %v396_v52 = vld [vmem:[#allocation2 + $0x788] sm:$0xff] }
  0xa8   :  { %3163 = vmatpush1.bf16.msra.mxu0 %v3162_v58  ;;  %v404_v53 = vld [vmem:[#allocation2 + $0x7c8] sm:$0xff]  ;;  %v398_v54 = vld [vmem:[#allocation2 + $0x798] sm:$0xff]  ;;  %v3182_v56 = vpack.c.bf16 %v387_v48, %v379_v47  ;;  %v3374_v57 = vpack.c.bf16 %v389_v51, %v381_v49  ;;  %v397_v61 = vld [vmem:[#allocation2 + $0x790] sm:$0xff] }
  0xa9   :  { %3355 = vmatpush1.bf16.msra.mxu1 %v3354_v59  ;;  %3165 = vmatprep.subr.bf16.mxu0 %v3164_v60  ;;  %v406_v55 = vld [vmem:[#allocation2 + $0x7d8] sm:$0xff]  ;;  %v3184_v58 = vpack.c.bf16 %v404_v53, %v396_v52  ;;  %v395_v59 = vld [vmem:[#allocation2 + $0x780] sm:$0xff]  ;;  %v405_v63 = vld [vmem:[#allocation2 + $0x7d0] sm:$0xff] }
  0xaa   :  { %3357 = vmatprep.subr.bf16.mxu1 %v3356_v0  ;;  %v403_v60 = vld [vmem:[#allocation2 + $0x7c0] sm:$0xff]  ;;  %v3376_v62 = vpack.c.bf16 %v406_v55, %v398_v54  ;;  %v412_v0 = vld [vmem:[#allocation2 + $0x808] sm:$0xff]  ;;  %v414_v2 = vld [vmem:[#allocation2 + $0x818] sm:$0xff]  ;;  %v3378_v5 = vpack.c.bf16 %v405_v63, %v397_v61 }
  0xab   :  { %v420_v1 = vld [vmem:[#allocation2 + $0x848] sm:$0xff]  ;;  %v422_v3 = vld [vmem:[#allocation2 + $0x858] sm:$0xff]  ;;  %v3186_v4 = vpack.c.bf16 %v403_v60, %v395_v59  ;;  %v411_v7 = vld [vmem:[#allocation2 + $0x800] sm:$0xff] }
  0xac   :  { %3167 = vmatpush1.bf16.msra.mxu0 %v3166_v6  ;;  %v3188_v6 = vpack.c.bf16 %v420_v1, %v412_v0  ;;  %v3380_v10 = vpack.c.bf16 %v422_v3, %v414_v2  ;;  %v421_v11 = vld [vmem:[#allocation2 + $0x850] sm:$0xff]  ;;  %v428_v12 = vld [vmem:[#allocation2 + $0x888] sm:$0xff]  ;;  %v430_v15 = vld [vmem:[#allocation2 + $0x898] sm:$0xff] }
  0xad   :  { %3359 = vmatpush1.bf16.msra.mxu1 %v3358_v8  ;;  %3169 = vmatprep.subr.bf16.mxu0 %v3168_v9  ;;  %v419_v8 = vld [vmem:[#allocation2 + $0x840] sm:$0xff]  ;;  %v413_v9 = vld [vmem:[#allocation2 + $0x810] sm:$0xff]  ;;  %v438_v17 = vld [vmem:[#allocation2 + $0x8d8] sm:$0xff] }
  0xae   :  { %3361 = vmatprep.subr.bf16.mxu1 %v3360_v13  ;;  %v436_v13 = vld [vmem:[#allocation2 + $0x8c8] sm:$0xff]  ;;  %v3190_v18 = vpack.c.bf16 %v419_v8, %v411_v7  ;;  %v435_v23 = vld [vmem:[#allocation2 + $0x8c0] sm:$0xff]  ;;  %v429_v24 = vld [vmem:[#allocation2 + $0x890] sm:$0xff]  ;;  %v3384_v25 = vpack.c.bf16 %v438_v17, %v430_v15 }
  0xaf   :  { %v444_v27 = vld [vmem:[#allocation2 + $0x908] sm:$0xff]  ;;  %v446_v16 = vld [vmem:[#allocation2 + $0x918] sm:$0xff]  ;;  %v445_v35 = vld [vmem:[#allocation2 + $0x910] sm:$0xff] }
  0xb0   :  { %3171 = vmatpush1.bf16.msra.mxu0 %v3170_v20  ;;  %v3382_v20 = vpack.c.bf16 %v421_v11, %v413_v9  ;;  %v452_v28 = vld [vmem:[#allocation2 + $0x948] sm:$0xff]  ;;  %v454_v29 = vld [vmem:[#allocation2 + $0x958] sm:$0xff]  ;;  %v453_v37 = vld [vmem:[#allocation2 + $0x950] sm:$0xff] }
  0xb1   :  { %3363 = vmatpush1.bf16.msra.mxu1 %v3362_v21  ;;  %3173 = vmatprep.subr.bf16.mxu0 %v3172_v22  ;;  %v3192_v21 = vpack.c.bf16 %v436_v13, %v428_v12  ;;  %v427_v22 = vld [vmem:[#allocation2 + $0x880] sm:$0xff]  ;;  %v3388_v36 = vpack.c.bf16 %v454_v29, %v446_v16  ;;  %v468_v39 = vld [vmem:[#allocation2 + $0x9c8] sm:$0xff]  ;;  %v462_v40 = vld [vmem:[#allocation2 + $0x998] sm:$0xff]  ;;  %v3390_v43 = vpack.c.bf16 %v453_v37, %v445_v35 }
  0xb2   :  { %3365 = vmatprep.subr.bf16.mxu1 %v3364_v26  ;;  %v437_v26 = vld [vmem:[#allocation2 + $0x8d0] sm:$0xff]  ;;  %v3194_v30 = vpack.c.bf16 %v435_v23, %v427_v22  ;;  %v470_v41 = vld [vmem:[#allocation2 + $0x9d8] sm:$0xff]  ;;  %v484_v51 = vld [vmem:[#allocation2 + $0xa48] sm:$0xff] }
  0xb3   :  { %v3386_v31 = vpack.c.bf16 %v437_v26, %v429_v24  ;;  %v461_v47 = vld [vmem:[#allocation2 + $0x990] sm:$0xff]  ;;  %v3392_v48 = vpack.c.bf16 %v470_v41, %v462_v40  ;;  %v478_v52 = vld [vmem:[#allocation2 + $0xa18] sm:$0xff]  ;;  %v475_v55 = vld [vmem:[#allocation2 + $0xa00] sm:$0xff] }
  0xb4   :  { %3175 = vmatpush1.bf16.msra.mxu0 %v3174_v32  ;;  %v3196_v32 = vpack.c.bf16 %v452_v28, %v444_v27  ;;  %v469_v49 = vld [vmem:[#allocation2 + $0x9d0] sm:$0xff]  ;;  %v486_v53 = vld [vmem:[#allocation2 + $0xa58] sm:$0xff]  ;;  %v492_v63 = vld [vmem:[#allocation2 + $0xa88] sm:$0xff] }
  0xb5   :  { %3367 = vmatpush1.bf16.msra.mxu1 %v3366_v33  ;;  %3177 = vmatprep.subr.bf16.mxu0 %v3176_v34  ;;  %v443_v33 = vld [vmem:[#allocation2 + $0x900] sm:$0xff]  ;;  %v477_v59 = vld [vmem:[#allocation2 + $0xa10] sm:$0xff]  ;;  %v122_v60 = vld [vmem:[%s5281_s0 + $0x18] sm:$0xff]  ;;  %v3396_v61 = vpack.c.bf16 %v486_v53, %v478_v52 }
  0xb6   :  { %3369 = vmatprep.subr.bf16.mxu1 %v3368_v38  ;;  %v451_v34 = vld [vmem:[#allocation2 + $0x940] sm:$0xff]  ;;  %v460_v38 = vld [vmem:[#allocation2 + $0x988] sm:$0xff]  ;;  %v4498_v1 = vunpack.c.h.bf16 %v122_v60  ;;  %v494_v2 = vld [vmem:[#allocation2 + $0xa98] sm:$0xff] }
  0xb7   :  { %v3198_v42 = vpack.c.bf16 %v451_v34, %v443_v33  ;;  %v500_v0 = vld [vmem:[#allocation2 + $0xac8] sm:$0xff]  ;;  %v502_v3 = vld [vmem:[#allocation2 + $0xad8] sm:$0xff]  ;;  %v491_v9 = vld [vmem:[#allocation2 + $0xa80] sm:$0xff] }
  0xb8   :  { %3179 = vmatpush1.bf16.msra.mxu0 %v3178_v44  ;;  %v3200_v44 = vpack.c.bf16 %v468_v39, %v460_v38  ;;  %v3208_v8 = vpack.c.bf16 %v500_v0, %v492_v63  ;;  %v493_v11 = vld [vmem:[#allocation2 + $0xa90] sm:$0xff]  ;;  %v3400_v13 = vpack.c.bf16 %v502_v3, %v494_v2  ;;  %v508_v17 = vld [vmem:[#allocation2 + $0xb08] sm:$0xff]  ;;  %v515_v16 = vld [vmem:[#allocation2 + $0xb40] sm:$0xff] }
  0xb9   :  { %3371 = vmatpush1.bf16.msra.mxu1 %v3370_v45  ;;  %3181 = vmatprep.subr.bf16.mxu0 %v3180_v46  ;;  %v459_v45 = vld [vmem:[#allocation2 + $0x980] sm:$0xff]  ;;  %v501_v15 = vld [vmem:[#allocation2 + $0xad0] sm:$0xff]  ;;  %v128_v23 = vld [vmem:[%s5281_s0 + $0x48] sm:$0xff] }
  0xba   :  { %3373 = vmatprep.subr.bf16.mxu1 %v3372_v50  ;;  %v467_v46 = vld [vmem:[#allocation2 + $0x9c0] sm:$0xff]  ;;  %v476_v50 = vld [vmem:[#allocation2 + $0xa08] sm:$0xff]  ;;  %v4517_v26 = vunpack.c.h.bf16 %v128_v23  ;;  %v3402_v27 = vpack.c.bf16 %v501_v15, %v493_v11  ;;  %v509_v29 = vld [vmem:[#allocation2 + $0xb10] sm:$0xff]  ;;  %v4527_v37 = vunpack.c.l.bf16 %v128_v23 }
  0xbb   :  { %v3202_v54 = vpack.c.bf16 %v467_v46, %v459_v45  ;;  %v532_v33 = vld [vmem:[#allocation2 + $0xbc8] sm:$0xff]  ;;  %v526_v35 = vld [vmem:[#allocation2 + $0xb98] sm:$0xff]  ;;  %v533_v46 = vld [vmem:[#allocation2 + $0xbd0] sm:$0xff] }
  0xbc   :  { %3183 = vmatpush1.bf16.msra.mxu0 %v3182_v56  ;;  %v3394_v56 = vpack.c.bf16 %v469_v49, %v461_v47  ;;  %v4523_v34 = vld [vmem:[%s5281_s0 + $0x8] sm:$0xff]  ;;  %v542_v49 = vld [vmem:[#allocation2 + $0xc18] sm:$0xff]  ;;  %v555_v3 = vld [vmem:[#allocation2 + $0xc80] sm:$0xff] }
  0xbd   :  { %3375 = vmatpush1.bf16.msra.mxu1 %v3374_v57  ;;  %3185 = vmatprep.subr.bf16.mxu0 %v3184_v58  ;;  %v3204_v57 = vpack.c.bf16 %v484_v51, %v476_v50  ;;  %v483_v58 = vld [vmem:[#allocation2 + $0xa40] sm:$0xff]  ;;  %v4531_v39 = vunpack.c.h.bf16 %v4523_v34  ;;  %v540_v47 = vld [vmem:[#allocation2 + $0xc08] sm:$0xff]  ;;  %v550_v50 = vld [vmem:[#allocation2 + $0xc58] sm:$0xff] }
  0xbe   :  { %3377 = vmatprep.subr.bf16.mxu1 %v3376_v62  ;;  %v485_v62 = vld [vmem:[#allocation2 + $0xa50] sm:$0xff]  ;;  %v574_v11 = vld [vmem:[#allocation2 + $0xd18] sm:$0xff] }
  0xbf   :  { %v3398_v7 = vpack.c.bf16 %v485_v62, %v477_v59  ;;  %v556_v59 = vld [vmem:[#allocation2 + $0xc88] sm:$0xff]  ;;  %v566_v62 = vld [vmem:[#allocation2 + $0xcd8] sm:$0xff]  ;;  %v573_v23 = vld [vmem:[#allocation2 + $0xd10] sm:$0xff] }
  0xc0   :  { %3187 = vmatpush1.bf16.msra.mxu0 %v3186_v4  ;;  %v4500_v4 = vunpack.c.l.bf16 %v122_v60  ;;  %v564_v60 = vld [vmem:[#allocation2 + $0xcc8] sm:$0xff] }
  0xc1   :  { %3379 = vmatpush1.bf16.msra.mxu1 %v3378_v5  ;;  %3189 = vmatprep.subr.bf16.mxu0 %v3188_v6  ;;  %v3206_v5 = vpack.c.bf16 %v483_v58, %v475_v55  ;;  %v125_v6 = vld [vmem:[%s5281_s0 + $0x30] sm:$0xff]  ;;  %v547_v55 = vld [vmem:[#allocation2 + $0xc40] sm:$0xff]  ;;  %v3224_v2 = vpack.c.bf16 %v564_v60, %v556_v59 }
  0xc2   :  { %3381 = vmatprep.subr.bf16.mxu1 %v3380_v10  ;;  %v499_v10 = vld [vmem:[#allocation2 + $0xac0] sm:$0xff]  ;;  %v4506_v12 = vunpack.c.h.bf16 %v125_v6  ;;  %v4511_v22 = vunpack.c.l.bf16 %v125_v6  ;;  %v549_v58 = vld [vmem:[#allocation2 + $0xc50] sm:$0xff] }
  0xc3   :  { %1030 = vmatmul.mubr.f32.vlgmr.msra.gmra.mrb[0].mxu0 %v4491_v14  ;;  %v3210_v24 = vpack.c.bf16 %v499_v10, %v491_v9  ;;  %v557_v6 = vld [vmem:[#allocation2 + $0xc90] sm:$0xff]  ;;  %v572_v9 = vld [vmem:[#allocation2 + $0xd08] sm:$0xff]  ;;  %v619_v60 = vld [vmem:[#allocation2 + $0xe80] sm:$0xff] }
  0xc4   :  { %3191 = vmatpush1.bf16.msra.mxu0 %v3190_v18  ;;  %1297 = vmatmul.mubr.f32.vlgmr.msra.gmra.mrb[0].mxu1 %v4491_v14  ;;  %v516_v18 = vld [vmem:[#allocation2 + $0xb48] sm:$0xff] }
  0xc5   :  { %3383 = vmatpush1.bf16.msra.mxu1 %v3382_v20  ;;  %3193 = vmatprep.subr.bf16.mxu0 %v3192_v21  ;;  %v510_v20 = vld [vmem:[#allocation2 + $0xb18] sm:$0xff]  ;;  %v3212_v28 = vpack.c.bf16 %v516_v18, %v508_v17  ;;  %v580_v10 = vld [vmem:[#allocation2 + $0xd48] sm:$0xff] }
  0xc6   :  { %3385 = vmatprep.subr.bf16.mxu1 %v3384_v25  ;;  %1035 = vmatprep.mubr.f32.mxu0 %v4498_v1  ;;  %v518_v21 = vld [vmem:[#allocation2 + $0xb58] sm:$0xff]  ;;  %v507_v25 = vld [vmem:[#allocation2 + $0xb00] sm:$0xff]  ;;  %v3228_v18 = vpack.c.bf16 %v580_v10, %v572_v9 }
  0xc7   :  { %1302 = vmatprep.mubr.f32.mxu1 %v4498_v1  ;;  %1036 = vmatmul.mubr.f32.gmra.mrb[2].mxu0 %v4500_v4  ;;  %v3214_v38 = vpack.c.bf16 %v515_v16, %v507_v25  ;;  %v581_v25 = vld [vmem:[#allocation2 + $0xd50] sm:$0xff]  ;;  %v590_v16 = vld [vmem:[#allocation2 + $0xd98] sm:$0xff]  ;;  %v635_v10 = vld [vmem:[#allocation2 + $0xf00] sm:$0xff] }
  0xc8   :  { %3195 = vmatpush1.bf16.msra.mxu0 %v3194_v30  ;;  %1303 = vmatmul.mubr.f32.gmra.mrb[2].mxu1 %v4500_v4  ;;  %v517_v30 = vld [vmem:[#allocation2 + $0xb50] sm:$0xff] }
  0xc9   :  { %3387 = vmatpush1.bf16.msra.mxu1 %v3386_v31  ;;  %3197 = vmatprep.subr.bf16.mxu0 %v3196_v32  ;;  %v3404_v31 = vpack.c.bf16 %v518_v21, %v510_v20  ;;  %v524_v32 = vld [vmem:[#allocation2 + $0xb88] sm:$0xff]  ;;  %v3406_v40 = vpack.c.bf16 %v517_v30, %v509_v29  ;;  %v571_v20 = vld [vmem:[#allocation2 + $0xd00] sm:$0xff]  ;;  %v598_v29 = vld [vmem:[#allocation2 + $0xdd8] sm:$0xff] }
  0xca   :  { %3389 = vmatprep.subr.bf16.mxu1 %v3388_v36  ;;  %1041 = vmatprep.mubr.f32.mxu0 %v4506_v12  ;;  %v534_v36 = vld [vmem:[#allocation2 + $0xbd8] sm:$0xff]  ;;  %v3216_v41 = vpack.c.bf16 %v532_v33, %v524_v32  ;;  %v579_v21 = vld [vmem:[#allocation2 + $0xd40] sm:$0xff] }
  0xcb   :  { %1308 = vmatprep.mubr.f32.mxu1 %v4506_v12  ;;  %1042 = vmatmul.mubr.f32.gmra.mrb[4].mxu0 %v4511_v22  ;;  %v3408_v45 = vpack.c.bf16 %v534_v36, %v526_v35  ;;  %v3230_v30 = vpack.c.bf16 %v579_v21, %v571_v20  ;;  %v587_v33 = vld [vmem:[#allocation2 + $0xd80] sm:$0xff]  ;;  %v589_v36 = vld [vmem:[#allocation2 + $0xd90] sm:$0xff]  ;;  %v660_v20 = vld [vmem:[#allocation2 + $0xfc8] sm:$0xff] }
  0xcc   :  { %3199 = vmatpush1.bf16.msra.mxu0 %v3198_v42  ;;  %1309 = vmatmul.mubr.f32.gmra.mrb[4].mxu1 %v4511_v22  ;;  %v523_v42 = vld [vmem:[#allocation2 + $0xb80] sm:$0xff]  ;;  %v654_v21 = vld [vmem:[#allocation2 + $0xf98] sm:$0xff] }
  0xcd   :  { %3391 = vmatpush1.bf16.msra.mxu1 %v3390_v43  ;;  %3201 = vmatprep.subr.bf16.mxu0 %v3200_v44  ;;  %v531_v43 = vld [vmem:[#allocation2 + $0xbc0] sm:$0xff]  ;;  %v525_v44 = vld [vmem:[#allocation2 + $0xb90] sm:$0xff] }
  0xce   :  { %3393 = vmatprep.subr.bf16.mxu1 %v3392_v48  ;;  %1047 = vmatprep.mubr.f32.mxu0 %v4517_v26  ;;  %v548_v48 = vld [vmem:[#allocation2 + $0xc48] sm:$0xff]  ;;  %v3218_v51 = vpack.c.bf16 %v531_v43, %v523_v42  ;;  %v3410_v52 = vpack.c.bf16 %v533_v46, %v525_v44  ;;  %v595_v35 = vld [vmem:[#allocation2 + $0xdc0] sm:$0xff]  ;;  %v606_v43 = vld [vmem:[#allocation2 + $0xe18] sm:$0xff] }
  0xcf   :  { %1314 = vmatprep.mubr.f32.mxu1 %v4517_v26  ;;  %1048 = vmatmul.mubr.f32.gmra.mrb[6].mxu0 %v4527_v37  ;;  %v3220_v53 = vpack.c.bf16 %v548_v48, %v540_v47  ;;  %v612_v42 = vld [vmem:[#allocation2 + $0xe48] sm:$0xff]  ;;  %v614_v44 = vld [vmem:[#allocation2 + $0xe58] sm:$0xff]  ;;  %v603_v48 = vld [vmem:[#allocation2 + $0xe00] sm:$0xff] }
  0xd0   :  { %3203 = vmatpush1.bf16.msra.mxu0 %v3202_v54  ;;  %1315 = vmatmul.mubr.f32.gmra.mrb[6].mxu1 %v4527_v37  ;;  %v539_v54 = vld [vmem:[#allocation2 + $0xc00] sm:$0xff] }
  0xd1   :  { %3395 = vmatpush1.bf16.msra.mxu1 %v3394_v56  ;;  %3205 = vmatprep.subr.bf16.mxu0 %v3204_v57  ;;  %v541_v56 = vld [vmem:[#allocation2 + $0xc10] sm:$0xff]  ;;  %v3412_v57 = vpack.c.bf16 %v550_v50, %v542_v49  ;;  %v3222_v63 = vpack.c.bf16 %v547_v55, %v539_v54  ;;  %v611_v49 = vld [vmem:[#allocation2 + $0xe40] sm:$0xff]  ;;  %v628_v54 = vld [vmem:[#allocation2 + $0xec8] sm:$0xff] }
  0xd2   :  { %3397 = vmatprep.subr.bf16.mxu1 %v3396_v61  ;;  %1118 = vmatprep.mubr.f32.mxu0 %v4531_v39  ;;  %v558_v61 = vld [vmem:[#allocation2 + $0xc98] sm:$0xff]  ;;  %v3414_v0 = vpack.c.bf16 %v549_v58, %v541_v56  ;;  %v605_v50 = vld [vmem:[#allocation2 + $0xe10] sm:$0xff] }
  0xd3   :  { %1385 = vmatprep.mubr.f32.mxu1 %v4531_v39  ;;  %v622_v55 = vld [vmem:[#allocation2 + $0xe98] sm:$0xff] }
  0xd4   :  { %3207 = vmatpush1.bf16.msra.mxu0 %v3206_v5  ;;  %v563_v5 = vld [vmem:[#allocation2 + $0xcc0] sm:$0xff]  ;;  %v630_v56 = vld [vmem:[#allocation2 + $0xed8] sm:$0xff] }
  0xd5   :  { %3399 = vmatpush1.bf16.msra.mxu1 %v3398_v7  ;;  %3209 = vmatprep.subr.bf16.mxu0 %v3208_v8  ;;  %v3416_v7 = vpack.c.bf16 %v566_v62, %v558_v61  ;;  %v565_v8 = vld [vmem:[#allocation2 + $0xcd0] sm:$0xff]  ;;  %v3226_v15 = vpack.c.bf16 %v563_v5, %v555_v3  ;;  %v627_v61 = vld [vmem:[#allocation2 + $0xec0] sm:$0xff]  ;;  %v644_v3 = vld [vmem:[#allocation2 + $0xf48] sm:$0xff] }
  0xd6   :  { %3401 = vmatprep.subr.bf16.mxu1 %v3400_v13  ;;  %v582_v13 = vld [vmem:[#allocation2 + $0xd58] sm:$0xff]  ;;  %v3418_v17 = vpack.c.bf16 %v565_v8, %v557_v6  ;;  %v621_v62 = vld [vmem:[#allocation2 + $0xe90] sm:$0xff] }
  0xd7   :  { %v638_v5 = vld [vmem:[#allocation2 + $0xf18] sm:$0xff] }
  0xd8   :  { %3211 = vmatpush1.bf16.msra.mxu0 %v3210_v24  ;;  %v3420_v24 = vpack.c.bf16 %v582_v13, %v574_v11  ;;  %v646_v6 = vld [vmem:[#allocation2 + $0xf58] sm:$0xff]  ;;  %v643_v11 = vld [vmem:[#allocation2 + $0xf40] sm:$0xff]  ;;  %v637_v13 = vld [vmem:[#allocation2 + $0xf10] sm:$0xff] }
  0xd9   :  { %3403 = vmatpush1.bf16.msra.mxu1 %v3402_v27  ;;  %3213 = vmatprep.subr.bf16.mxu0 %v3212_v28  ;;  %v588_v27 = vld [vmem:[#allocation2 + $0xd88] sm:$0xff] }
  0xda   :  { %3405 = vmatprep.subr.bf16.mxu1 %v3404_v31  ;;  %v596_v28 = vld [vmem:[#allocation2 + $0xdc8] sm:$0xff]  ;;  %v3422_v31 = vpack.c.bf16 %v581_v25, %v573_v23  ;;  %v662_v23 = vld [vmem:[#allocation2 + $0xfd8] sm:$0xff] }
  0xdb   :  { %v3232_v32 = vpack.c.bf16 %v596_v28, %v588_v27  ;;  %v651_v28 = vld [vmem:[#allocation2 + $0xf80] sm:$0xff] }
  0xdc   :  { %3215 = vmatpush1.bf16.msra.mxu0 %v3214_v38  ;;  %v3424_v38 = vpack.c.bf16 %v598_v29, %v590_v16  ;;  %v659_v16 = vld [vmem:[#allocation2 + $0xfc0] sm:$0xff]  ;;  %v653_v29 = vld [vmem:[#allocation2 + $0xf90] sm:$0xff] }
  0xdd   :  { %3407 = vmatpush1.bf16.msra.mxu1 %v3406_v40  ;;  %3217 = vmatprep.subr.bf16.mxu0 %v3216_v41  ;;  %v597_v40 = vld [vmem:[#allocation2 + $0xdd0] sm:$0xff]  ;;  %v604_v41 = vld [vmem:[#allocation2 + $0xe08] sm:$0xff] }
  0xde   :  { %3409 = vmatprep.subr.bf16.mxu1 %v3408_v45  ;;  %v3234_v45 = vpack.c.bf16 %v595_v35, %v587_v33  ;;  %v3426_v46 = vpack.c.bf16 %v597_v40, %v589_v36  ;;  %v3236_v47 = vpack.c.bf16 %v612_v42, %v604_v41  ;;  %v676_v33 = vld [vmem:[#allocation2 + $0x1048] sm:$0xff]  ;;  %v670_v35 = vld [vmem:[#allocation2 + $0x1018] sm:$0xff]  ;;  %v667_v42 = vld [vmem:[#allocation2 + $0x1000] sm:$0xff] }
  0xdf   :  { %v678_v36 = vld [vmem:[#allocation2 + $0x1058] sm:$0xff] }
  0xe0   :  { %3219 = vmatpush1.bf16.msra.mxu0 %v3218_v51  ;;  %v3428_v51 = vpack.c.bf16 %v614_v44, %v606_v43  ;;  %v675_v43 = vld [vmem:[#allocation2 + $0x1040] sm:$0xff]  ;;  %v669_v44 = vld [vmem:[#allocation2 + $0x1010] sm:$0xff] }
  0xe1   :  { %3411 = vmatpush1.bf16.msra.mxu1 %v3410_v52  ;;  %3221 = vmatprep.subr.bf16.mxu0 %v3220_v53  ;;  %v613_v52 = vld [vmem:[#allocation2 + $0xe50] sm:$0xff]  ;;  %v620_v53 = vld [vmem:[#allocation2 + $0xe88] sm:$0xff] }
  0xe2   :  { %3413 = vmatprep.subr.bf16.mxu1 %v3412_v57  ;;  %v3238_v57 = vpack.c.bf16 %v611_v49, %v603_v48  ;;  %v3430_v58 = vpack.c.bf16 %v613_v52, %v605_v50  ;;  %v3240_v59 = vpack.c.bf16 %v628_v54, %v620_v53  ;;  %v692_v48 = vld [vmem:[#allocation2 + $0x10c8] sm:$0xff]  ;;  %v4539_v49 = vunpack.c.l.bf16 %v4523_v34  ;;  %v686_v50 = vld [vmem:[#allocation2 + $0x1098] sm:$0xff]  ;;  %v123_v52 = vld [vmem:[%s5281_s0 + $0x20] sm:$0xff] }
  0xe3   :  { %v3254_v53 = vpack.c.bf16 %v675_v43, %v667_v42  ;;  %v700_v34 = vld [vmem:[#allocation2 + $0x1108] sm:$0xff]  ;;  %v4574_v42 = vld [vmem:[%s5281_s0 + $0x10] sm:$0xff] }
  0xe4   :  { %3223 = vmatpush1.bf16.msra.mxu0 %v3222_v63  ;;  %v3432_v63 = vpack.c.bf16 %v630_v56, %v622_v55  ;;  %v683_v56 = vld [vmem:[#allocation2 + $0x1080] sm:$0xff] }
  0xe5   :  { %3415 = vmatpush1.bf16.msra.mxu1 %v3414_v0  ;;  %3225 = vmatprep.subr.bf16.mxu0 %v3224_v2  ;;  %v629_v0 = vld [vmem:[#allocation2 + $0xed0] sm:$0xff]  ;;  %v636_v2 = vld [vmem:[#allocation2 + $0xf08] sm:$0xff] }
  0xe6   :  { %3417 = vmatprep.subr.bf16.mxu1 %v3416_v7  ;;  %v3242_v7 = vpack.c.bf16 %v627_v61, %v619_v60  ;;  %v3434_v8 = vpack.c.bf16 %v629_v0, %v621_v62  ;;  %v3244_v9 = vpack.c.bf16 %v644_v3, %v636_v2  ;;  %v693_v60 = vld [vmem:[#allocation2 + $0x10d0] sm:$0xff]  ;;  %v708_v61 = vld [vmem:[#allocation2 + $0x1148] sm:$0xff]  ;;  %v4544_v62 = vunpack.c.h.bf16 %v123_v52  ;;  %v710_v0 = vld [vmem:[#allocation2 + $0x1158] sm:$0xff] }
  0xe7   :  { %v4547_v2 = vunpack.c.l.bf16 %v123_v52  ;;  %v126_v3 = vld [vmem:[%s5281_s0 + $0x38] sm:$0xff]  ;;  %v748_v52 = vld [vmem:[#allocation2 + $0x1288] sm:$0xff] }
  0xe8   :  { %3227 = vmatpush1.bf16.msra.mxu0 %v3226_v15  ;;  %v3436_v15 = vpack.c.bf16 %v646_v6, %v638_v5 }
  0xe9   :  { %3419 = vmatpush1.bf16.msra.mxu1 %v3418_v17  ;;  %3229 = vmatprep.subr.bf16.mxu0 %v3228_v18  ;;  %v645_v17 = vld [vmem:[#allocation2 + $0xf50] sm:$0xff]  ;;  %v652_v18 = vld [vmem:[#allocation2 + $0xf88] sm:$0xff] }
  0xea   :  { %3421 = vmatprep.subr.bf16.mxu1 %v3420_v24  ;;  %v3246_v24 = vpack.c.bf16 %v643_v11, %v635_v10  ;;  %v3438_v25 = vpack.c.bf16 %v645_v17, %v637_v13  ;;  %v3248_v27 = vpack.c.bf16 %v660_v20, %v652_v18  ;;  %v701_v10 = vld [vmem:[#allocation2 + $0x1110] sm:$0xff]  ;;  %v724_v17 = vld [vmem:[#allocation2 + $0x11c8] sm:$0xff]  ;;  %v4554_v18 = vunpack.c.h.bf16 %v126_v3  ;;  %v718_v20 = vld [vmem:[#allocation2 + $0x1198] sm:$0xff] }
  0xeb   :  { %v709_v13 = vld [vmem:[#allocation2 + $0x1150] sm:$0xff] }
  0xec   :  { %3231 = vmatpush1.bf16.msra.mxu0 %v3230_v30  ;;  %v3440_v30 = vpack.c.bf16 %v662_v23, %v654_v21  ;;  %v726_v21 = vld [vmem:[#allocation2 + $0x11d8] sm:$0xff]  ;;  %v4558_v23 = vunpack.c.l.bf16 %v126_v3  ;;  %v764_v3 = vld [vmem:[#allocation2 + $0x1308] sm:$0xff] }
  0xed   :  { %3423 = vmatpush1.bf16.msra.mxu1 %v3422_v31  ;;  %3233 = vmatprep.subr.bf16.mxu0 %v3232_v32  ;;  %v661_v31 = vld [vmem:[#allocation2 + $0xfd0] sm:$0xff]  ;;  %v668_v32 = vld [vmem:[#allocation2 + $0x1008] sm:$0xff] }
  0xee   :  { %3425 = vmatprep.subr.bf16.mxu1 %v3424_v38  ;;  %v3250_v38 = vpack.c.bf16 %v659_v16, %v651_v28  ;;  %v3442_v40 = vpack.c.bf16 %v661_v31, %v653_v29  ;;  %v3252_v41 = vpack.c.bf16 %v676_v33, %v668_v32  ;;  %v715_v16 = vld [vmem:[#allocation2 + $0x1180] sm:$0xff]  ;;  %v3456_v31 = vpack.c.bf16 %v726_v21, %v718_v20  ;;  %v725_v32 = vld [vmem:[#allocation2 + $0x11d0] sm:$0xff]  ;;  %v732_v33 = vld [vmem:[#allocation2 + $0x1208] sm:$0xff] }
  0xef   :  { %v723_v29 = vld [vmem:[#allocation2 + $0x11c0] sm:$0xff]  ;;  %v773_v20 = vld [vmem:[#allocation2 + $0x1350] sm:$0xff]  ;;  %v780_v21 = vld [vmem:[#allocation2 + $0x1388] sm:$0xff] }
  0xf0   :  { %3235 = vmatpush1.bf16.msra.mxu0 %v3234_v45  ;;  %v3444_v45 = vpack.c.bf16 %v678_v36, %v670_v35  ;;  %v740_v35 = vld [vmem:[#allocation2 + $0x1248] sm:$0xff]  ;;  %v3266_v43 = vpack.c.bf16 %v723_v29, %v715_v16 }
  0xf1   :  { %3427 = vmatpush1.bf16.msra.mxu1 %v3426_v46  ;;  %3237 = vmatprep.subr.bf16.mxu0 %v3236_v47  ;;  %v677_v46 = vld [vmem:[#allocation2 + $0x1050] sm:$0xff]  ;;  %v684_v47 = vld [vmem:[#allocation2 + $0x1088] sm:$0xff] }
  0xf2   :  { %3429 = vmatprep.subr.bf16.mxu1 %v3428_v51  ;;  %v694_v51 = vld [vmem:[#allocation2 + $0x10d8] sm:$0xff]  ;;  %v3446_v54 = vpack.c.bf16 %v677_v46, %v669_v44  ;;  %v3256_v55 = vpack.c.bf16 %v692_v48, %v684_v47  ;;  %v731_v46 = vld [vmem:[#allocation2 + $0x1200] sm:$0xff]  ;;  %v733_v48 = vld [vmem:[#allocation2 + $0x1210] sm:$0xff] }
  0xf3   :  { %v739_v47 = vld [vmem:[#allocation2 + $0x1240] sm:$0xff] }
  0xf4   :  { %3239 = vmatpush1.bf16.msra.mxu0 %v3238_v57  ;;  %v691_v57 = vld [vmem:[#allocation2 + $0x10c0] sm:$0xff] }
  0xf5   :  { %3431 = vmatpush1.bf16.msra.mxu1 %v3430_v58  ;;  %3241 = vmatprep.subr.bf16.mxu0 %v3240_v59  ;;  %v685_v58 = vld [vmem:[#allocation2 + $0x1090] sm:$0xff]  ;;  %v3448_v59 = vpack.c.bf16 %v694_v51, %v686_v50  ;;  %v3258_v5 = vpack.c.bf16 %v691_v57, %v683_v56  ;;  %v758_v56 = vld [vmem:[#allocation2 + $0x12d8] sm:$0xff]  ;;  %v3270_v57 = vpack.c.bf16 %v739_v47, %v731_v46 }
  0xf6   :  { %3433 = vmatprep.subr.bf16.mxu1 %v3432_v63  ;;  %v702_v63 = vld [vmem:[#allocation2 + $0x1118] sm:$0xff]  ;;  %v3450_v6 = vpack.c.bf16 %v693_v60, %v685_v58  ;;  %v741_v51 = vld [vmem:[#allocation2 + $0x1250] sm:$0xff]  ;;  %v747_v60 = vld [vmem:[#allocation2 + $0x1280] sm:$0xff] }
  0xf7   :  { %v3452_v11 = vpack.c.bf16 %v710_v0, %v702_v63  ;;  %v3462_v58 = vpack.c.bf16 %v741_v51, %v733_v48  ;;  %v757_v0 = vld [vmem:[#allocation2 + $0x12d0] sm:$0xff]  ;;  %v795_v48 = vld [vmem:[#allocation2 + $0x1400] sm:$0xff] }
  0xf8   :  { %3243 = vmatpush1.bf16.msra.mxu0 %v3242_v7  ;;  %v3260_v7 = vpack.c.bf16 %v708_v61, %v700_v34  ;;  %v755_v34 = vld [vmem:[#allocation2 + $0x12c0] sm:$0xff]  ;;  %v749_v61 = vld [vmem:[#allocation2 + $0x1290] sm:$0xff] }
  0xf9   :  { %3435 = vmatpush1.bf16.msra.mxu1 %v3434_v8  ;;  %3245 = vmatprep.subr.bf16.mxu0 %v3244_v9  ;;  %v699_v8 = vld [vmem:[#allocation2 + $0x1100] sm:$0xff]  ;;  %v797_v51 = vld [vmem:[#allocation2 + $0x1410] sm:$0xff] }
  0xfa   :  { %3437 = vmatprep.subr.bf16.mxu1 %v3436_v15  ;;  %v707_v9 = vld [vmem:[#allocation2 + $0x1140] sm:$0xff]  ;;  %v716_v15 = vld [vmem:[#allocation2 + $0x1188] sm:$0xff] }
  0xfb   :  { %v3264_v28 = vpack.c.bf16 %v724_v17, %v716_v15  ;;  %v765_v15 = vld [vmem:[#allocation2 + $0x1310] sm:$0xff] }
  0xfc   :  { %3247 = vmatpush1.bf16.msra.mxu0 %v3246_v24  ;;  %v129_v24 = vld [vmem:[%s5281_s0 + $0x50] sm:$0xff]  ;;  %v3470_v16 = vpack.c.bf16 %v773_v20, %v765_v15  ;;  %v827_v15 = vld [vmem:[#allocation2 + $0x1500] sm:$0xff] }
  0xfd   :  { %3439 = vmatpush1.bf16.msra.mxu1 %v3438_v25  ;;  %3249 = vmatprep.subr.bf16.mxu0 %v3248_v27  ;;  %v3262_v25 = vpack.c.bf16 %v707_v9, %v699_v8  ;;  %v3454_v27 = vpack.c.bf16 %v709_v13, %v701_v10  ;;  %v4565_v36 = vunpack.c.h.bf16 %v129_v24  ;;  %v3274_v8 = vpack.c.bf16 %v755_v34, %v747_v60  ;;  %v771_v13 = vld [vmem:[#allocation2 + $0x1340] sm:$0xff]  ;;  %v829_v20 = vld [vmem:[#allocation2 + $0x1510] sm:$0xff] }
  0xfe   :  { %3441 = vmatprep.subr.bf16.mxu1 %v3440_v30  ;;  %v717_v30 = vld [vmem:[#allocation2 + $0x1190] sm:$0xff]  ;;  %v3466_v9 = vpack.c.bf16 %v757_v0, %v749_v61  ;;  %v811_v61 = vld [vmem:[#allocation2 + $0x1480] sm:$0xff] }
  0xff   :  { %v3458_v44 = vpack.c.bf16 %v725_v32, %v717_v30  ;;  %v779_v30 = vld [vmem:[#allocation2 + $0x1380] sm:$0xff]  ;;  %v781_v32 = vld [vmem:[#allocation2 + $0x1390] sm:$0xff] }
 0x100   :  { %3251 = vmatpush1.bf16.msra.mxu0 %v3250_v38  ;;  %v734_v38 = vld [vmem:[#allocation2 + $0x1218] sm:$0xff]  ;;  %v813_v0 = vld [vmem:[#allocation2 + $0x1490] sm:$0xff] }
 0x101   :  { %3443 = vmatpush1.bf16.msra.mxu1 %v3442_v40  ;;  %3253 = vmatprep.subr.bf16.mxu0 %v3252_v41  ;;  %v742_v40 = vld [vmem:[#allocation2 + $0x1258] sm:$0xff]  ;;  %v4569_v41 = vunpack.c.l.bf16 %v129_v24  ;;  %v788_v24 = vld [vmem:[#allocation2 + $0x13c8] sm:$0xff] }
 0x102   :  { %3445 = vmatprep.subr.bf16.mxu1 %v3444_v45  ;;  %v3268_v45 = vpack.c.bf16 %v740_v35, %v732_v33  ;;  %v3460_v50 = vpack.c.bf16 %v742_v40, %v734_v38  ;;  %v3280_v29 = vpack.c.bf16 %v788_v24, %v780_v21  ;;  %v789_v35 = vld [vmem:[#allocation2 + $0x13d0] sm:$0xff]  ;;  %v796_v38 = vld [vmem:[#allocation2 + $0x1408] sm:$0xff] }
 0x103   :  { %1119 = vmatmul.mubr.f32.vlgmr.msra.gmra.mrb[0].mxu0 %v4539_v49  ;;  %v804_v40 = vld [vmem:[#allocation2 + $0x1448] sm:$0xff]  ;;  %v3474_v46 = vpack.c.bf16 %v789_v35, %v781_v32  ;;  %v837_v24 = vld [vmem:[#allocation2 + $0x1550] sm:$0xff]  ;;  %v843_v32 = vld [vmem:[#allocation2 + $0x1580] sm:$0xff] }
 0x104   :  { %3255 = vmatpush1.bf16.msra.mxu0 %v3254_v53  ;;  %1386 = vmatmul.mubr.f32.vlgmr.msra.gmra.mrb[0].mxu1 %v4539_v49  ;;  %v756_v53 = vld [vmem:[#allocation2 + $0x12c8] sm:$0xff]  ;;  %v3284_v47 = vpack.c.bf16 %v804_v40, %v796_v38  ;;  %v845_v35 = vld [vmem:[#allocation2 + $0x1590] sm:$0xff] }
 0x105   :  { %3447 = vmatpush1.bf16.msra.mxu1 %v3446_v54  ;;  %3257 = vmatprep.subr.bf16.mxu0 %v3256_v55  ;;  %v4579_v54 = vunpack.c.h.bf16 %v4574_v42  ;;  %v750_v55 = vld [vmem:[#allocation2 + $0x1298] sm:$0xff]  ;;  %v853_v40 = vld [vmem:[#allocation2 + $0x15d0] sm:$0xff] }
 0x106   :  { %3449 = vmatprep.subr.bf16.mxu1 %v3448_v59  ;;  %1124 = vmatprep.mubr.f32.mxu0 %v4544_v62  ;;  %v3272_v59 = vpack.c.bf16 %v756_v53, %v748_v52  ;;  %v3464_v63 = vpack.c.bf16 %v758_v56, %v750_v55  ;;  %v805_v53 = vld [vmem:[#allocation2 + $0x1450] sm:$0xff]  ;;  %v812_v55 = vld [vmem:[#allocation2 + $0x1488] sm:$0xff] }
 0x107   :  { %1391 = vmatprep.mubr.f32.mxu1 %v4544_v62  ;;  %1125 = vmatmul.mubr.f32.gmra.mrb[2].mxu0 %v4547_v2  ;;  %v820_v56 = vld [vmem:[#allocation2 + $0x14c8] sm:$0xff]  ;;  %v3478_v60 = vpack.c.bf16 %v805_v53, %v797_v51  ;;  %v859_v51 = vld [vmem:[#allocation2 + $0x1600] sm:$0xff]  ;;  %v861_v53 = vld [vmem:[#allocation2 + $0x1610] sm:$0xff] }
 0x108   :  { %3259 = vmatpush1.bf16.msra.mxu0 %v3258_v5  ;;  %1392 = vmatmul.mubr.f32.gmra.mrb[2].mxu1 %v4547_v2  ;;  %v772_v5 = vld [vmem:[#allocation2 + $0x1348] sm:$0xff]  ;;  %v3288_v34 = vpack.c.bf16 %v820_v56, %v812_v55  ;;  %v869_v56 = vld [vmem:[#allocation2 + $0x1650] sm:$0xff] }
 0x109   :  { %3451 = vmatpush1.bf16.msra.mxu1 %v3450_v6  ;;  %3261 = vmatprep.subr.bf16.mxu0 %v3260_v7  ;;  %v766_v6 = vld [vmem:[#allocation2 + $0x1318] sm:$0xff]  ;;  %v3276_v10 = vpack.c.bf16 %v772_v5, %v764_v3  ;;  %v821_v5 = vld [vmem:[#allocation2 + $0x14d0] sm:$0xff] }
 0x10a   :  { %3453 = vmatprep.subr.bf16.mxu1 %v3452_v11  ;;  %1130 = vmatprep.mubr.f32.mxu0 %v4554_v18  ;;  %v774_v7 = vld [vmem:[#allocation2 + $0x1358] sm:$0xff]  ;;  %v763_v11 = vld [vmem:[#allocation2 + $0x1300] sm:$0xff] }
 0x10b   :  { %1397 = vmatprep.mubr.f32.mxu1 %v4554_v18  ;;  %1131 = vmatmul.mubr.f32.gmra.mrb[4].mxu0 %v4558_v23  ;;  %v3468_v17 = vpack.c.bf16 %v774_v7, %v766_v6  ;;  %v828_v6 = vld [vmem:[#allocation2 + $0x1508] sm:$0xff] }
 0x10c   :  { %3263 = vmatpush1.bf16.msra.mxu0 %v3262_v25  ;;  %1398 = vmatmul.mubr.f32.gmra.mrb[4].mxu1 %v4558_v23  ;;  %v782_v25 = vld [vmem:[#allocation2 + $0x1398] sm:$0xff]  ;;  %v836_v7 = vld [vmem:[#allocation2 + $0x1548] sm:$0xff] }
 0x10d   :  { %3455 = vmatpush1.bf16.msra.mxu1 %v3454_v27  ;;  %3265 = vmatprep.subr.bf16.mxu0 %v3264_v28  ;;  %v790_v27 = vld [vmem:[#allocation2 + $0x13d8] sm:$0xff]  ;;  %v3278_v28 = vpack.c.bf16 %v771_v13, %v763_v11  ;;  %v3482_v11 = vpack.c.bf16 %v821_v5, %v813_v0  ;;  %v3292_v13 = vpack.c.bf16 %v836_v7, %v828_v6  ;;  %v875_v0 = vld [vmem:[#allocation2 + $0x1680] sm:$0xff]  ;;  %v877_v5 = vld [vmem:[#allocation2 + $0x1690] sm:$0xff] }
 0x10e   :  { %3457 = vmatprep.subr.bf16.mxu1 %v3456_v31  ;;  %1136 = vmatprep.mubr.f32.mxu0 %v4565_v36  ;;  %v787_v31 = vld [vmem:[#allocation2 + $0x13c0] sm:$0xff]  ;;  %v3472_v33 = vpack.c.bf16 %v790_v27, %v782_v25  ;;  %v844_v25 = vld [vmem:[#allocation2 + $0x1588] sm:$0xff]  ;;  %v885_v7 = vld [vmem:[#allocation2 + $0x16d0] sm:$0xff] }
 0x10f   :  { %1403 = vmatprep.mubr.f32.mxu1 %v4565_v36  ;;  %1137 = vmatmul.mubr.f32.gmra.mrb[6].mxu0 %v4569_v41  ;;  %v852_v27 = vld [vmem:[#allocation2 + $0x15c8] sm:$0xff] }
 0x110   :  { %3267 = vmatpush1.bf16.msra.mxu0 %v3266_v43  ;;  %1404 = vmatmul.mubr.f32.gmra.mrb[6].mxu1 %v4569_v41  ;;  %v798_v43 = vld [vmem:[#allocation2 + $0x1418] sm:$0xff] }
 0x111   :  { %3459 = vmatpush1.bf16.msra.mxu1 %v3458_v44  ;;  %3269 = vmatprep.subr.bf16.mxu0 %v3268_v45  ;;  %v806_v44 = vld [vmem:[#allocation2 + $0x1458] sm:$0xff]  ;;  %v3282_v45 = vpack.c.bf16 %v787_v31, %v779_v30  ;;  %v3486_v30 = vpack.c.bf16 %v837_v24, %v829_v20  ;;  %v3296_v31 = vpack.c.bf16 %v852_v27, %v844_v25  ;;  %v891_v20 = vld [vmem:[#allocation2 + $0x1700] sm:$0xff]  ;;  %v893_v24 = vld [vmem:[#allocation2 + $0x1710] sm:$0xff] }
 0x112   :  { %3461 = vmatprep.subr.bf16.mxu1 %v3460_v50  ;;  %1207 = vmatprep.mubr.f32.mxu0 %v4579_v54  ;;  %v803_v50 = vld [vmem:[#allocation2 + $0x1440] sm:$0xff]  ;;  %v3476_v52 = vpack.c.bf16 %v806_v44, %v798_v43  ;;  %v860_v43 = vld [vmem:[#allocation2 + $0x1608] sm:$0xff]  ;;  %v901_v27 = vld [vmem:[#allocation2 + $0x1750] sm:$0xff] }
 0x113   :  { %1474 = vmatprep.mubr.f32.mxu1 %v4579_v54  ;;  %v868_v44 = vld [vmem:[#allocation2 + $0x1648] sm:$0xff] }
 0x114   :  { %3271 = vmatpush1.bf16.msra.mxu0 %v3270_v57  ;;  %v814_v57 = vld [vmem:[#allocation2 + $0x1498] sm:$0xff] }
 0x115   :  { %3463 = vmatpush1.bf16.msra.mxu1 %v3462_v58  ;;  %3273 = vmatprep.subr.bf16.mxu0 %v3272_v59  ;;  %v822_v58 = vld [vmem:[#allocation2 + $0x14d8] sm:$0xff]  ;;  %v3286_v59 = vpack.c.bf16 %v803_v50, %v795_v48  ;;  %v3490_v48 = vpack.c.bf16 %v853_v40, %v845_v35  ;;  %v3300_v50 = vpack.c.bf16 %v868_v44, %v860_v43  ;;  %v907_v35 = vld [vmem:[#allocation2 + $0x1780] sm:$0xff]  ;;  %v909_v40 = vld [vmem:[#allocation2 + $0x1790] sm:$0xff] }
 0x116   :  { %3465 = vmatprep.subr.bf16.mxu1 %v3464_v63  ;;  %v819_v63 = vld [vmem:[#allocation2 + $0x14c0] sm:$0xff]  ;;  %v3480_v3 = vpack.c.bf16 %v822_v58, %v814_v57  ;;  %v876_v57 = vld [vmem:[#allocation2 + $0x1688] sm:$0xff]  ;;  %v917_v44 = vld [vmem:[#allocation2 + $0x17d0] sm:$0xff] }
 0x117   :  { %v884_v58 = vld [vmem:[#allocation2 + $0x16c8] sm:$0xff] }
 0x118   :  { %3275 = vmatpush1.bf16.msra.mxu0 %v3274_v8  ;;  %v830_v8 = vld [vmem:[#allocation2 + $0x1518] sm:$0xff] }
 0x119   :  { %3467 = vmatpush1.bf16.msra.mxu1 %v3466_v9  ;;  %3277 = vmatprep.subr.bf16.mxu0 %v3276_v10  ;;  %v838_v9 = vld [vmem:[#allocation2 + $0x1558] sm:$0xff]  ;;  %v3290_v10 = vpack.c.bf16 %v819_v63, %v811_v61  ;;  %v3494_v61 = vpack.c.bf16 %v869_v56, %v861_v53  ;;  %v3304_v63 = vpack.c.bf16 %v884_v58, %v876_v57  ;;  %v159_v53 = vld [vmem:[#allocation2 + $0x20] sm:$0xff]  ;;  %v161_v57 = vld [vmem:[#allocation2 + $0x30] sm:$0xff] }
 0x11a   :  { %3469 = vmatprep.subr.bf16.mxu1 %v3468_v17  ;;  %v835_v17 = vld [vmem:[#allocation2 + $0x1540] sm:$0xff]  ;;  %v3484_v21 = vpack.c.bf16 %v838_v9, %v830_v8  ;;  %v892_v8 = vld [vmem:[#allocation2 + $0x1708] sm:$0xff]  ;;  %v169_v58 = vld [vmem:[#allocation2 + $0x70] sm:$0xff] }
 0x11b   :  { %v900_v9 = vld [vmem:[#allocation2 + $0x1748] sm:$0xff] }
 0x11c   :  { %3279 = vmatpush1.bf16.msra.mxu0 %v3278_v28  ;;  %v846_v28 = vld [vmem:[#allocation2 + $0x1598] sm:$0xff] }
 0x11d   :  { %3471 = vmatpush1.bf16.msra.mxu1 %v3470_v16  ;;  %3281 = vmatprep.subr.bf16.mxu0 %v3280_v29  ;;  %v854_v16 = vld [vmem:[#allocation2 + $0x15d8] sm:$0xff]  ;;  %v3294_v29 = vpack.c.bf16 %v835_v17, %v827_v15  ;;  %v3498_v15 = vpack.c.bf16 %v885_v7, %v877_v5  ;;  %v3308_v17 = vpack.c.bf16 %v900_v9, %v892_v8  ;;  %v175_v7 = vld [vmem:[#allocation2 + $0xa0] sm:$0xff] }
 0x11e   :  { %3473 = vmatprep.subr.bf16.mxu1 %v3472_v33  ;;  %v851_v33 = vld [vmem:[#allocation2 + $0x15c0] sm:$0xff]  ;;  %v3488_v38 = vpack.c.bf16 %v854_v16, %v846_v28  ;;  %v908_v28 = vld [vmem:[#allocation2 + $0x1788] sm:$0xff]  ;;  %v3702_v5 = vpack.c.bf16 %v169_v58, %v161_v57 }
 0x11f   :  { %v916_v16 = vld [vmem:[#allocation2 + $0x17c8] sm:$0xff]  ;;  %v183_v8 = vld [vmem:[#allocation2 + $0xe0] sm:$0xff] }
 0x120   :  { %3283 = vmatpush1.bf16.msra.mxu0 %v3282_v45  ;;  %v862_v45 = vld [vmem:[#allocation2 + $0x1618] sm:$0xff]  ;;  %v232_v57 = vld [vmem:[#allocation2 + $0x268] sm:$0xff] }
 0x121   :  { %3475 = vmatpush1.bf16.msra.mxu1 %v3474_v46  ;;  %3285 = vmatprep.subr.bf16.mxu0 %v3284_v47  ;;  %v870_v46 = vld [vmem:[#allocation2 + $0x1658] sm:$0xff]  ;;  %v3298_v47 = vpack.c.bf16 %v851_v33, %v843_v32  ;;  %v3502_v32 = vpack.c.bf16 %v901_v27, %v893_v24  ;;  %v3312_v33 = vpack.c.bf16 %v916_v16, %v908_v28  ;;  %v191_v16 = vld [vmem:[#allocation2 + $0x120] sm:$0xff] }
 0x122   :  { %3477 = vmatprep.subr.bf16.mxu1 %v3476_v52  ;;  %v867_v52 = vld [vmem:[#allocation2 + $0x1640] sm:$0xff]  ;;  %v3492_v55 = vpack.c.bf16 %v870_v46, %v862_v45  ;;  %v160_v45 = vld [vmem:[#allocation2 + $0x28] sm:$0xff]  ;;  %v194_v24 = vld [vmem:[#allocation2 + $0x138] sm:$0xff] }
 0x123   :  { %v168_v46 = vld [vmem:[#allocation2 + $0x68] sm:$0xff] }
 0x124   :  { %3287 = vmatpush1.bf16.msra.mxu0 %v3286_v59  ;;  %v878_v59 = vld [vmem:[#allocation2 + $0x1698] sm:$0xff] }
 0x125   :  { %3479 = vmatpush1.bf16.msra.mxu1 %v3478_v60  ;;  %3289 = vmatprep.subr.bf16.mxu0 %v3288_v34  ;;  %v886_v60 = vld [vmem:[#allocation2 + $0x16d8] sm:$0xff]  ;;  %v3302_v34 = vpack.c.bf16 %v867_v52, %v859_v51  ;;  %v3506_v51 = vpack.c.bf16 %v917_v44, %v909_v40  ;;  %v3508_v52 = vpack.c.bf16 %v168_v46, %v160_v45  ;;  %v208_v40 = vld [vmem:[#allocation2 + $0x1a8] sm:$0xff] }
 0x126   :  { %3481 = vmatprep.subr.bf16.mxu1 %v3480_v3  ;;  %v883_v3 = vld [vmem:[#allocation2 + $0x16c0] sm:$0xff]  ;;  %v3496_v6 = vpack.c.bf16 %v886_v60, %v878_v59  ;;  %v124_v59 = vld [vmem:[%s5281_s0 + $0x28] sm:$0xff]  ;;  %v4590_v60 = vunpack.c.l.bf16 %v4574_v42  ;;  %v210_v45 = vld [vmem:[#allocation2 + $0x1b8] sm:$0xff] }
 0x127   :  { %v127_v42 = vld [vmem:[%s5281_s0 + $0x40] sm:$0xff]  ;;  %v218_v46 = vld [vmem:[#allocation2 + $0x1f8] sm:$0xff] }
 0x128   :  { %3291 = vmatpush1.bf16.msra.mxu0 %v3290_v10  ;;  %v894_v10 = vld [vmem:[#allocation2 + $0x1718] sm:$0xff]  ;;  %v4602_v28 = vunpack.c.h.bf16 %v127_v42 }
 0x129   :  { %3483 = vmatpush1.bf16.msra.mxu1 %v3482_v11  ;;  %3293 = vmatprep.subr.bf16.mxu0 %v3292_v13  ;;  %v902_v11 = vld [vmem:[#allocation2 + $0x1758] sm:$0xff]  ;;  %v3306_v13 = vpack.c.bf16 %v883_v3, %v875_v0 }
 0x12a   :  { %3485 = vmatprep.subr.bf16.mxu1 %v3484_v21  ;;  %v899_v21 = vld [vmem:[#allocation2 + $0x1740] sm:$0xff]  ;;  %v3500_v25 = vpack.c.bf16 %v902_v11, %v894_v10  ;;  %v178_v0 = vld [vmem:[#allocation2 + $0xb8] sm:$0xff]  ;;  %v177_v10 = vld [vmem:[#allocation2 + $0xb0] sm:$0xff] }
 0x12b   :  { %v186_v3 = vld [vmem:[#allocation2 + $0xf8] sm:$0xff]  ;;  %v185_v11 = vld [vmem:[#allocation2 + $0xf0] sm:$0xff] }
 0x12c   :  { %3295 = vmatpush1.bf16.msra.mxu0 %v3294_v29  ;;  %v910_v29 = vld [vmem:[#allocation2 + $0x1798] sm:$0xff]  ;;  %v3706_v27 = vpack.c.bf16 %v185_v11, %v177_v10  ;;  %v233_v10 = vld [vmem:[#allocation2 + $0x270] sm:$0xff]  ;;  %v240_v11 = vld [vmem:[#allocation2 + $0x2a8] sm:$0xff] }
 0x12d   :  { %3487 = vmatpush1.bf16.msra.mxu1 %v3486_v30  ;;  %3297 = vmatprep.subr.bf16.mxu0 %v3296_v31  ;;  %v918_v30 = vld [vmem:[#allocation2 + $0x17d8] sm:$0xff]  ;;  %v3310_v31 = vpack.c.bf16 %v899_v21, %v891_v20  ;;  %v200_v20 = vld [vmem:[#allocation2 + $0x168] sm:$0xff]  ;;  %v3514_v21 = vpack.c.bf16 %v183_v8, %v175_v7  ;;  %v231_v7 = vld [vmem:[#allocation2 + $0x260] sm:$0xff] }
 0x12e   :  { %3489 = vmatprep.subr.bf16.mxu1 %v3488_v38  ;;  %v915_v38 = vld [vmem:[#allocation2 + $0x17c0] sm:$0xff]  ;;  %v3504_v43 = vpack.c.bf16 %v918_v30, %v910_v29  ;;  %v225_v8 = vld [vmem:[#allocation2 + $0x230] sm:$0xff] }
 0x12f   :  { %v199_v29 = vld [vmem:[#allocation2 + $0x160] sm:$0xff] }
 0x130   :  { %3299 = vmatpush1.bf16.msra.mxu0 %v3298_v47  ;;  %v162_v47 = vld [vmem:[#allocation2 + $0x38] sm:$0xff]  ;;  %v3518_v44 = vpack.c.bf16 %v199_v29, %v191_v16  ;;  %v241_v16 = vld [vmem:[#allocation2 + $0x2b0] sm:$0xff] }
 0x131   :  { %3491 = vmatpush1.bf16.msra.mxu1 %v3490_v48  ;;  %3301 = vmatprep.subr.bf16.mxu0 %v3300_v50  ;;  %v170_v48 = vld [vmem:[#allocation2 + $0x78] sm:$0xff]  ;;  %v3314_v50 = vpack.c.bf16 %v915_v38, %v907_v35  ;;  %v4609_v35 = vunpack.c.l.bf16 %v127_v42  ;;  %v248_v42 = vld [vmem:[#allocation2 + $0x2e8] sm:$0xff] }
 0x132   :  { %3493 = vmatprep.subr.bf16.mxu1 %v3492_v55  ;;  %v167_v55 = vld [vmem:[#allocation2 + $0x60] sm:$0xff]  ;;  %v3700_v56 = vpack.c.bf16 %v170_v48, %v162_v47 }
 0x134   :  { %3303 = vmatpush1.bf16.msra.mxu0 %v3302_v34  ;;  %v176_v34 = vld [vmem:[#allocation2 + $0xa8] sm:$0xff] }
 0x135   :  { %3495 = vmatpush1.bf16.msra.mxu1 %v3494_v61  ;;  %3305 = vmatprep.subr.bf16.mxu0 %v3304_v63  ;;  %v184_v61 = vld [vmem:[#allocation2 + $0xe8] sm:$0xff]  ;;  %v3510_v63 = vpack.c.bf16 %v167_v55, %v159_v53  ;;  %v217_v55 = vld [vmem:[#allocation2 + $0x1f0] sm:$0xff] }
 0x136   :  { %3497 = vmatprep.subr.bf16.mxu1 %v3496_v6  ;;  %v4592_v6 = vunpack.c.h.bf16 %v124_v59  ;;  %v3512_v9 = vpack.c.bf16 %v184_v61, %v176_v34  ;;  %v226_v34 = vld [vmem:[#allocation2 + $0x238] sm:$0xff] }
 0x137   :  { %v234_v61 = vld [vmem:[#allocation2 + $0x278] sm:$0xff] }
 0x138   :  { %3307 = vmatpush1.bf16.msra.mxu0 %v3306_v13  ;;  %v4598_v13 = vunpack.c.l.bf16 %v124_v59  ;;  %v3712_v59 = vpack.c.bf16 %v218_v46, %v210_v45  ;;  %v255_v45 = vld [vmem:[#allocation2 + $0x320] sm:$0xff] }
 0x139   :  { %3499 = vmatpush1.bf16.msra.mxu1 %v3498_v15  ;;  %3309 = vmatprep.subr.bf16.mxu0 %v3308_v17  ;;  %v3704_v15 = vpack.c.bf16 %v186_v3, %v178_v0  ;;  %v192_v17 = vld [vmem:[#allocation2 + $0x128] sm:$0xff]  ;;  %v263_v46 = vld [vmem:[#allocation2 + $0x360] sm:$0xff] }
 0x13a   :  { %3501 = vmatprep.subr.bf16.mxu1 %v3500_v25  ;;  %v202_v25 = vld [vmem:[#allocation2 + $0x178] sm:$0xff]  ;;  %v3516_v30 = vpack.c.bf16 %v200_v20, %v192_v17 }
 0x13b   :  { %v3708_v38 = vpack.c.bf16 %v202_v25, %v194_v24  ;;  %v250_v17 = vld [vmem:[#allocation2 + $0x2f8] sm:$0xff]  ;;  %v3528_v24 = vpack.c.bf16 %v248_v42, %v240_v11  ;;  %v239_v25 = vld [vmem:[#allocation2 + $0x2a0] sm:$0xff] }
 0x13c   :  { %3311 = vmatpush1.bf16.msra.mxu0 %v3310_v31  ;;  %v193_v31 = vld [vmem:[#allocation2 + $0x130] sm:$0xff] }
 0x13d   :  { %3503 = vmatpush1.bf16.msra.mxu1 %v3502_v32  ;;  %3313 = vmatprep.subr.bf16.mxu0 %v3312_v33  ;;  %v201_v32 = vld [vmem:[#allocation2 + $0x170] sm:$0xff]  ;;  %v130_v33 = vld [vmem:[%s5281_s0 + $0x58] sm:$0xff] }
 0x13e   :  { %3505 = vmatprep.subr.bf16.mxu1 %v3504_v43  ;;  %v216_v43 = vld [vmem:[#allocation2 + $0x1e8] sm:$0xff]  ;;  %v3710_v47 = vpack.c.bf16 %v201_v32, %v193_v31  ;;  %v4613_v48 = vunpack.c.h.bf16 %v130_v33  ;;  %v4617_v58 = vunpack.c.l.bf16 %v130_v33  ;;  %v258_v33 = vld [vmem:[#allocation2 + $0x338] sm:$0xff] }
 0x13f   :  { %v3520_v53 = vpack.c.bf16 %v216_v43, %v208_v40  ;;  %v256_v31 = vld [vmem:[#allocation2 + $0x328] sm:$0xff] }
 0x140   :  { %3315 = vmatpush1.bf16.msra.mxu0 %v3314_v50  ;;  %v207_v50 = vld [vmem:[#allocation2 + $0x1a0] sm:$0xff]  ;;  %v264_v32 = vld [vmem:[#allocation2 + $0x368] sm:$0xff] }
 0x141   :  { %3507 = vmatpush1.bf16.msra.mxu1 %v3506_v51  ;;  %3509 = vmatprep.subr.bf16.mxu0 %v3508_v52  ;;  %v215_v51 = vld [vmem:[#allocation2 + $0x1e0] sm:$0xff]  ;;  %v209_v52 = vld [vmem:[#allocation2 + $0x1b0] sm:$0xff] }
 0x142   :  { %3701 = vmatprep.subr.bf16.mxu1 %v3700_v56  ;;  %v224_v56 = vld [vmem:[#allocation2 + $0x228] sm:$0xff]  ;;  %v3714_v0 = vpack.c.bf16 %v217_v55, %v209_v52  ;;  %v274_v55 = vld [vmem:[#allocation2 + $0x3b8] sm:$0xff] }
 0x143   :  { %1208 = vmatmul.mubr.f32.vlgmr.msra.gmra.mrb[0].mxu0 %v4590_v60  ;;  %v3524_v3 = vpack.c.bf16 %v232_v57, %v224_v56  ;;  %v272_v52 = vld [vmem:[#allocation2 + $0x3a8] sm:$0xff]  ;;  %v282_v56 = vld [vmem:[#allocation2 + $0x3f8] sm:$0xff]  ;;  %v3534_v57 = vpack.c.bf16 %v263_v46, %v255_v45 }
 0x144   :  { %1475 = vmatmul.mubr.f32.vlgmr.msra.gmra.mrb[0].mxu1 %v4590_v60  ;;  %3511 = vmatpush1.bf16.msra.mxu0 %v3510_v63  ;;  %v3522_v63 = vpack.c.bf16 %v215_v51, %v207_v50  ;;  %v265_v51 = vld [vmem:[#allocation2 + $0x370] sm:$0xff]  ;;  %v320_v45 = vld [vmem:[#allocation2 + $0x528] sm:$0xff] }
 0x145   :  { %3703 = vmatpush1.bf16.msra.mxu1 %v3702_v5  ;;  %1213 = vmatprep.mubr.f32.mxu0 %v4592_v6  ;;  %v223_v5 = vld [vmem:[#allocation2 + $0x220] sm:$0xff]  ;;  %v328_v46 = vld [vmem:[#allocation2 + $0x568] sm:$0xff] }
 0x146   :  { %1480 = vmatprep.mubr.f32.mxu1 %v4592_v6  ;;  %3513 = vmatprep.subr.bf16.mxu0 %v3512_v9  ;;  %v3716_v9 = vpack.c.bf16 %v234_v61, %v226_v34  ;;  %v3526_v20 = vpack.c.bf16 %v231_v7, %v223_v5  ;;  %v271_v34 = vld [vmem:[#allocation2 + $0x3a0] sm:$0xff]  ;;  %v288_v5 = vld [vmem:[#allocation2 + $0x428] sm:$0xff] }
 0x147   :  { %1214 = vmatmul.mubr.f32.gmra.mrb[2].mxu0 %v4598_v13  ;;  %3705 = vmatprep.subr.bf16.mxu1 %v3704_v15  ;;  %v242_v15 = vld [vmem:[#allocation2 + $0x2b8] sm:$0xff]  ;;  %v279_v61 = vld [vmem:[#allocation2 + $0x3e0] sm:$0xff]  ;;  %v296_v7 = vld [vmem:[#allocation2 + $0x468] sm:$0xff] }
 0x148   :  { %1481 = vmatmul.mubr.f32.gmra.mrb[2].mxu1 %v4598_v13  ;;  %3515 = vmatpush1.bf16.msra.mxu0 %v3514_v21  ;;  %v3718_v21 = vpack.c.bf16 %v233_v10, %v225_v8  ;;  %v3720_v29 = vpack.c.bf16 %v250_v17, %v242_v15  ;;  %v290_v8 = vld [vmem:[#allocation2 + $0x438] sm:$0xff]  ;;  %v3538_v10 = vpack.c.bf16 %v279_v61, %v271_v34  ;;  %v287_v15 = vld [vmem:[#allocation2 + $0x420] sm:$0xff]  ;;  %v336_v34 = vld [vmem:[#allocation2 + $0x5a8] sm:$0xff] }
 0x149   :  { %3707 = vmatpush1.bf16.msra.mxu1 %v3706_v27  ;;  %1219 = vmatprep.mubr.f32.mxu0 %v4602_v28  ;;  %v247_v27 = vld [vmem:[#allocation2 + $0x2e0] sm:$0xff]  ;;  %v3540_v42 = vpack.c.bf16 %v296_v7, %v288_v5  ;;  %v344_v61 = vld [vmem:[#allocation2 + $0x5e8] sm:$0xff] }
 0x14a   :  { %1486 = vmatprep.mubr.f32.mxu1 %v4602_v28  ;;  %3517 = vmatprep.subr.bf16.mxu0 %v3516_v30  ;;  %v249_v30 = vld [vmem:[#allocation2 + $0x2f0] sm:$0xff]  ;;  %v3530_v40 = vpack.c.bf16 %v247_v27, %v239_v25  ;;  %v295_v17 = vld [vmem:[#allocation2 + $0x460] sm:$0xff]  ;;  %v304_v25 = vld [vmem:[#allocation2 + $0x4a8] sm:$0xff]  ;;  %v3552_v7 = vpack.c.bf16 %v344_v61, %v336_v34 }
 0x14b   :  { %1220 = vmatmul.mubr.f32.gmra.mrb[4].mxu0 %v4609_v35  ;;  %3709 = vmatprep.subr.bf16.mxu1 %v3708_v38  ;;  %v266_v38 = vld [vmem:[#allocation2 + $0x378] sm:$0xff]  ;;  %v3722_v43 = vpack.c.bf16 %v249_v30, %v241_v16  ;;  %v312_v27 = vld [vmem:[#allocation2 + $0x4e8] sm:$0xff]  ;;  %v3542_v30 = vpack.c.bf16 %v295_v17, %v287_v15 }
 0x14c   :  { %1487 = vmatmul.mubr.f32.gmra.mrb[4].mxu1 %v4609_v35  ;;  %3519 = vmatpush1.bf16.msra.mxu0 %v3518_v44  ;;  %v3532_v44 = vpack.c.bf16 %v264_v32, %v256_v31  ;;  %v3724_v50 = vpack.c.bf16 %v266_v38, %v258_v33  ;;  %v306_v16 = vld [vmem:[#allocation2 + $0x4b8] sm:$0xff]  ;;  %v3544_v32 = vpack.c.bf16 %v312_v27, %v304_v25  ;;  %v303_v33 = vld [vmem:[#allocation2 + $0x4a0] sm:$0xff]  ;;  %v352_v15 = vld [vmem:[#allocation2 + $0x628] sm:$0xff] }
 0x14d   :  { %3711 = vmatpush1.bf16.msra.mxu1 %v3710_v47  ;;  %1225 = vmatprep.mubr.f32.mxu0 %v4613_v48  ;;  %v257_v47 = vld [vmem:[#allocation2 + $0x330] sm:$0xff]  ;;  %v311_v38 = vld [vmem:[#allocation2 + $0x4e0] sm:$0xff]  ;;  %v360_v17 = vld [vmem:[#allocation2 + $0x668] sm:$0xff] }
 0x14e   :  { %1492 = vmatprep.mubr.f32.mxu1 %v4613_v48  ;;  %3521 = vmatprep.subr.bf16.mxu0 %v3520_v53  ;;  %v280_v53 = vld [vmem:[#allocation2 + $0x3e8] sm:$0xff]  ;;  %v3556_v27 = vpack.c.bf16 %v360_v17, %v352_v15 }
 0x14f   :  { %1226 = vmatmul.mubr.f32.gmra.mrb[6].mxu0 %v4617_v58  ;;  %3713 = vmatprep.subr.bf16.mxu1 %v3712_v59  ;;  %v3536_v59 = vpack.c.bf16 %v280_v53, %v272_v52  ;;  %v3548_v53 = vpack.c.bf16 %v328_v46, %v320_v45 }
 0x150   :  { %1493 = vmatmul.mubr.f32.gmra.mrb[6].mxu1 %v4617_v58  ;;  %3523 = vmatpush1.bf16.msra.mxu0 %v3522_v63  ;;  %v273_v63 = vld [vmem:[#allocation2 + $0x3b0] sm:$0xff] }
 0x151   :  { %3715 = vmatpush1.bf16.msra.mxu1 %v3714_v0  ;;  %3525 = vmatprep.subr.bf16.mxu0 %v3524_v3  ;;  %v3728_v0 = vpack.c.bf16 %v282_v56, %v274_v55  ;;  %v281_v3 = vld [vmem:[#allocation2 + $0x3f0] sm:$0xff]  ;;  %v319_v55 = vld [vmem:[#allocation2 + $0x520] sm:$0xff] }
 0x152   :  { %3717 = vmatprep.subr.bf16.mxu1 %v3716_v9  ;;  %1563 = vmatprep.mubr.f32.mxu0 %v4486_v19  ;;  %v298_v9 = vld [vmem:[#allocation2 + $0x478] sm:$0xff]  ;;  %v3730_v11 = vpack.c.bf16 %v281_v3, %v273_v63  ;;  %v327_v56 = vld [vmem:[#allocation2 + $0x560] sm:$0xff] }
 0x153   :  { %1830 = vmatprep.mubr.f32.mxu1 %v4486_v19  ;;  %v3726_v19 = vpack.c.bf16 %v265_v51, %v257_v47  ;;  %v322_v47 = vld [vmem:[#allocation2 + $0x538] sm:$0xff]  ;;  %v3546_v51 = vpack.c.bf16 %v311_v38, %v303_v33  ;;  %v3550_v3 = vpack.c.bf16 %v327_v56, %v319_v55  ;;  %v368_v33 = vld [vmem:[#allocation2 + $0x6a8] sm:$0xff] }
 0x154   :  { %3527 = vmatpush1.bf16.msra.mxu0 %v3526_v20  ;;  %v289_v20 = vld [vmem:[#allocation2 + $0x430] sm:$0xff]  ;;  %v338_v63 = vld [vmem:[#allocation2 + $0x5b8] sm:$0xff]  ;;  %v376_v38 = vld [vmem:[#allocation2 + $0x6e8] sm:$0xff] }
 0x155   :  { %3719 = vmatpush1.bf16.msra.mxu1 %v3718_v21  ;;  %3529 = vmatprep.subr.bf16.mxu0 %v3528_v24  ;;  %v3732_v21 = vpack.c.bf16 %v298_v9, %v290_v8  ;;  %v297_v24 = vld [vmem:[#allocation2 + $0x470] sm:$0xff]  ;;  %v335_v8 = vld [vmem:[#allocation2 + $0x5a0] sm:$0xff]  ;;  %v3560_v46 = vpack.c.bf16 %v376_v38, %v368_v33  ;;  %v384_v55 = vld [vmem:[#allocation2 + $0x728] sm:$0xff] }
 0x156   :  { %3721 = vmatprep.subr.bf16.mxu1 %v3720_v29  ;;  %v314_v29 = vld [vmem:[#allocation2 + $0x4f8] sm:$0xff]  ;;  %v3734_v31 = vpack.c.bf16 %v297_v24, %v289_v20  ;;  %v343_v9 = vld [vmem:[#allocation2 + $0x5e0] sm:$0xff]  ;;  %v392_v56 = vld [vmem:[#allocation2 + $0x768] sm:$0xff] }
 0x157   :  { %v354_v20 = vld [vmem:[#allocation2 + $0x638] sm:$0xff]  ;;  %v3554_v24 = vpack.c.bf16 %v343_v9, %v335_v8  ;;  %v3564_v61 = vpack.c.bf16 %v392_v56, %v384_v55  ;;  %v400_v8 = vld [vmem:[#allocation2 + $0x7a8] sm:$0xff] }
 0x158   :  { %3531 = vmatpush1.bf16.msra.mxu0 %v3530_v40  ;;  %v305_v40 = vld [vmem:[#allocation2 + $0x4b0] sm:$0xff]  ;;  %v408_v9 = vld [vmem:[#allocation2 + $0x7e8] sm:$0xff] }
 0x159   :  { %3723 = vmatpush1.bf16.msra.mxu1 %v3722_v43  ;;  %3533 = vmatprep.subr.bf16.mxu0 %v3532_v44  ;;  %v3736_v43 = vpack.c.bf16 %v314_v29, %v306_v16  ;;  %v313_v44 = vld [vmem:[#allocation2 + $0x4f0] sm:$0xff]  ;;  %v351_v16 = vld [vmem:[#allocation2 + $0x620] sm:$0xff]  ;;  %v3568_v17 = vpack.c.bf16 %v408_v9, %v400_v8 }
 0x15a   :  { %3725 = vmatprep.subr.bf16.mxu1 %v3724_v50  ;;  %v330_v50 = vld [vmem:[#allocation2 + $0x578] sm:$0xff]  ;;  %v3738_v52 = vpack.c.bf16 %v313_v44, %v305_v40  ;;  %v359_v29 = vld [vmem:[#allocation2 + $0x660] sm:$0xff] }
 0x15b   :  { %v370_v40 = vld [vmem:[#allocation2 + $0x6b8] sm:$0xff]  ;;  %v3558_v44 = vpack.c.bf16 %v359_v29, %v351_v16  ;;  %v416_v16 = vld [vmem:[#allocation2 + $0x828] sm:$0xff] }
 0x15c   :  { %3535 = vmatpush1.bf16.msra.mxu0 %v3534_v57  ;;  %v321_v57 = vld [vmem:[#allocation2 + $0x530] sm:$0xff]  ;;  %v424_v29 = vld [vmem:[#allocation2 + $0x868] sm:$0xff] }
 0x15d   :  { %3727 = vmatpush1.bf16.msra.mxu1 %v3726_v19  ;;  %3537 = vmatprep.subr.bf16.mxu0 %v3536_v59  ;;  %v3740_v19 = vpack.c.bf16 %v330_v50, %v322_v47  ;;  %v329_v59 = vld [vmem:[#allocation2 + $0x570] sm:$0xff]  ;;  %v367_v47 = vld [vmem:[#allocation2 + $0x6a0] sm:$0xff]  ;;  %v3572_v38 = vpack.c.bf16 %v424_v29, %v416_v16 }
 0x15e   :  { %3729 = vmatprep.subr.bf16.mxu1 %v3728_v0  ;;  %v346_v0 = vld [vmem:[#allocation2 + $0x5f8] sm:$0xff]  ;;  %v3742_v5 = vpack.c.bf16 %v329_v59, %v321_v57  ;;  %v375_v50 = vld [vmem:[#allocation2 + $0x6e0] sm:$0xff] }
 0x15f   :  { %v386_v57 = vld [vmem:[#allocation2 + $0x738] sm:$0xff]  ;;  %v3562_v59 = vpack.c.bf16 %v375_v50, %v367_v47  ;;  %v432_v47 = vld [vmem:[#allocation2 + $0x8a8] sm:$0xff]  ;;  %v463_v29 = vld [vmem:[#allocation2 + $0x9a0] sm:$0xff] }
 0x160   :  { %3539 = vmatpush1.bf16.msra.mxu0 %v3538_v10  ;;  %v337_v10 = vld [vmem:[#allocation2 + $0x5b0] sm:$0xff]  ;;  %v440_v50 = vld [vmem:[#allocation2 + $0x8e8] sm:$0xff] }
 0x161   :  { %3731 = vmatpush1.bf16.msra.mxu1 %v3730_v11  ;;  %3541 = vmatprep.subr.bf16.mxu0 %v3540_v42  ;;  %v3744_v11 = vpack.c.bf16 %v346_v0, %v338_v63  ;;  %v345_v42 = vld [vmem:[#allocation2 + $0x5f0] sm:$0xff]  ;;  %v383_v63 = vld [vmem:[#allocation2 + $0x720] sm:$0xff]  ;;  %v3576_v56 = vpack.c.bf16 %v440_v50, %v432_v47 }
 0x162   :  { %3733 = vmatprep.subr.bf16.mxu1 %v3732_v21  ;;  %v362_v21 = vld [vmem:[#allocation2 + $0x678] sm:$0xff]  ;;  %v3746_v25 = vpack.c.bf16 %v345_v42, %v337_v10  ;;  %v391_v0 = vld [vmem:[#allocation2 + $0x760] sm:$0xff]  ;;  %v481_v50 = vld [vmem:[#allocation2 + $0xa30] sm:$0xff] }
 0x163   :  { %v402_v10 = vld [vmem:[#allocation2 + $0x7b8] sm:$0xff]  ;;  %v3566_v42 = vpack.c.bf16 %v391_v0, %v383_v63  ;;  %v448_v63 = vld [vmem:[#allocation2 + $0x928] sm:$0xff]  ;;  %v487_v47 = vld [vmem:[#allocation2 + $0xa60] sm:$0xff] }
 0x164   :  { %3543 = vmatpush1.bf16.msra.mxu0 %v3542_v30  ;;  %v353_v30 = vld [vmem:[#allocation2 + $0x630] sm:$0xff]  ;;  %v456_v0 = vld [vmem:[#allocation2 + $0x968] sm:$0xff] }
 0x165   :  { %3735 = vmatpush1.bf16.msra.mxu1 %v3734_v31  ;;  %3545 = vmatprep.subr.bf16.mxu0 %v3544_v32  ;;  %v3748_v31 = vpack.c.bf16 %v362_v21, %v354_v20  ;;  %v361_v32 = vld [vmem:[#allocation2 + $0x670] sm:$0xff]  ;;  %v399_v20 = vld [vmem:[#allocation2 + $0x7a0] sm:$0xff]  ;;  %v3580_v9 = vpack.c.bf16 %v456_v0, %v448_v63 }
 0x166   :  { %3737 = vmatprep.subr.bf16.mxu1 %v3736_v43  ;;  %v378_v43 = vld [vmem:[#allocation2 + $0x6f8] sm:$0xff]  ;;  %v3750_v45 = vpack.c.bf16 %v361_v32, %v353_v30  ;;  %v407_v21 = vld [vmem:[#allocation2 + $0x7e0] sm:$0xff]  ;;  %v505_v0 = vld [vmem:[#allocation2 + $0xaf0] sm:$0xff] }
 0x167   :  { %v418_v30 = vld [vmem:[#allocation2 + $0x838] sm:$0xff]  ;;  %v3570_v32 = vpack.c.bf16 %v407_v21, %v399_v20  ;;  %v464_v20 = vld [vmem:[#allocation2 + $0x9a8] sm:$0xff] }
 0x168   :  { %3547 = vmatpush1.bf16.msra.mxu0 %v3546_v51  ;;  %v369_v51 = vld [vmem:[#allocation2 + $0x6b0] sm:$0xff]  ;;  %v472_v21 = vld [vmem:[#allocation2 + $0x9e8] sm:$0xff] }
 0x169   :  { %3739 = vmatpush1.bf16.msra.mxu1 %v3738_v52  ;;  %3549 = vmatprep.subr.bf16.mxu0 %v3548_v53  ;;  %v3752_v52 = vpack.c.bf16 %v378_v43, %v370_v40  ;;  %v377_v53 = vld [vmem:[#allocation2 + $0x6f0] sm:$0xff]  ;;  %v415_v40 = vld [vmem:[#allocation2 + $0x820] sm:$0xff]  ;;  %v3584_v16 = vpack.c.bf16 %v472_v21, %v464_v20  ;;  %v528_v20 = vld [vmem:[#allocation2 + $0xba8] sm:$0xff] }
 0x16a   :  { %3741 = vmatprep.subr.bf16.mxu1 %v3740_v19  ;;  %v394_v19 = vld [vmem:[#allocation2 + $0x778] sm:$0xff]  ;;  %v3754_v34 = vpack.c.bf16 %v377_v53, %v369_v51  ;;  %v423_v43 = vld [vmem:[#allocation2 + $0x860] sm:$0xff]  ;;  %v536_v21 = vld [vmem:[#allocation2 + $0xbe8] sm:$0xff] }
 0x16b   :  { %v434_v51 = vld [vmem:[#allocation2 + $0x8b8] sm:$0xff]  ;;  %v3574_v53 = vpack.c.bf16 %v423_v43, %v415_v40  ;;  %v488_v40 = vld [vmem:[#allocation2 + $0xa68] sm:$0xff] }
 0x16c   :  { %3551 = vmatpush1.bf16.msra.mxu0 %v3550_v3  ;;  %v385_v3 = vld [vmem:[#allocation2 + $0x730] sm:$0xff]  ;;  %v490_v43 = vld [vmem:[#allocation2 + $0xa78] sm:$0xff] }
 0x16d   :  { %3743 = vmatpush1.bf16.msra.mxu1 %v3742_v5  ;;  %3553 = vmatprep.subr.bf16.mxu0 %v3552_v7  ;;  %v3756_v5 = vpack.c.bf16 %v394_v19, %v386_v57  ;;  %v393_v7 = vld [vmem:[#allocation2 + $0x770] sm:$0xff]  ;;  %v431_v57 = vld [vmem:[#allocation2 + $0x8a0] sm:$0xff] }
 0x16e   :  { %3745 = vmatprep.subr.bf16.mxu1 %v3744_v11  ;;  %v410_v11 = vld [vmem:[#allocation2 + $0x7f8] sm:$0xff]  ;;  %v3758_v15 = vpack.c.bf16 %v393_v7, %v385_v3  ;;  %v439_v19 = vld [vmem:[#allocation2 + $0x8e0] sm:$0xff] }
 0x16f   :  { %v450_v3 = vld [vmem:[#allocation2 + $0x938] sm:$0xff]  ;;  %v3578_v7 = vpack.c.bf16 %v439_v19, %v431_v57 }
 0x170   :  { %3555 = vmatpush1.bf16.msra.mxu0 %v3554_v24  ;;  %v401_v24 = vld [vmem:[#allocation2 + $0x7b0] sm:$0xff] }
 0x171   :  { %3747 = vmatpush1.bf16.msra.mxu1 %v3746_v25  ;;  %3557 = vmatprep.subr.bf16.mxu0 %v3556_v27  ;;  %v3760_v25 = vpack.c.bf16 %v410_v11, %v402_v10  ;;  %v409_v27 = vld [vmem:[#allocation2 + $0x7f0] sm:$0xff]  ;;  %v447_v10 = vld [vmem:[#allocation2 + $0x920] sm:$0xff] }
 0x172   :  { %3749 = vmatprep.subr.bf16.mxu1 %v3748_v31  ;;  %v426_v31 = vld [vmem:[#allocation2 + $0x878] sm:$0xff]  ;;  %v3762_v33 = vpack.c.bf16 %v409_v27, %v401_v24  ;;  %v455_v11 = vld [vmem:[#allocation2 + $0x960] sm:$0xff] }
 0x173   :  { %v466_v24 = vld [vmem:[#allocation2 + $0x9b8] sm:$0xff] }
 0x174   :  { %3559 = vmatpush1.bf16.msra.mxu0 %v3558_v44  ;;  %v417_v44 = vld [vmem:[#allocation2 + $0x830] sm:$0xff] }
 0x175   :  { %3751 = vmatpush1.bf16.msra.mxu1 %v3750_v45  ;;  %3561 = vmatprep.subr.bf16.mxu0 %v3560_v46  ;;  %v3764_v45 = vpack.c.bf16 %v426_v31, %v418_v30  ;;  %v425_v46 = vld [vmem:[#allocation2 + $0x870] sm:$0xff]  ;;  %v471_v30 = vld [vmem:[#allocation2 + $0x9e0] sm:$0xff] }
 0x176   :  { %3753 = vmatprep.subr.bf16.mxu1 %v3752_v52  ;;  %v442_v52 = vld [vmem:[#allocation2 + $0x8f8] sm:$0xff]  ;;  %v3766_v55 = vpack.c.bf16 %v425_v46, %v417_v44  ;;  %v465_v31 = vld [vmem:[#allocation2 + $0x9b0] sm:$0xff]  ;;  %v479_v46 = vld [vmem:[#allocation2 + $0xa20] sm:$0xff] }
 0x178   :  { %3563 = vmatpush1.bf16.msra.mxu0 %v3562_v59  ;;  %v433_v59 = vld [vmem:[#allocation2 + $0x8b0] sm:$0xff] }
 0x179   :  { %3755 = vmatpush1.bf16.msra.mxu1 %v3754_v34  ;;  %3565 = vmatprep.subr.bf16.mxu0 %v3564_v61  ;;  %v3768_v34 = vpack.c.bf16 %v442_v52, %v434_v51  ;;  %v441_v61 = vld [vmem:[#allocation2 + $0x8f0] sm:$0xff] }
 0x17a   :  { %3757 = vmatprep.subr.bf16.mxu1 %v3756_v5  ;;  %v458_v5 = vld [vmem:[#allocation2 + $0x978] sm:$0xff]  ;;  %v3770_v8 = vpack.c.bf16 %v441_v61, %v433_v59  ;;  %v489_v52 = vld [vmem:[#allocation2 + $0xa70] sm:$0xff]  ;;  %v495_v59 = vld [vmem:[#allocation2 + $0xaa0] sm:$0xff] }
 0x17b   :  { %v3782_v57 = vpack.c.bf16 %v489_v52, %v481_v50  ;;  %v497_v61 = vld [vmem:[#allocation2 + $0xab0] sm:$0xff]  ;;  %v560_v52 = vld [vmem:[#allocation2 + $0xca8] sm:$0xff] }
 0x17c   :  { %3567 = vmatpush1.bf16.msra.mxu0 %v3566_v42  ;;  %v449_v42 = vld [vmem:[#allocation2 + $0x930] sm:$0xff] }
 0x17d   :  { %3759 = vmatpush1.bf16.msra.mxu1 %v3758_v15  ;;  %3569 = vmatprep.subr.bf16.mxu0 %v3568_v17  ;;  %v3772_v15 = vpack.c.bf16 %v458_v5, %v450_v3  ;;  %v457_v17 = vld [vmem:[#allocation2 + $0x970] sm:$0xff]  ;;  %v512_v3 = vld [vmem:[#allocation2 + $0xb28] sm:$0xff] }
 0x17e   :  { %3761 = vmatprep.subr.bf16.mxu1 %v3760_v25  ;;  %v474_v25 = vld [vmem:[#allocation2 + $0x9f8] sm:$0xff]  ;;  %v3774_v27 = vpack.c.bf16 %v457_v17, %v449_v42  ;;  %v520_v5 = vld [vmem:[#allocation2 + $0xb68] sm:$0xff]  ;;  %v513_v42 = vld [vmem:[#allocation2 + $0xb30] sm:$0xff] }
 0x17f   :  { %v521_v17 = vld [vmem:[#allocation2 + $0xb70] sm:$0xff] }
 0x180   :  { %3571 = vmatpush1.bf16.msra.mxu0 %v3570_v32  ;;  %v3776_v32 = vpack.c.bf16 %v474_v25, %v466_v24  ;;  %v530_v24 = vld [vmem:[#allocation2 + $0xbb8] sm:$0xff] }
 0x181   :  { %3763 = vmatpush1.bf16.msra.mxu1 %v3762_v33  ;;  %3573 = vmatprep.subr.bf16.mxu0 %v3572_v38  ;;  %v473_v33 = vld [vmem:[#allocation2 + $0x9f0] sm:$0xff]  ;;  %v480_v38 = vld [vmem:[#allocation2 + $0xa28] sm:$0xff]  ;;  %v538_v25 = vld [vmem:[#allocation2 + $0xbf8] sm:$0xff] }
 0x182   :  { %3765 = vmatprep.subr.bf16.mxu1 %v3764_v45  ;;  %v3778_v44 = vpack.c.bf16 %v473_v33, %v465_v31  ;;  %v3588_v45 = vpack.c.bf16 %v488_v40, %v480_v38  ;;  %v3792_v31 = vpack.c.bf16 %v538_v25, %v530_v24  ;;  %v544_v33 = vld [vmem:[#allocation2 + $0xc28] sm:$0xff]  ;;  %v546_v40 = vld [vmem:[#allocation2 + $0xc38] sm:$0xff] }
 0x183   :  { %1564 = vmatmul.mubr.f32.vlgmr.msra.gmra.mrb[8].mxu0 %v4491_v14  ;;  %v552_v38 = vld [vmem:[#allocation2 + $0xc68] sm:$0xff]  ;;  %v602_v24 = vld [vmem:[#allocation2 + $0xdf8] sm:$0xff] }
 0x184   :  { %3575 = vmatpush1.bf16.msra.mxu0 %v3574_v53  ;;  %1831 = vmatmul.mubr.f32.vlgmr.msra.gmra.mrb[8].mxu1 %v4491_v14  ;;  %v3582_v14 = vpack.c.bf16 %v455_v11, %v447_v10  ;;  %v496_v53 = vld [vmem:[#allocation2 + $0xaa8] sm:$0xff]  ;;  %v511_v10 = vld [vmem:[#allocation2 + $0xb20] sm:$0xff] }
 0x185   :  { %3767 = vmatpush1.bf16.msra.mxu1 %v3766_v55  ;;  %3577 = vmatprep.subr.bf16.mxu0 %v3576_v56  ;;  %v504_v55 = vld [vmem:[#allocation2 + $0xae8] sm:$0xff]  ;;  %v506_v56 = vld [vmem:[#allocation2 + $0xaf8] sm:$0xff]  ;;  %v519_v11 = vld [vmem:[#allocation2 + $0xb60] sm:$0xff] }
 0x186   :  { %3769 = vmatprep.subr.bf16.mxu1 %v3768_v34  ;;  %1569 = vmatprep.mubr.f32.mxu0 %v4498_v1  ;;  %v3592_v19 = vpack.c.bf16 %v504_v55, %v496_v53  ;;  %v503_v34 = vld [vmem:[#allocation2 + $0xae0] sm:$0xff]  ;;  %v568_v53 = vld [vmem:[#allocation2 + $0xce8] sm:$0xff]  ;;  %v562_v55 = vld [vmem:[#allocation2 + $0xcb8] sm:$0xff] }
 0x187   :  { %1836 = vmatprep.mubr.f32.mxu1 %v4498_v1  ;;  %1570 = vmatmul.mubr.f32.gmra.mrb[10].mxu0 %v4500_v4  ;;  %v482_v1 = vld [vmem:[#allocation2 + $0xa38] sm:$0xff] }
 0x188   :  { %3579 = vmatpush1.bf16.msra.mxu0 %v3578_v7  ;;  %1837 = vmatmul.mubr.f32.gmra.mrb[10].mxu1 %v4500_v4  ;;  %v3586_v4 = vpack.c.bf16 %v471_v30, %v463_v29  ;;  %v3780_v51 = vpack.c.bf16 %v490_v43, %v482_v1  ;;  %v522_v7 = vld [vmem:[#allocation2 + $0xb78] sm:$0xff]  ;;  %v535_v29 = vld [vmem:[#allocation2 + $0xbe0] sm:$0xff]  ;;  %v529_v30 = vld [vmem:[#allocation2 + $0xbb0] sm:$0xff] }
 0x189   :  { %3771 = vmatpush1.bf16.msra.mxu1 %v3770_v8  ;;  %3581 = vmatprep.subr.bf16.mxu0 %v3580_v9  ;;  %v3786_v8 = vpack.c.bf16 %v505_v0, %v497_v61  ;;  %v3596_v9 = vpack.c.bf16 %v520_v5, %v512_v3  ;;  %v554_v1 = vld [vmem:[#allocation2 + $0xc78] sm:$0xff]  ;;  %v576_v0 = vld [vmem:[#allocation2 + $0xd28] sm:$0xff] }
 0x18a   :  { %3773 = vmatprep.subr.bf16.mxu1 %v3772_v15  ;;  %1575 = vmatprep.mubr.f32.mxu0 %v4506_v12  ;;  %v3796_v50 = vpack.c.bf16 %v554_v1, %v546_v40  ;;  %v584_v3 = vld [vmem:[#allocation2 + $0xd68] sm:$0xff]  ;;  %v578_v5 = vld [vmem:[#allocation2 + $0xd38] sm:$0xff] }
 0x18b   :  { %1842 = vmatprep.mubr.f32.mxu1 %v4506_v12  ;;  %1576 = vmatmul.mubr.f32.gmra.mrb[12].mxu0 %v4511_v22  ;;  %v498_v12 = vld [vmem:[#allocation2 + $0xab8] sm:$0xff] }
 0x18c   :  { %3583 = vmatpush1.bf16.msra.mxu0 %v3582_v14  ;;  %1843 = vmatmul.mubr.f32.gmra.mrb[12].mxu1 %v4511_v22  ;;  %v3590_v22 = vpack.c.bf16 %v487_v47, %v479_v46  ;;  %v3784_v63 = vpack.c.bf16 %v506_v56, %v498_v12  ;;  %v3598_v14 = vpack.c.bf16 %v519_v11, %v511_v10  ;;  %v551_v46 = vld [vmem:[#allocation2 + $0xc60] sm:$0xff]  ;;  %v545_v47 = vld [vmem:[#allocation2 + $0xc30] sm:$0xff]  ;;  %v570_v12 = vld [vmem:[#allocation2 + $0xcf8] sm:$0xff] }
 0x18d   :  { %3775 = vmatpush1.bf16.msra.mxu1 %v3774_v27  ;;  %3585 = vmatprep.subr.bf16.mxu0 %v3584_v16  ;;  %v3600_v27 = vpack.c.bf16 %v536_v21, %v528_v20  ;;  %v527_v16 = vld [vmem:[#allocation2 + $0xba0] sm:$0xff]  ;;  %v3800_v61 = vpack.c.bf16 %v570_v12, %v562_v55  ;;  %v577_v11 = vld [vmem:[#allocation2 + $0xd30] sm:$0xff]  ;;  %v600_v20 = vld [vmem:[#allocation2 + $0xde8] sm:$0xff] }
 0x18e   :  { %3777 = vmatprep.subr.bf16.mxu1 %v3776_v32  ;;  %1581 = vmatprep.mubr.f32.mxu0 %v4517_v26  ;;  %v537_v32 = vld [vmem:[#allocation2 + $0xbf0] sm:$0xff]  ;;  %v3602_v43 = vpack.c.bf16 %v535_v29, %v527_v16  ;;  %v583_v10 = vld [vmem:[#allocation2 + $0xd60] sm:$0xff]  ;;  %v594_v21 = vld [vmem:[#allocation2 + $0xdb8] sm:$0xff] }
 0x18f   :  { %1848 = vmatprep.mubr.f32.mxu1 %v4517_v26  ;;  %1582 = vmatmul.mubr.f32.gmra.mrb[14].mxu0 %v4527_v37  ;;  %v514_v26 = vld [vmem:[#allocation2 + $0xb38] sm:$0xff]  ;;  %v599_v16 = vld [vmem:[#allocation2 + $0xde0] sm:$0xff]  ;;  %v593_v29 = vld [vmem:[#allocation2 + $0xdb0] sm:$0xff] }
 0x190   :  { %3587 = vmatpush1.bf16.msra.mxu0 %v3586_v4  ;;  %1849 = vmatmul.mubr.f32.gmra.mrb[14].mxu1 %v4527_v37  ;;  %v3594_v37 = vpack.c.bf16 %v503_v34, %v495_v59  ;;  %v3788_v15 = vpack.c.bf16 %v522_v7, %v514_v26  ;;  %v3794_v4 = vpack.c.bf16 %v537_v32, %v529_v30  ;;  %v567_v59 = vld [vmem:[#allocation2 + $0xce0] sm:$0xff]  ;;  %v561_v34 = vld [vmem:[#allocation2 + $0xcb0] sm:$0xff]  ;;  %v586_v26 = vld [vmem:[#allocation2 + $0xd78] sm:$0xff] }
 0x191   :  { %3779 = vmatpush1.bf16.msra.mxu1 %v3778_v44  ;;  %3589 = vmatprep.subr.bf16.mxu0 %v3588_v45  ;;  %v3604_v44 = vpack.c.bf16 %v552_v38, %v544_v33  ;;  %v543_v45 = vld [vmem:[#allocation2 + $0xc20] sm:$0xff]  ;;  %v3808_v30 = vpack.c.bf16 %v602_v24, %v594_v21  ;;  %v608_v32 = vld [vmem:[#allocation2 + $0xe28] sm:$0xff]  ;;  %v610_v38 = vld [vmem:[#allocation2 + $0xe38] sm:$0xff] }
 0x192   :  { %3781 = vmatprep.subr.bf16.mxu1 %v3780_v51  ;;  %1652 = vmatprep.mubr.f32.mxu0 %v4531_v39  ;;  %v553_v51 = vld [vmem:[#allocation2 + $0xc70] sm:$0xff]  ;;  %v3606_v56 = vpack.c.bf16 %v551_v46, %v543_v45  ;;  %v616_v33 = vld [vmem:[#allocation2 + $0xe68] sm:$0xff]  ;;  %v618_v40 = vld [vmem:[#allocation2 + $0xe78] sm:$0xff] }
 0x193   :  { %1919 = vmatprep.mubr.f32.mxu1 %v4531_v39  ;;  %v3790_v39 = vpack.c.bf16 %v521_v17, %v513_v42  ;;  %v3804_v42 = vpack.c.bf16 %v586_v26, %v578_v5  ;;  %v592_v17 = vld [vmem:[#allocation2 + $0xda8] sm:$0xff]  ;;  %v615_v45 = vld [vmem:[#allocation2 + $0xe60] sm:$0xff]  ;;  %v609_v46 = vld [vmem:[#allocation2 + $0xe30] sm:$0xff] }
 0x194   :  { %3591 = vmatpush1.bf16.msra.mxu0 %v3590_v22  ;;  %v3798_v22 = vpack.c.bf16 %v553_v51, %v545_v47  ;;  %v3812_v47 = vpack.c.bf16 %v618_v40, %v610_v38  ;;  %v624_v51 = vld [vmem:[#allocation2 + $0xea8] sm:$0xff]  ;;  %v634_v55 = vld [vmem:[#allocation2 + $0xef8] sm:$0xff] }
 0x195   :  { %3783 = vmatpush1.bf16.msra.mxu1 %v3782_v57  ;;  %3593 = vmatprep.subr.bf16.mxu0 %v3592_v19  ;;  %v3608_v57 = vpack.c.bf16 %v568_v53, %v560_v52  ;;  %v559_v19 = vld [vmem:[#allocation2 + $0xca0] sm:$0xff]  ;;  %v632_v52 = vld [vmem:[#allocation2 + $0xee8] sm:$0xff]  ;;  %v626_v53 = vld [vmem:[#allocation2 + $0xeb8] sm:$0xff] }
 0x196   :  { %3785 = vmatprep.subr.bf16.mxu1 %v3784_v63  ;;  %v569_v63 = vld [vmem:[#allocation2 + $0xcf0] sm:$0xff]  ;;  %v3610_v7 = vpack.c.bf16 %v567_v59, %v559_v19  ;;  %v631_v19 = vld [vmem:[#allocation2 + $0xee0] sm:$0xff]  ;;  %v650_v5 = vld [vmem:[#allocation2 + $0xf78] sm:$0xff] }
 0x197   :  { %v625_v59 = vld [vmem:[#allocation2 + $0xeb0] sm:$0xff]  ;;  %v666_v21 = vld [vmem:[#allocation2 + $0xff8] sm:$0xff] }
 0x198   :  { %3595 = vmatpush1.bf16.msra.mxu0 %v3594_v37  ;;  %v3802_v37 = vpack.c.bf16 %v569_v63, %v561_v34  ;;  %v3816_v34 = vpack.c.bf16 %v634_v55, %v626_v53  ;;  %v640_v63 = vld [vmem:[#allocation2 + $0xf28] sm:$0xff]  ;;  %v682_v38 = vld [vmem:[#allocation2 + $0x1078] sm:$0xff] }
 0x199   :  { %3787 = vmatpush1.bf16.msra.mxu1 %v3786_v8  ;;  %3597 = vmatprep.subr.bf16.mxu0 %v3596_v9  ;;  %v3612_v8 = vpack.c.bf16 %v584_v3, %v576_v0  ;;  %v575_v9 = vld [vmem:[#allocation2 + $0xd20] sm:$0xff]  ;;  %v648_v0 = vld [vmem:[#allocation2 + $0xf68] sm:$0xff]  ;;  %v642_v3 = vld [vmem:[#allocation2 + $0xf38] sm:$0xff] }
 0x19a   :  { %3789 = vmatprep.subr.bf16.mxu1 %v3788_v15  ;;  %v585_v15 = vld [vmem:[#allocation2 + $0xd70] sm:$0xff]  ;;  %v3614_v25 = vpack.c.bf16 %v583_v10, %v575_v9  ;;  %v647_v9 = vld [vmem:[#allocation2 + $0xf60] sm:$0xff]  ;;  %v698_v53 = vld [vmem:[#allocation2 + $0x10f8] sm:$0xff] }
 0x19b   :  { %v641_v10 = vld [vmem:[#allocation2 + $0xf30] sm:$0xff] }
 0x19c   :  { %3599 = vmatpush1.bf16.msra.mxu0 %v3598_v14  ;;  %v3806_v14 = vpack.c.bf16 %v585_v15, %v577_v11  ;;  %v3820_v11 = vpack.c.bf16 %v650_v5, %v642_v3  ;;  %v656_v15 = vld [vmem:[#allocation2 + $0xfa8] sm:$0xff]  ;;  %v714_v3 = vld [vmem:[#allocation2 + $0x1178] sm:$0xff] }
 0x19d   :  { %3791 = vmatpush1.bf16.msra.mxu1 %v3790_v39  ;;  %3601 = vmatprep.subr.bf16.mxu0 %v3600_v27  ;;  %v3616_v39 = vpack.c.bf16 %v600_v20, %v592_v17  ;;  %v591_v27 = vld [vmem:[#allocation2 + $0xda0] sm:$0xff]  ;;  %v664_v17 = vld [vmem:[#allocation2 + $0xfe8] sm:$0xff]  ;;  %v658_v20 = vld [vmem:[#allocation2 + $0xfb8] sm:$0xff] }
 0x19e   :  { %3793 = vmatprep.subr.bf16.mxu1 %v3792_v31  ;;  %v601_v31 = vld [vmem:[#allocation2 + $0xdf0] sm:$0xff]  ;;  %v3618_v1 = vpack.c.bf16 %v599_v16, %v591_v27  ;;  %v663_v27 = vld [vmem:[#allocation2 + $0xfe0] sm:$0xff] }
 0x19f   :  { %v657_v16 = vld [vmem:[#allocation2 + $0xfb0] sm:$0xff] }
 0x1a0   :  { %3603 = vmatpush1.bf16.msra.mxu0 %v3602_v43  ;;  %v3810_v43 = vpack.c.bf16 %v601_v31, %v593_v29  ;;  %v3824_v29 = vpack.c.bf16 %v666_v21, %v658_v20  ;;  %v672_v31 = vld [vmem:[#allocation2 + $0x1028] sm:$0xff]  ;;  %v730_v20 = vld [vmem:[#allocation2 + $0x11f8] sm:$0xff] }
 0x1a1   :  { %3795 = vmatpush1.bf16.msra.mxu1 %v3794_v4  ;;  %3605 = vmatprep.subr.bf16.mxu0 %v3604_v44  ;;  %v3620_v4 = vpack.c.bf16 %v616_v33, %v608_v32  ;;  %v607_v44 = vld [vmem:[#allocation2 + $0xe20] sm:$0xff]  ;;  %v680_v32 = vld [vmem:[#allocation2 + $0x1068] sm:$0xff]  ;;  %v674_v33 = vld [vmem:[#allocation2 + $0x1038] sm:$0xff] }
 0x1a2   :  { %3797 = vmatprep.subr.bf16.mxu1 %v3796_v50  ;;  %v617_v50 = vld [vmem:[#allocation2 + $0xe70] sm:$0xff]  ;;  %v3622_v12 = vpack.c.bf16 %v615_v45, %v607_v44  ;;  %v679_v44 = vld [vmem:[#allocation2 + $0x1060] sm:$0xff] }
 0x1a3   :  { %v673_v45 = vld [vmem:[#allocation2 + $0x1030] sm:$0xff] }
 0x1a4   :  { %3607 = vmatpush1.bf16.msra.mxu0 %v3606_v56  ;;  %v3814_v56 = vpack.c.bf16 %v617_v50, %v609_v46  ;;  %v3828_v46 = vpack.c.bf16 %v682_v38, %v674_v33  ;;  %v688_v50 = vld [vmem:[#allocation2 + $0x10a8] sm:$0xff]  ;;  %v735_v38 = vld [vmem:[#allocation2 + $0x1220] sm:$0xff] }
 0x1a5   :  { %3799 = vmatpush1.bf16.msra.mxu1 %v3798_v22  ;;  %3609 = vmatprep.subr.bf16.mxu0 %v3608_v57  ;;  %v3624_v22 = vpack.c.bf16 %v632_v52, %v624_v51  ;;  %v623_v57 = vld [vmem:[#allocation2 + $0xea0] sm:$0xff]  ;;  %v696_v51 = vld [vmem:[#allocation2 + $0x10e8] sm:$0xff]  ;;  %v690_v52 = vld [vmem:[#allocation2 + $0x10b8] sm:$0xff] }
 0x1a6   :  { %3801 = vmatprep.subr.bf16.mxu1 %v3800_v61  ;;  %v633_v61 = vld [vmem:[#allocation2 + $0xef0] sm:$0xff]  ;;  %v3626_v26 = vpack.c.bf16 %v631_v19, %v623_v57  ;;  %v695_v57 = vld [vmem:[#allocation2 + $0x10e0] sm:$0xff] }
 0x1a7   :  { %v689_v19 = vld [vmem:[#allocation2 + $0x10b0] sm:$0xff] }
 0x1a8   :  { %3611 = vmatpush1.bf16.msra.mxu0 %v3610_v7  ;;  %v3818_v7 = vpack.c.bf16 %v633_v61, %v625_v59  ;;  %v3832_v59 = vpack.c.bf16 %v698_v53, %v690_v52  ;;  %v704_v61 = vld [vmem:[#allocation2 + $0x1128] sm:$0xff]  ;;  %v759_v52 = vld [vmem:[#allocation2 + $0x12e0] sm:$0xff]  ;;  %v753_v53 = vld [vmem:[#allocation2 + $0x12b0] sm:$0xff] }
 0x1a9   :  { %3803 = vmatpush1.bf16.msra.mxu1 %v3802_v37  ;;  %3613 = vmatprep.subr.bf16.mxu0 %v3612_v8  ;;  %v3628_v37 = vpack.c.bf16 %v648_v0, %v640_v63  ;;  %v639_v8 = vld [vmem:[#allocation2 + $0xf20] sm:$0xff]  ;;  %v712_v63 = vld [vmem:[#allocation2 + $0x1168] sm:$0xff]  ;;  %v706_v0 = vld [vmem:[#allocation2 + $0x1138] sm:$0xff] }
 0x1aa   :  { %3805 = vmatprep.subr.bf16.mxu1 %v3804_v42  ;;  %v649_v42 = vld [vmem:[#allocation2 + $0xf70] sm:$0xff]  ;;  %v3630_v24 = vpack.c.bf16 %v647_v9, %v639_v8  ;;  %v711_v8 = vld [vmem:[#allocation2 + $0x1160] sm:$0xff] }
 0x1ab   :  { %v705_v9 = vld [vmem:[#allocation2 + $0x1130] sm:$0xff] }
 0x1ac   :  { %3615 = vmatpush1.bf16.msra.mxu0 %v3614_v25  ;;  %v3822_v25 = vpack.c.bf16 %v649_v42, %v641_v10  ;;  %v3836_v10 = vpack.c.bf16 %v714_v3, %v706_v0  ;;  %v720_v42 = vld [vmem:[#allocation2 + $0x11a8] sm:$0xff]  ;;  %v777_v3 = vld [vmem:[#allocation2 + $0x1370] sm:$0xff] }
 0x1ad   :  { %3807 = vmatpush1.bf16.msra.mxu1 %v3806_v14  ;;  %3617 = vmatprep.subr.bf16.mxu0 %v3616_v39  ;;  %v3632_v14 = vpack.c.bf16 %v664_v17, %v656_v15  ;;  %v655_v39 = vld [vmem:[#allocation2 + $0xfa0] sm:$0xff]  ;;  %v728_v15 = vld [vmem:[#allocation2 + $0x11e8] sm:$0xff]  ;;  %v722_v17 = vld [vmem:[#allocation2 + $0x11b8] sm:$0xff] }
 0x1ae   :  { %3809 = vmatprep.subr.bf16.mxu1 %v3808_v30  ;;  %v665_v30 = vld [vmem:[#allocation2 + $0xff0] sm:$0xff]  ;;  %v3634_v40 = vpack.c.bf16 %v663_v27, %v655_v39  ;;  %v3840_v27 = vpack.c.bf16 %v730_v20, %v722_v17  ;;  %v800_v20 = vld [vmem:[#allocation2 + $0x1428] sm:$0xff] }
 0x1af   :  { %v721_v39 = vld [vmem:[#allocation2 + $0x11b0] sm:$0xff] }
 0x1b0   :  { %3619 = vmatpush1.bf16.msra.mxu0 %v3618_v1  ;;  %v3826_v1 = vpack.c.bf16 %v665_v30, %v657_v16  ;;  %v729_v16 = vld [vmem:[#allocation2 + $0x11f0] sm:$0xff]  ;;  %v744_v30 = vld [vmem:[#allocation2 + $0x1268] sm:$0xff] }
 0x1b1   :  { %3811 = vmatpush1.bf16.msra.mxu1 %v3810_v43  ;;  %3621 = vmatprep.subr.bf16.mxu0 %v3620_v4  ;;  %v3636_v43 = vpack.c.bf16 %v680_v32, %v672_v31  ;;  %v671_v4 = vld [vmem:[#allocation2 + $0x1020] sm:$0xff]  ;;  %v746_v31 = vld [vmem:[#allocation2 + $0x1278] sm:$0xff]  ;;  %v3842_v32 = vpack.c.bf16 %v729_v16, %v721_v39  ;;  %v793_v17 = vld [vmem:[#allocation2 + $0x13f0] sm:$0xff] }
 0x1b2   :  { %3813 = vmatprep.subr.bf16.mxu1 %v3812_v47  ;;  %v681_v47 = vld [vmem:[#allocation2 + $0x1070] sm:$0xff]  ;;  %v3638_v55 = vpack.c.bf16 %v679_v44, %v671_v4  ;;  %v752_v44 = vld [vmem:[#allocation2 + $0x12a8] sm:$0xff]  ;;  %v807_v16 = vld [vmem:[#allocation2 + $0x1460] sm:$0xff] }
 0x1b3   :  { %v745_v4 = vld [vmem:[#allocation2 + $0x1270] sm:$0xff] }
 0x1b4   :  { %3623 = vmatpush1.bf16.msra.mxu0 %v3622_v12  ;;  %v3830_v12 = vpack.c.bf16 %v681_v47, %v673_v45  ;;  %v760_v45 = vld [vmem:[#allocation2 + $0x12e8] sm:$0xff] }
 0x1b5   :  { %3815 = vmatpush1.bf16.msra.mxu1 %v3814_v56  ;;  %3625 = vmatprep.subr.bf16.mxu0 %v3624_v22  ;;  %v3640_v56 = vpack.c.bf16 %v696_v51, %v688_v50  ;;  %v687_v22 = vld [vmem:[#allocation2 + $0x10a0] sm:$0xff]  ;;  %v3656_v50 = vpack.c.bf16 %v760_v45, %v752_v44  ;;  %v817_v44 = vld [vmem:[#allocation2 + $0x14b0] sm:$0xff] }
 0x1b6   :  { %3817 = vmatprep.subr.bf16.mxu1 %v3816_v34  ;;  %v697_v34 = vld [vmem:[#allocation2 + $0x10f0] sm:$0xff]  ;;  %v3642_v5 = vpack.c.bf16 %v695_v57, %v687_v22  ;;  %v751_v51 = vld [vmem:[#allocation2 + $0x12a0] sm:$0xff]  ;;  %v776_v22 = vld [vmem:[#allocation2 + $0x1368] sm:$0xff] }
 0x1b7   :  { %v778_v57 = vld [vmem:[#allocation2 + $0x1378] sm:$0xff] }
 0x1b8   :  { %3627 = vmatpush1.bf16.msra.mxu0 %v3626_v26  ;;  %v3834_v26 = vpack.c.bf16 %v697_v34, %v689_v19  ;;  %v767_v34 = vld [vmem:[#allocation2 + $0x1320] sm:$0xff] }
 0x1b9   :  { %3819 = vmatpush1.bf16.msra.mxu1 %v3818_v7  ;;  %3629 = vmatprep.subr.bf16.mxu0 %v3628_v37  ;;  %v3644_v7 = vpack.c.bf16 %v712_v63, %v704_v61  ;;  %v703_v37 = vld [vmem:[#allocation2 + $0x1120] sm:$0xff]  ;;  %v769_v63 = vld [vmem:[#allocation2 + $0x1330] sm:$0xff] }
 0x1ba   :  { %3821 = vmatprep.subr.bf16.mxu1 %v3820_v11  ;;  %v713_v11 = vld [vmem:[#allocation2 + $0x1170] sm:$0xff]  ;;  %v775_v61 = vld [vmem:[#allocation2 + $0x1360] sm:$0xff] }
 0x1bb   :  { %v3838_v21 = vpack.c.bf16 %v713_v11, %v705_v9  ;;  %v791_v11 = vld [vmem:[#allocation2 + $0x13e0] sm:$0xff] }
 0x1bc   :  { %3631 = vmatpush1.bf16.msra.mxu0 %v3630_v24  ;;  %v3648_v24 = vpack.c.bf16 %v728_v15, %v720_v42  ;;  %v785_v42 = vld [vmem:[#allocation2 + $0x13b0] sm:$0xff] }
 0x1bd   :  { %3823 = vmatpush1.bf16.msra.mxu1 %v3822_v25  ;;  %3633 = vmatprep.subr.bf16.mxu0 %v3632_v14  ;;  %v719_v25 = vld [vmem:[#allocation2 + $0x11a0] sm:$0xff] }
 0x1be   :  { %3825 = vmatprep.subr.bf16.mxu1 %v3824_v29  ;;  %v727_v14 = vld [vmem:[#allocation2 + $0x11e0] sm:$0xff]  ;;  %v736_v29 = vld [vmem:[#allocation2 + $0x1228] sm:$0xff] }
 0x1bf   :  { %v3652_v33 = vpack.c.bf16 %v744_v30, %v736_v29  ;;  %v801_v29 = vld [vmem:[#allocation2 + $0x1430] sm:$0xff] }
 0x1c0   :  { %3635 = vmatpush1.bf16.msra.mxu0 %v3634_v40  ;;  %v743_v40 = vld [vmem:[#allocation2 + $0x1260] sm:$0xff] }
 0x1c1   :  { %3827 = vmatpush1.bf16.msra.mxu1 %v3826_v1  ;;  %3637 = vmatprep.subr.bf16.mxu0 %v3636_v43  ;;  %v737_v1 = vld [vmem:[#allocation2 + $0x1230] sm:$0xff] }
 0x1c2   :  { %3829 = vmatprep.subr.bf16.mxu1 %v3828_v46  ;;  %v762_v46 = vld [vmem:[#allocation2 + $0x12f8] sm:$0xff]  ;;  %v3846_v47 = vpack.c.bf16 %v745_v4, %v737_v1  ;;  %v823_v4 = vld [vmem:[#allocation2 + $0x14e0] sm:$0xff] }
 0x1c3   :  { %1653 = vmatmul.mubr.f32.vlgmr.msra.gmra.mrb[8].mxu0 %v4539_v49 }
 0x1c4   :  { %3639 = vmatpush1.bf16.msra.mxu0 %v3638_v55  ;;  %1920 = vmatmul.mubr.f32.vlgmr.msra.gmra.mrb[8].mxu1 %v4539_v49  ;;  %v3646_v49 = vpack.c.bf16 %v711_v8, %v703_v37  ;;  %v794_v37 = vld [vmem:[#allocation2 + $0x13f8] sm:$0xff]  ;;  %v3662_v8 = vpack.c.bf16 %v775_v61, %v767_v34 }
 0x1c5   :  { %3831 = vmatpush1.bf16.msra.mxu1 %v3830_v12  ;;  %3641 = vmatprep.subr.bf16.mxu0 %v3640_v56  ;;  %v761_v12 = vld [vmem:[#allocation2 + $0x12f0] sm:$0xff]  ;;  %v768_v56 = vld [vmem:[#allocation2 + $0x1328] sm:$0xff] }
 0x1c6   :  { %3833 = vmatprep.subr.bf16.mxu1 %v3832_v59  ;;  %1658 = vmatprep.mubr.f32.mxu0 %v4544_v62  ;;  %v3850_v19 = vpack.c.bf16 %v761_v12, %v753_v53  ;;  %v3660_v59 = vpack.c.bf16 %v776_v22, %v768_v56  ;;  %v839_v12 = vld [vmem:[#allocation2 + $0x1560] sm:$0xff]  ;;  %v833_v56 = vld [vmem:[#allocation2 + $0x1530] sm:$0xff] }
 0x1c7   :  { %1925 = vmatprep.mubr.f32.mxu1 %v4544_v62  ;;  %1659 = vmatmul.mubr.f32.gmra.mrb[10].mxu0 %v4547_v2  ;;  %v738_v62 = vld [vmem:[#allocation2 + $0x1238] sm:$0xff] }
 0x1c8   :  { %3643 = vmatpush1.bf16.msra.mxu0 %v3642_v5  ;;  %1926 = vmatmul.mubr.f32.gmra.mrb[10].mxu1 %v4547_v2  ;;  %v3650_v2 = vpack.c.bf16 %v727_v14, %v719_v25  ;;  %v3844_v43 = vpack.c.bf16 %v746_v31, %v738_v62  ;;  %v784_v5 = vld [vmem:[#allocation2 + $0x13a8] sm:$0xff]  ;;  %v3858_v14 = vpack.c.bf16 %v793_v17, %v785_v42  ;;  %v809_v62 = vld [vmem:[#allocation2 + $0x1470] sm:$0xff]  ;;  %v871_v17 = vld [vmem:[#allocation2 + $0x1660] sm:$0xff] }
 0x1c9   :  { %3835 = vmatpush1.bf16.msra.mxu1 %v3834_v26  ;;  %3645 = vmatprep.subr.bf16.mxu0 %v3644_v7  ;;  %v792_v26 = vld [vmem:[#allocation2 + $0x13e8] sm:$0xff]  ;;  %v786_v7 = vld [vmem:[#allocation2 + $0x13b8] sm:$0xff] }
 0x1ca   :  { %3837 = vmatprep.subr.bf16.mxu1 %v3836_v10  ;;  %1664 = vmatprep.mubr.f32.mxu0 %v4554_v18  ;;  %v3664_v9 = vpack.c.bf16 %v792_v26, %v784_v5  ;;  %v783_v10 = vld [vmem:[#allocation2 + $0x13a0] sm:$0xff]  ;;  %v3856_v15 = vpack.c.bf16 %v794_v37, %v786_v7  ;;  %v816_v31 = vld [vmem:[#allocation2 + $0x14a8] sm:$0xff]  ;;  %v849_v5 = vld [vmem:[#allocation2 + $0x15b0] sm:$0xff] }
 0x1cb   :  { %1931 = vmatprep.mubr.f32.mxu1 %v4554_v18  ;;  %1665 = vmatmul.mubr.f32.gmra.mrb[12].mxu0 %v4558_v23  ;;  %v754_v18 = vld [vmem:[#allocation2 + $0x12b8] sm:$0xff]  ;;  %v3666_v25 = vpack.c.bf16 %v791_v11, %v783_v10  ;;  %v857_v7 = vld [vmem:[#allocation2 + $0x15f0] sm:$0xff]  ;;  %v864_v37 = vld [vmem:[#allocation2 + $0x1628] sm:$0xff] }
 0x1cc   :  { %3647 = vmatpush1.bf16.msra.mxu0 %v3646_v49  ;;  %1932 = vmatmul.mubr.f32.gmra.mrb[12].mxu1 %v4558_v23  ;;  %v3654_v23 = vpack.c.bf16 %v743_v40, %v735_v38  ;;  %v3848_v55 = vpack.c.bf16 %v762_v46, %v754_v18  ;;  %v808_v49 = vld [vmem:[#allocation2 + $0x1468] sm:$0xff]  ;;  %v3862_v40 = vpack.c.bf16 %v809_v62, %v801_v29  ;;  %v825_v18 = vld [vmem:[#allocation2 + $0x14f0] sm:$0xff]  ;;  %v887_v62 = vld [vmem:[#allocation2 + $0x16e0] sm:$0xff] }
 0x1cd   :  { %3839 = vmatpush1.bf16.msra.mxu1 %v3838_v21  ;;  %3649 = vmatprep.subr.bf16.mxu0 %v3648_v24  ;;  %v802_v21 = vld [vmem:[#allocation2 + $0x1438] sm:$0xff]  ;;  %v3668_v39 = vpack.c.bf16 %v808_v49, %v800_v20  ;;  %v832_v46 = vld [vmem:[#allocation2 + $0x1528] sm:$0xff]  ;;  %v3874_v11 = vpack.c.bf16 %v857_v7, %v849_v5  ;;  %v865_v20 = vld [vmem:[#allocation2 + $0x1630] sm:$0xff] }
 0x1ce   :  { %3841 = vmatprep.subr.bf16.mxu1 %v3840_v27  ;;  %1670 = vmatprep.mubr.f32.mxu0 %v4565_v36  ;;  %v810_v24 = vld [vmem:[#allocation2 + $0x1478] sm:$0xff]  ;;  %v799_v27 = vld [vmem:[#allocation2 + $0x1420] sm:$0xff]  ;;  %v2130_v7 = vld [vmem:[%s5284_s3 + $0x8] sm:$0xff] }
 0x1cf   :  { %1937 = vmatprep.mubr.f32.mxu1 %v4565_v36  ;;  %1671 = vmatmul.mubr.f32.gmra.mrb[14].mxu0 %v4569_v41  ;;  %v770_v36 = vld [vmem:[#allocation2 + $0x1338] sm:$0xff]  ;;  %v3860_v30 = vpack.c.bf16 %v810_v24, %v802_v21  ;;  %v3670_v38 = vpack.c.bf16 %v807_v16, %v799_v27  ;;  %v873_v21 = vld [vmem:[#allocation2 + $0x1670] sm:$0xff]  ;;  %v880_v24 = vld [vmem:[#allocation2 + $0x16a8] sm:$0xff] }
 0x1d0   :  { %3651 = vmatpush1.bf16.msra.mxu0 %v3650_v2  ;;  %1938 = vmatmul.mubr.f32.gmra.mrb[14].mxu1 %v4569_v41  ;;  %v3658_v41 = vpack.c.bf16 %v759_v52, %v751_v51  ;;  %v3852_v0 = vpack.c.bf16 %v778_v57, %v770_v36  ;;  %v824_v2 = vld [vmem:[#allocation2 + $0x14e8] sm:$0xff]  ;;  %v3866_v52 = vpack.c.bf16 %v825_v18, %v817_v44  ;;  %v841_v36 = vld [vmem:[#allocation2 + $0x1570] sm:$0xff]  ;;  %v903_v18 = vld [vmem:[#allocation2 + $0x1760] sm:$0xff] }
 0x1d1   :  { %3843 = vmatpush1.bf16.msra.mxu1 %v3842_v32  ;;  %3653 = vmatprep.subr.bf16.mxu0 %v3652_v33  ;;  %v818_v32 = vld [vmem:[#allocation2 + $0x14b8] sm:$0xff]  ;;  %v3672_v1 = vpack.c.bf16 %v824_v2, %v816_v31  ;;  %v848_v57 = vld [vmem:[#allocation2 + $0x15a8] sm:$0xff]  ;;  %v3870_v61 = vpack.c.bf16 %v841_v36, %v833_v56  ;;  %v3878_v16 = vpack.c.bf16 %v873_v21, %v865_v20  ;;  %v881_v31 = vld [vmem:[#allocation2 + $0x16b0] sm:$0xff] }
 0x1d2   :  { %3845 = vmatprep.subr.bf16.mxu1 %v3844_v43  ;;  %1741 = vmatprep.mubr.f32.mxu0 %v4579_v54  ;;  %v826_v33 = vld [vmem:[#allocation2 + $0x14f8] sm:$0xff]  ;;  %v815_v43 = vld [vmem:[#allocation2 + $0x14a0] sm:$0xff]  ;;  %v2131_v20 = vld [vmem:[%s5284_s3 + $0x10] sm:$0xff] }
 0x1d3   :  { %2008 = vmatprep.mubr.f32.mxu1 %v4579_v54  ;;  %v3854_v54 = vpack.c.bf16 %v777_v3, %v769_v63  ;;  %v3864_v45 = vpack.c.bf16 %v826_v33, %v818_v32  ;;  %v3674_v51 = vpack.c.bf16 %v823_v4, %v815_v43  ;;  %v855_v3 = vld [vmem:[#allocation2 + $0x15e0] sm:$0xff]  ;;  %v889_v32 = vld [vmem:[#allocation2 + $0x16f0] sm:$0xff]  ;;  %v896_v33 = vld [vmem:[#allocation2 + $0x1728] sm:$0xff] }
 0x1d4   :  { %3655 = vmatpush1.bf16.msra.mxu0 %v3654_v23  ;;  %v840_v23 = vld [vmem:[#allocation2 + $0x1568] sm:$0xff]  ;;  %v3882_v4 = vpack.c.bf16 %v889_v32, %v881_v31  ;;  %v919_v36 = vld [vmem:[#allocation2 + $0x17e0] sm:$0xff] }
 0x1d5   :  { %3847 = vmatpush1.bf16.msra.mxu1 %v3846_v47  ;;  %3657 = vmatprep.subr.bf16.mxu0 %v3656_v50  ;;  %v834_v47 = vld [vmem:[#allocation2 + $0x1538] sm:$0xff]  ;;  %v3676_v53 = vpack.c.bf16 %v840_v23, %v832_v46  ;;  %v897_v46 = vld [vmem:[#allocation2 + $0x1730] sm:$0xff]  ;;  %v2133_v31 = vld [vmem:[%s5284_s3 + $0x20] sm:$0xff] }
 0x1d6   :  { %3849 = vmatprep.subr.bf16.mxu1 %v3848_v55  ;;  %v842_v50 = vld [vmem:[#allocation2 + $0x1578] sm:$0xff]  ;;  %v831_v55 = vld [vmem:[#allocation2 + $0x1520] sm:$0xff] }
 0x1d7   :  { %v3868_v22 = vpack.c.bf16 %v842_v50, %v834_v47  ;;  %v3678_v34 = vpack.c.bf16 %v839_v12, %v831_v55  ;;  %v905_v47 = vld [vmem:[#allocation2 + $0x1770] sm:$0xff]  ;;  %v912_v50 = vld [vmem:[#allocation2 + $0x17a8] sm:$0xff]  ;;  %v2165_v32 = vld [vmem:[%s5284_s3 + $0x120] sm:$0xff] }
 0x1d8   :  { %3659 = vmatpush1.bf16.msra.mxu0 %v3658_v41  ;;  %v856_v41 = vld [vmem:[#allocation2 + $0x15e8] sm:$0xff]  ;;  %v3886_v12 = vpack.c.bf16 %v905_v47, %v897_v46  ;;  %v2167_v46 = vld [vmem:[%s5284_s3 + $0x130] sm:$0xff]  ;;  %v2168_v47 = vld [vmem:[%s5284_s3 + $0x138] sm:$0xff] }
 0x1d9   :  { %3851 = vmatpush1.bf16.msra.mxu1 %v3850_v19  ;;  %3661 = vmatprep.subr.bf16.mxu0 %v3660_v59  ;;  %v850_v19 = vld [vmem:[#allocation2 + $0x15b8] sm:$0xff]  ;;  %v3680_v63 = vpack.c.bf16 %v856_v41, %v848_v57  ;;  %v913_v57 = vld [vmem:[#allocation2 + $0x17b0] sm:$0xff] }
 0x1da   :  { %3853 = vmatprep.subr.bf16.mxu1 %v3852_v0  ;;  %v858_v59 = vld [vmem:[#allocation2 + $0x15f8] sm:$0xff]  ;;  %v847_v0 = vld [vmem:[#allocation2 + $0x15a0] sm:$0xff] }
 0x1db   :  { %v3872_v26 = vpack.c.bf16 %v858_v59, %v850_v19  ;;  %v3682_v10 = vpack.c.bf16 %v855_v3, %v847_v0  ;;  %v921_v19 = vld [vmem:[#allocation2 + $0x17f0] sm:$0xff]  ;;  %v2145_v59 = vld [vmem:[%s5284_s3 + $0x80] sm:$0xff] }
 0x1dc   :  { %3663 = vmatpush1.bf16.msra.mxu0 %v3662_v8  ;;  %v872_v8 = vld [vmem:[#allocation2 + $0x1668] sm:$0xff]  ;;  %v3890_v3 = vpack.c.bf16 %v921_v19, %v913_v57 }
 0x1dd   :  { %3855 = vmatpush1.bf16.msra.mxu1 %v3854_v54  ;;  %3665 = vmatprep.subr.bf16.mxu0 %v3664_v9  ;;  %v866_v54 = vld [vmem:[#allocation2 + $0x1638] sm:$0xff]  ;;  %v3684_v42 = vpack.c.bf16 %v872_v8, %v864_v37  ;;  %v2161_v8 = vld [vmem:[%s5284_s3 + $0x100] sm:$0xff]  ;;  %v2138_v57 = vld [vmem:[%s5284_s3 + $0x48] sm:$0xff] }
 0x1de   :  { %3857 = vmatprep.subr.bf16.mxu1 %v3856_v15  ;;  %v874_v9 = vld [vmem:[#allocation2 + $0x1678] sm:$0xff]  ;;  %v863_v15 = vld [vmem:[#allocation2 + $0x1620] sm:$0xff] }
 0x1df   :  { %v3876_v49 = vpack.c.bf16 %v874_v9, %v866_v54  ;;  %v3686_v27 = vpack.c.bf16 %v871_v17, %v863_v15  ;;  %v2162_v54 = vld [vmem:[%s5284_s3 + $0x108] sm:$0xff]  ;;  %v2147_v9 = vld [vmem:[%s5284_s3 + $0x90] sm:$0xff]  ;;  %v2180_v15 = vld [vmem:[%s5284_s3 + $0x198] sm:$0xff] }
 0x1e0   :  { %3667 = vmatpush1.bf16.msra.mxu0 %v3666_v25  ;;  %v888_v25 = vld [vmem:[#allocation2 + $0x16e8] sm:$0xff]  ;;  %v3926_v17 = vpack.c.bf16 %v2162_v54, %v2161_v8  ;;  %v2172_v8 = vld [vmem:[%s5284_s3 + $0x158] sm:$0xff]  ;;  %v2157_v54 = vld [vmem:[%s5284_s3 + $0xe0] sm:$0xff] }
 0x1e1   :  { %3859 = vmatpush1.bf16.msra.mxu1 %v3858_v14  ;;  %3669 = vmatprep.subr.bf16.mxu0 %v3668_v39  ;;  %v882_v14 = vld [vmem:[#allocation2 + $0x16b8] sm:$0xff]  ;;  %v3688_v29 = vpack.c.bf16 %v888_v25, %v880_v24  ;;  %v2163_v24 = vld [vmem:[%s5284_s3 + $0x110] sm:$0xff] }
 0x1e2   :  { %3861 = vmatprep.subr.bf16.mxu1 %v3860_v30  ;;  %v890_v39 = vld [vmem:[#allocation2 + $0x16f8] sm:$0xff]  ;;  %v879_v30 = vld [vmem:[#allocation2 + $0x16a0] sm:$0xff] }
 0x1e3   :  { %v3880_v2 = vpack.c.bf16 %v890_v39, %v882_v14  ;;  %v3690_v43 = vpack.c.bf16 %v887_v62, %v879_v30  ;;  %v2164_v25 = vld [vmem:[%s5284_s3 + $0x118] sm:$0xff]  ;;  %v2149_v39 = vld [vmem:[%s5284_s3 + $0xa0] sm:$0xff]  ;;  %v2182_v30 = vld [vmem:[%s5284_s3 + $0x1a8] sm:$0xff] }
 0x1e4   :  { %3671 = vmatpush1.bf16.msra.mxu0 %v3670_v38  ;;  %v904_v38 = vld [vmem:[#allocation2 + $0x1768] sm:$0xff]  ;;  %v3930_v62 = vpack.c.bf16 %v2164_v25, %v2163_v24 }
 0x1e5   :  { %3863 = vmatpush1.bf16.msra.mxu1 %v3862_v40  ;;  %3673 = vmatprep.subr.bf16.mxu0 %v3672_v1  ;;  %v898_v40 = vld [vmem:[#allocation2 + $0x1738] sm:$0xff]  ;;  %v3692_v44 = vpack.c.bf16 %v904_v38, %v896_v33  ;;  %v2166_v33 = vld [vmem:[%s5284_s3 + $0x128] sm:$0xff] }
 0x1e6   :  { %3865 = vmatprep.subr.bf16.mxu1 %v3864_v45  ;;  %v906_v1 = vld [vmem:[#allocation2 + $0x1778] sm:$0xff]  ;;  %v895_v45 = vld [vmem:[#allocation2 + $0x1720] sm:$0xff]  ;;  %v4854_v25 = vld [vmem:[%s5284_s3 + $0x168] sm:$0xff] }
 0x1e7   :  { %v3884_v23 = vpack.c.bf16 %v906_v1, %v898_v40  ;;  %v3694_v55 = vpack.c.bf16 %v903_v18, %v895_v45  ;;  %v2151_v40 = vld [vmem:[%s5284_s3 + $0xb0] sm:$0xff]  ;;  %v3934_v45 = vpack.c.bf16 %v2166_v33, %v2165_v32  ;;  %v4893_v33 = vld [vmem:[%s5284_s3 + $0x78] sm:$0xff] }
 0x1e8   :  { %3675 = vmatpush1.bf16.msra.mxu0 %v3674_v51  ;;  %v920_v51 = vld [vmem:[#allocation2 + $0x17e8] sm:$0xff]  ;;  %v2135_v18 = vld [vmem:[%s5284_s3 + $0x30] sm:$0xff] }
 0x1e9   :  { %3867 = vmatpush1.bf16.msra.mxu1 %v3866_v52  ;;  %3677 = vmatprep.subr.bf16.mxu0 %v3676_v53  ;;  %v914_v52 = vld [vmem:[#allocation2 + $0x17b8] sm:$0xff]  ;;  %v3696_v56 = vpack.c.bf16 %v920_v51, %v912_v50  ;;  %v2153_v50 = vld [vmem:[%s5284_s3 + $0xc0] sm:$0xff]  ;;  %v2154_v51 = vld [vmem:[%s5284_s3 + $0xc8] sm:$0xff] }
 0x1ea   :  { %3869 = vmatprep.subr.bf16.mxu1 %v3868_v22  ;;  %v922_v53 = vld [vmem:[#allocation2 + $0x17f8] sm:$0xff]  ;;  %v911_v22 = vld [vmem:[#allocation2 + $0x17a0] sm:$0xff] }
 0x1eb   :  { %v3888_v41 = vpack.c.bf16 %v922_v53, %v914_v52  ;;  %v3698_v0 = vpack.c.bf16 %v919_v36, %v911_v22  ;;  %v2186_v53 = vld [vmem:[%s5284_s3 + $0x1c8] sm:$0xff]  ;;  %v3938_v22 = vpack.c.bf16 %v2168_v47, %v2167_v46  ;;  %v3908_v36 = vpack.c.bf16 %v2154_v51, %v2153_v50  ;;  %v4935_v50 = vld [vmem:[%s5284_s3 + $0x200] sm:$0xff] }
 0x1ec   :  { %3679 = vmatpush1.bf16.msra.mxu0 %v3678_v34  ;;  %v2146_v34 = vld [vmem:[%s5284_s3 + $0x88] sm:$0xff] }
 0x1ed   :  { %3871 = vmatpush1.bf16.msra.mxu1 %v3870_v61  ;;  %3681 = vmatprep.subr.bf16.mxu0 %v3680_v63  ;;  %v2177_v61 = vld [vmem:[%s5284_s3 + $0x180] sm:$0xff]  ;;  %v2178_v63 = vld [vmem:[%s5284_s3 + $0x188] sm:$0xff]  ;;  %v3892_v5 = vpack.c.bf16 %v2146_v34, %v2145_v59  ;;  %v2155_v59 = vld [vmem:[%s5284_s3 + $0xd0] sm:$0xff] }
 0x1ee   :  { %3873 = vmatprep.subr.bf16.mxu1 %v3872_v26  ;;  %v2129_v26 = vld [vmem:[%s5284_s3] sm:$0xff]  ;;  %v3924_v37 = vpack.c.bf16 %v2178_v63, %v2177_v61  ;;  %v2156_v34 = vld [vmem:[%s5284_s3 + $0xd8] sm:$0xff]  ;;  %v2187_v61 = vld [vmem:[%s5284_s3 + $0x1d0] sm:$0xff] }
 0x1ef   :  { %v4802_v63 = vld [vmem:[#allocation4] sm:$0xff]  ;;  %v4930_v47 = vld [vmem:[%s5284_s3 + $0x388] sm:$0xff] }
 0x1f0   :  { %3683 = vmatpush1.bf16.msra.mxu0 %v3682_v10  ;;  %v2148_v10 = vld [vmem:[%s5284_s3 + $0x98] sm:$0xff]  ;;  %v4940_v51 = vld [vmem:[%s5284_s3 + $0x208] sm:$0xff] }
 0x1f1   :  { %3875 = vmatpush1.bf16.msra.mxu1 %v3874_v11  ;;  %3685 = vmatprep.subr.bf16.mxu0 %v3684_v42  ;;  %v3894_v11 = vpack.c.bf16 %v2130_v7, %v2129_v26  ;;  %v2179_v42 = vld [vmem:[%s5284_s3 + $0x190] sm:$0xff]  ;;  %v3896_v21 = vpack.c.bf16 %v2148_v10, %v2147_v9  ;;  %v3912_v10 = vpack.c.bf16 %v2156_v34, %v2155_v59  ;;  %v4971_v59 = vld [vmem:[%s5284_s3 + $0x298] sm:$0xff] }
 0x1f2   :  { %3877 = vmatprep.subr.bf16.mxu1 %v3876_v49  ;;  %v2132_v49 = vld [vmem:[%s5284_s3 + $0x18] sm:$0xff]  ;;  %v3928_v14 = vpack.c.bf16 %v2180_v15, %v2179_v42  ;;  %v2189_v42 = vld [vmem:[%s5284_s3 + $0x1e0] sm:$0xff]  ;;  %v2190_v15 = vld [vmem:[%s5284_s3 + $0x1e8] sm:$0xff] }
 0x1f3   :  { %v4976_v34 = vld [vmem:[%s5284_s3 + $0x390] sm:$0xff] }
 0x1f4   :  { %3687 = vmatpush1.bf16.msra.mxu0 %v3686_v27  ;;  %v2150_v27 = vld [vmem:[%s5284_s3 + $0xa8] sm:$0xff] }
 0x1f5   :  { %3879 = vmatpush1.bf16.msra.mxu1 %v3878_v16  ;;  %3689 = vmatprep.subr.bf16.mxu0 %v3688_v29  ;;  %v3898_v16 = vpack.c.bf16 %v2132_v49, %v2131_v20  ;;  %v2181_v29 = vld [vmem:[%s5284_s3 + $0x1a0] sm:$0xff]  ;;  %v4843_v49 = vld [vmem:[%s5284_s3 + $0x68] sm:$0xff] }
 0x1f6   :  { %3881 = vmatprep.subr.bf16.mxu1 %v3880_v2  ;;  %v3900_v2 = vpack.c.bf16 %v2150_v27, %v2149_v39  ;;  %v3932_v38 = vpack.c.bf16 %v2182_v30, %v2181_v29  ;;  %v4838_v20 = vld [vmem:[%s5284_s3 + $0x60] sm:$0xff]  ;;  %v4864_v39 = vld [vmem:[%s5284_s3 + $0xf8] sm:$0xff]  ;;  %v4875_v30 = vld [vmem:[%s5284_s3 + $0x1f0] sm:$0xff] }
 0x1f7   :  { %v3918_v46 = vpack.c.bf16 %v4843_v49, %v4838_v20 }
 0x1f8   :  { %3691 = vmatpush1.bf16.msra.mxu0 %v3690_v43  ;;  %v2183_v43 = vld [vmem:[%s5284_s3 + $0x1b0] sm:$0xff] }
 0x1f9   :  { %3883 = vmatpush1.bf16.msra.mxu1 %v3882_v4  ;;  %3693 = vmatprep.subr.bf16.mxu0 %v3692_v44  ;;  %v2184_v4 = vld [vmem:[%s5284_s3 + $0x1b8] sm:$0xff]  ;;  %v925_v44 = vlaneseq }
 0x1fa   :  { %3885 = vmatprep.subr.bf16.mxu1 %v3884_v23  ;;  %v3936_v52 = vpack.c.bf16 %v2184_v4, %v2183_v43  ;;  %v4908_v43 = vld [vmem:[%s5284_s3 + $0x280] sm:$0xff]  ;;  %v4913_v4 = vld [vmem:[%s5284_s3 + $0x288] sm:$0xff] }
 0x1fc   :  { %3695 = vmatpush1.bf16.msra.mxu0 %v3694_v55 }
 0x1fd   :  { %3887 = vmatpush1.bf16.msra.mxu1 %v3886_v12  ;;  %3697 = vmatprep.subr.bf16.mxu0 %v3696_v56  ;;  %v2137_v12 = vld [vmem:[%s5284_s3 + $0x40] sm:$0xff]  ;;  %v4779_v56 = vshrl.u32 %v925_v44, 7 }
 0x1fe   :  { %3889 = vmatprep.subr.bf16.mxu1 %v3888_v41  ;;  %v2170_v41 = vld [vmem:[%s5284_s3 + $0x148] sm:$0xff]  ;;  %v4918_v44 = vld [vmem:[%s5284_s3 + $0x380] sm:$0xff] }
 0x1ff   :  { %v927_v26 = vsub.s32 0, %v4779_v56  ;;  %v931_v7 = vsub.s32 1, %v4779_v56  ;;  %v939_v9 = vsub.s32 3, %v4779_v56  ;;  %v935_v24 = vsub.s32 2, %v4779_v56 }
 0x200   :  { %3699 = vmatpush1.bf16.msra.mxu0 %v3698_v0  ;;  %v2139_v0 = vld [vmem:[%s5284_s3 + $0x50] sm:$0xff] }
 0x201   :  { %3891 = vmatpush1.bf16.msra.mxu1 %v3890_v3  ;;  %3893 = vmatprep.subr.bf16.mxu0 %v3892_v5  ;;  %v2140_v3 = vld [vmem:[%s5284_s3 + $0x58] sm:$0xff]  ;;  %v3910_v5 = vpack.c.bf16 %v2138_v57, %v2137_v12  ;;  %v4867_v27 = vrot.slane %v4802_v63, %v927_v26  ;;  %v4962_v57 = vld [vmem:[%s5284_s3 + $0x290] sm:$0xff]  ;;  %v3958_v26 = vpack.c.bf16 %v4940_v51, %v4935_v50 }
 0x202   :  { %3925 = vmatprep.subr.bf16.mxu1 %v3924_v37  ;;  %v2171_v37 = vld [vmem:[%s5284_s3 + $0x150] sm:$0xff]  ;;  %v3914_v29 = vpack.c.bf16 %v2140_v3, %v2139_v0  ;;  %v3956_v3 = vpack.c.bf16 %v4913_v4, %v4908_v43  ;;  %v3960_v20 = vpack.c.bf16 %v4971_v59, %v4962_v57 }
 0x203   :  { %1742 = vmatmul.mubr.f32.vlgmr.msra.gmra.mrb[8].mxu0 %v4590_v60 }
 0x204   :  { %2009 = vmatmul.mubr.f32.vlgmr.msra.gmra.mrb[8].mxu1 %v4590_v60  ;;  %3895 = vmatpush3.bf16.msra.mxu0 %v3894_v11  ;;  %v2134_v60 = vld [vmem:[%s5284_s3 + $0x28] sm:$0xff] }
 0x205   :  { %3927 = vmatpush3.bf16.msra.mxu1 %v3926_v17  ;;  %1747 = vmatprep.mubr.f32.mxu0 %v4592_v6  ;;  %v3902_v1 = vpack.c.bf16 %v2134_v60, %v2133_v31  ;;  %v2158_v11 = vld [vmem:[%s5284_s3 + $0xe8] sm:$0xff]  ;;  %v4885_v31 = vld [vmem:[%s5284_s3 + $0x70] sm:$0xff]  ;;  %v4888_v60 = vrot.slane %v4802_v63, %v939_v9 }
 0x206   :  { %2014 = vmatprep.mubr.f32.mxu1 %v4592_v6  ;;  %3897 = vmatprep.subr.bf16.mxu0 %v3896_v21  ;;  %v2152_v6 = vld [vmem:[%s5284_s3 + $0xb8] sm:$0xff]  ;;  %v4848_v21 = vld [vmem:[%s5284_s3 + $0x160] sm:$0xff]  ;;  %v3916_v32 = vpack.c.bf16 %v2158_v11, %v2157_v54  ;;  %v3922_v12 = vpack.c.bf16 %v4893_v33, %v4885_v31  ;;  %v5005_v11 = vld [vmem:[%s5284_s3 + $0x310] sm:$0xff] }
 0x207   :  { %1748 = vmatmul.mubr.f32.gmra.mrb[10].mxu0 %v4598_v13  ;;  %3929 = vmatprep.subr.bf16.mxu1 %v3928_v14  ;;  %v3904_v23 = vpack.c.bf16 %v2152_v6, %v2151_v40  ;;  %v4859_v14 = vld [vmem:[%s5284_s3 + $0xf0] sm:$0xff]  ;;  %v4903_v40 = vld [vmem:[%s5284_s3 + $0x178] sm:$0xff] }
 0x208   :  { %2015 = vmatmul.mubr.f32.gmra.mrb[10].mxu1 %v4598_v13  ;;  %3899 = vmatpush3.bf16.msra.mxu0 %v3898_v16  ;;  %v2136_v13 = vld [vmem:[%s5284_s3 + $0x38] sm:$0xff]  ;;  %v4870_v16 = vrot.slane %v4802_v63, %v931_v7  ;;  %v4992_v7 = vld [vmem:[%s5284_s3 + $0x210] sm:$0xff] }
 0x209   :  { %3931 = vmatpush3.bf16.msra.mxu1 %v3930_v62  ;;  %1753 = vmatprep.mubr.f32.mxu0 %v4602_v28  ;;  %v3906_v55 = vpack.c.bf16 %v2136_v13, %v2135_v18  ;;  %v4880_v62 = vld [vmem:[%s5284_s3 + $0x1f8] sm:$0xff] }
 0x20a   :  { %2020 = vmatprep.mubr.f32.mxu1 %v4602_v28  ;;  %3901 = vmatprep.subr.bf16.mxu0 %v3900_v2  ;;  %v2185_v28 = vld [vmem:[%s5284_s3 + $0x1c0] sm:$0xff]  ;;  %v3946_v2 = vpack.c.bf16 %v2172_v8, %v2171_v37  ;;  %v4997_v37 = vld [vmem:[%s5284_s3 + $0x218] sm:$0xff] }
 0x20b   :  { %1754 = vmatmul.mubr.f32.gmra.mrb[12].mxu0 %v4609_v35  ;;  %3933 = vmatprep.subr.bf16.mxu1 %v3932_v38  ;;  %v3940_v19 = vpack.c.bf16 %v2186_v53, %v2185_v28  ;;  %v4898_v38 = vld [vmem:[%s5284_s3 + $0x170] sm:$0xff]  ;;  %v3920_v53 = vpack.c.bf16 %v4864_v39, %v4859_v14 }
 0x20c   :  { %2021 = vmatmul.mubr.f32.gmra.mrb[12].mxu1 %v4609_v35  ;;  %3903 = vmatpush3.bf16.msra.mxu0 %v3902_v1  ;;  %v2169_v35 = vld [vmem:[%s5284_s3 + $0x140] sm:$0xff]  ;;  %v3948_v1 = vpack.c.bf16 %v2190_v15, %v2189_v42 }
 0x20d   :  { %3935 = vmatpush3.bf16.msra.mxu1 %v3934_v45  ;;  %1759 = vmatprep.mubr.f32.mxu0 %v4613_v48  ;;  %v4921_v45 = vrot.slane %v4802_v63, %v935_v24  ;;  %v5020_v24 = vld [vmem:[%s5284_s3 + $0x2a0] sm:$0xff] }
 0x20e   :  { %2026 = vmatprep.mubr.f32.mxu1 %v4613_v48  ;;  %3905 = vmatprep.subr.bf16.mxu0 %v3904_v23  ;;  %v2188_v48 = vld [vmem:[%s5284_s3 + $0x1d8] sm:$0xff]  ;;  %v3950_v23 = vpack.c.bf16 %v4854_v25, %v4848_v21  ;;  %v5025_v25 = vld [vmem:[%s5284_s3 + $0x2a8] sm:$0xff] }
 0x20f   :  { %1760 = vmatmul.mubr.f32.gmra.mrb[14].mxu0 %v4617_v58  ;;  %3937 = vmatprep.subr.bf16.mxu1 %v3936_v52  ;;  %v3944_v17 = vpack.c.bf16 %v2188_v48, %v2187_v61  ;;  %v4981_v61 = vld [vmem:[%s5284_s3 + $0x398] sm:$0xff] }
 0x210   :  { %2027 = vmatmul.mubr.f32.gmra.mrb[14].mxu1 %v4617_v58  ;;  %3907 = vmatpush3.bf16.msra.mxu0 %v3906_v55  ;;  %v3942_v58 = vpack.c.bf16 %v2170_v41, %v2169_v35  ;;  %v3952_v55 = vpack.c.bf16 %v4880_v62, %v4875_v30  ;;  %v3992_v49 = vpack.c.bf16 %v4981_v61, %v4976_v34  ;;  %v5015_v21 = vld [vmem:[%s5284_s3 + $0x318] sm:$0xff] }
 0x211   :  { %3939 = vmatpush3.bf16.msra.mxu1 %v3938_v22  ;;  %3909 = vmatprep.subr.bf16.mxu0 %v3908_v36  ;;  %v4952_v22 = vld [vmem:[%s5284_s3 + $0x300] sm:$0xff]  ;;  %v4957_v36 = vld [vmem:[%s5284_s3 + $0x308] sm:$0xff] }
 0x212   :  { %3941 = vmatprep.subr.bf16.mxu1 %v3940_v19  ;;  %v3954_v19 = vpack.c.bf16 %v4903_v40, %v4898_v38 }
 0x214   :  { %3911 = vmatpush3.bf16.msra.mxu0 %v3910_v5  ;;  %v3988_v5 = vpack.c.bf16 %v4930_v47, %v4918_v44 }
 0x215   :  { %3943 = vmatpush3.bf16.msra.mxu1 %v3942_v58  ;;  %3913 = vmatprep.subr.bf16.mxu0 %v3912_v10  ;;  %v3990_v10 = vpack.c.bf16 %v4957_v36, %v4952_v22  ;;  %v2216_v22 = vld [vmem:[%s5284_s3 + $0x2b8] sm:$0xff]  ;;  %v2247_v36 = vld [vmem:[%s5284_s3 + $0x3b0] sm:$0xff] }
 0x216   :  { %v1209_v6 = vpop.f32.mrb[0].mxu0  ;;  %3945 = vmatprep.subr.bf16.mxu1 %v3944_v17 }
 0x217   :  { %v1476_v18 = vpop.f32.mrb[0].mxu1  ;;  %v1211_v13 = vpop.f32.mrb[1].mxu0  ;;  %v4036_v35 = vadd.f32 %v1209_v6, %v4867_v27  ;;  %v3994_v6 = vpack.c.bf16 %v5015_v21, %v5005_v11 }
 0x218   :  { %v4037_v52 = vadd.f32 %v1211_v13, %v4870_v16  ;;  %v1478_v28 = vpop.f32.mrb[1].mxu1  ;;  %3915 = vmatpush3.bf16.msra.mxu0 %v3914_v29  ;;  %v4044_v8 = vadd.f32 %v1476_v18, %v4921_v45 }
 0x219   :  { %v4045_v41 = vadd.f32 %v1478_v28, %v4888_v60  ;;  %3947 = vmatpush3.bf16.msra.mxu1 %v3946_v2  ;;  %3917 = vmatprep.subr.bf16.mxu0 %v3916_v32  ;;  %v2065_v14 = vmul.f32 0.01, %v4036_v35  ;;  %vm2033_vm2 = vcmp.gt.f32.partialorder %v4036_v35, 0.0  ;;  %v3962_v2 = vpack.c.bf16 %v4997_v37, %v4992_v7  ;;  %v2199_v7 = vld [vmem:[%s5284_s3 + $0x230] sm:$0xff]  ;;  %v2200_v37 = vld [vmem:[%s5284_s3 + $0x238] sm:$0xff] }
 0x21a   :  { %v2066_v48 = vmul.f32 0.01, %v4037_v52  ;;  %v1215_v0 = vpop.f32.mrb[2].mxu0  ;;  %3949 = vmatprep.subr.bf16.mxu1 %v3948_v1  ;;  %vm2034_vm0 = vcmp.gt.f32.partialorder %v4037_v52, 0.0  ;;  %v2067_v32 = vmul.f32 0.01, %v4044_v8  ;;  %v3964_v1 = vpack.c.bf16 %v5025_v25, %v5020_v24 }
 0x21b   :  { %v2068_v54 = vmul.f32 0.01, %v4045_v41  ;;  %v1482_v58 = vpop.f32.mrb[2].mxu1  ;;  %v1217_v9 = vpop.f32.mrb[3].mxu0  ;;  %v4038_v39 = vadd.f32 %v1215_v0, %v4867_v27  ;;  %vm2036_vm1 = vcmp.gt.f32.partialorder %v4045_v41, 0.0  ;;  %vm2035_vm3 = vcmp.gt.f32.partialorder %v4044_v8, 0.0 }
 0x21c   :  { %v4039_v42 = vadd.f32 %v1217_v9, %v4870_v16  ;;  %v1484_v15 = vpop.f32.mrb[3].mxu1  ;;  %3919 = vmatpush3.bf16.msra.mxu0 %v3918_v46  ;;  %v2098_v17 = vsel %vm2034_vm0, %v4037_v52, %v2066_v48  ;;  %v4046_v30 = vadd.f32 %v1482_v58, %v4921_v45  ;;  %v2097_v18 = vsel %vm2033_vm2, %v4036_v35, %v2065_v14  ;;  %v2215_v14 = vld [vmem:[%s5284_s3 + $0x2b0] sm:$0xff]  ;;  %v2232_v25 = vld [vmem:[%s5284_s3 + $0x338] sm:$0xff] }
 0x21d   :  { %v4047_v29 = vadd.f32 %v1484_v15, %v4888_v60  ;;  %3951 = vmatpush3.bf16.msra.mxu1 %v3950_v23  ;;  %2328 = vmatprep.mubr.f32.mxu0 %v2098_v17  ;;  %v2100_v62 = vsel %vm2036_vm1, %v4045_v41, %v2068_v54  ;;  %v2073_v13 = vmul.f32 0.01, %v4038_v39  ;;  %vm2041_vm6 = vcmp.gt.f32.partialorder %v4038_v39, 0.0 }
 0x21e   :  { %v1221_v31 = vpop.f32.mrb[4].mxu0  ;;  %3921 = vmatprep.subr.bf16.mxu0 %v3920_v53  ;;  %3953 = vmatprep.subr.bf16.mxu1 %v3952_v55  ;;  %v2074_v33 = vmul.f32 0.01, %v4039_v42  ;;  %vm2042_vm4 = vcmp.gt.f32.partialorder %v4039_v42, 0.0  ;;  %v2075_v23 = vmul.f32 0.01, %v4046_v30 }
 0x21f   :  { %2413 = vmatprep.mubr.f32.mxu1 %v2100_v62  ;;  %v1488_v38 = vpop.f32.mrb[4].mxu1  ;;  %v1223_v40 = vpop.f32.mrb[5].mxu0  ;;  %v2076_v43 = vmul.f32 0.01, %v4047_v29  ;;  %vm2044_vm5 = vcmp.gt.f32.partialorder %v4047_v29, 0.0  ;;  %v4040_v47 = vadd.f32 %v1221_v31, %v4867_v27  ;;  %v5046_v53 = vld [vmem:[%s5284_s3 + $0x3a0] sm:$0xff] }
 0x220   :  { %v4041_v4 = vadd.f32 %v1223_v40, %v4870_v16  ;;  %v1490_v44 = vpop.f32.mrb[5].mxu1  ;;  %3923 = vmatpush3.bf16.msra.mxu0 %v3922_v12  ;;  %v5041_v52 = vadd.f32 %v1488_v38, %v4921_v45  ;;  %v5051_v55 = vld [vmem:[%s5284_s3 + $0x3a8] sm:$0xff]  ;;  %v2099_v12 = vsel %vm2035_vm3, %v4044_v8, %v2067_v32  ;;  %v2106_v48 = vsel %vm2042_vm4, %v4039_v42, %v2074_v33  ;;  %v2231_v62 = vld [vmem:[%s5284_s3 + $0x330] sm:$0xff]  ;;  %v2217_v31 = vld [vmem:[%s5284_s3 + $0x2c0] sm:$0xff] }
 0x221   :  { %v4049_v46 = vadd.f32 %v1490_v44, %v4888_v60  ;;  %3955 = vmatpush3.bf16.msra.mxu1 %v3954_v19  ;;  %3957 = vmatprep.subr.bf16.mxu0 %v3956_v3  ;;  %vm2043_vm7 = vcmp.gt.f32.partialorder %v4046_v30, 0.0  ;;  %v2108_v54 = vsel %vm2044_vm5, %v4047_v29, %v2076_v43  ;;  %v2105_v8 = vsel %vm2041_vm6, %v4038_v39, %v2073_v13  ;;  %v2198_v42 = vld [vmem:[%s5284_s3 + $0x228] sm:$0xff]  ;;  %v2249_v33 = vld [vmem:[%s5284_s3 + $0x3c0] sm:$0xff] }
 0x222   :  { %v1227_v28 = vpop.f32.mrb[6].mxu0  ;;  %3989 = vmatprep.subr.bf16.mxu1 %v3988_v5  ;;  %v2082_v35 = vmul.f32 0.01, %v4041_v4  ;;  %vm2050_vm8 = vcmp.gt.f32.partialorder %v4041_v4, 0.0  ;;  %v3996_v9 = vpack.c.bf16 %v5051_v55, %v5046_v53  ;;  %v2081_v15 = vmul.f32 0.01, %v4040_v47 }
 0x223   :  { %v1494_v41 = vpop.f32.mrb[6].mxu1  ;;  %v1229_v19 = vpop.f32.mrb[7].mxu0  ;;  %2329 = vmatmul.mubr.f32.vlgmr.msra.gmra.mrb[16].mxu0 %v2097_v18  ;;  %v2084_v0 = vmul.f32 0.01, %v4049_v46  ;;  %vm2052_vm9 = vcmp.gt.f32.partialorder %v4049_v46, 0.0  ;;  %v4042_v50 = vadd.f32 %v1227_v28, %v4867_v27  ;;  %v2107_v51 = vsel %vm2043_vm7, %v4046_v30, %v2075_v23  ;;  %v2250_v38 = vld [vmem:[%s5284_s3 + $0x3c8] sm:$0xff] }
 0x224   :  { %v4043_v3 = vadd.f32 %v1229_v19, %v4870_v16  ;;  %v1496_v5 = vpop.f32.mrb[7].mxu1  ;;  %2414 = vmatmul.mubr.f32.vlgmr.msra.gmra.mrb[16].mxu1 %v2099_v12  ;;  %2333 = vmatprep.mubr.f32.mxu0 %v2106_v48  ;;  %v2197_v16 = vld [vmem:[%s5284_s3 + $0x220] sm:$0xff]  ;;  %v2083_v17 = vmul.f32 0.01, %v5041_v52  ;;  %v4050_v27 = vadd.f32 %v1494_v41, %v4921_v45  ;;  %v2114_v29 = vsel %vm2050_vm8, %v4041_v4, %v2082_v35  ;;  %v2248_v45 = vld [vmem:[%s5284_s3 + $0x3b8] sm:$0xff]  ;;  %v2202_v44 = vld [vmem:[%s5284_s3 + $0x248] sm:$0xff] }
 0x225   :  { %v4051_v58 = vadd.f32 %v1496_v5, %v4888_v60  ;;  %2418 = vmatprep.mubr.f32.mxu1 %v2108_v54  ;;  %3959 = vmatpush3.bf16.msra.mxu0 %v3958_v26  ;;  %v2229_v60 = vld [vmem:[%s5284_s3 + $0x320] sm:$0xff]  ;;  %v2230_v26 = vld [vmem:[%s5284_s3 + $0x328] sm:$0xff]  ;;  %vm2049_vm10 = vcmp.gt.f32.partialorder %v4040_v47, 0.0  ;;  %v2116_v59 = vsel %vm2052_vm9, %v4049_v46, %v2084_v0  ;;  %vm2051_vm11 = vcmp.gt.f32.partialorder %v5041_v52, 0.0  ;;  %v2251_v28 = vld [vmem:[%s5284_s3 + $0x3d0] sm:$0xff] }
 0x226   :  { %3991 = vmatpush3.bf16.msra.mxu1 %v3990_v10  ;;  %3961 = vmatprep.subr.bf16.mxu0 %v3960_v20  ;;  %v2090_v39 = vmul.f32 0.01, %v4043_v3  ;;  %vm2058_vm12 = vcmp.gt.f32.partialorder %v4043_v3, 0.0  ;;  %v3966_v34 = vpack.c.bf16 %v2198_v42, %v2197_v16  ;;  %v3998_v61 = vpack.c.bf16 %v2230_v26, %v2229_v60  ;;  %v2201_v4 = vld [vmem:[%s5284_s3 + $0x240] sm:$0xff]  ;;  %v2234_v23 = vld [vmem:[%s5284_s3 + $0x348] sm:$0xff]  ;;  %v2252_v53 = vld [vmem:[%s5284_s3 + $0x3d8] sm:$0xff] }
 0x227   :  { %2334 = vmatmul.mubr.f32.gmra.mrb[18].mxu0 %v2105_v8  ;;  %3993 = vmatprep.subr.bf16.mxu1 %v3992_v49  ;;  %v2092_v57 = vmul.f32 0.01, %v4051_v58  ;;  %vm2060_vm13 = vcmp.gt.f32.partialorder %v4051_v58, 0.0  ;;  %v2089_v10 = vmul.f32 0.01, %v4042_v50  ;;  %v2113_v20 = vsel %vm2049_vm10, %v4040_v47, %v2081_v15  ;;  %v2233_v18 = vld [vmem:[%s5284_s3 + $0x340] sm:$0xff] }
 0x228   :  { %2419 = vmatmul.mubr.f32.gmra.mrb[18].mxu1 %v2107_v51  ;;  %2338 = vmatprep.mubr.f32.mxu0 %v2114_v29  ;;  %v3968_v49 = vpack.c.bf16 %v2216_v22, %v2215_v14  ;;  %v4000_v30 = vpack.c.bf16 %v2248_v45, %v2247_v36  ;;  %v2091_v11 = vmul.f32 0.01, %v4050_v27  ;;  %v2115_v21 = vsel %vm2051_vm11, %v5041_v52, %v2083_v17  ;;  %v2219_v47 = vld [vmem:[%s5284_s3 + $0x2d0] sm:$0xff]  ;;  %v2220_v52 = vld [vmem:[%s5284_s3 + $0x2d8] sm:$0xff]  ;;  %v2222_v8 = vld [vmem:[%s5284_s3 + $0x2e8] sm:$0xff] }
 0x229   :  { %2423 = vmatprep.mubr.f32.mxu1 %v2116_v59  ;;  %3963 = vmatpush3.bf16.msra.mxu0 %v3962_v2  ;;  %v2122_v24 = vsel %vm2058_vm12, %v4043_v3, %v2090_v39  ;;  %vm2057_vm14 = vcmp.gt.f32.partialorder %v4042_v50, 0.0  ;;  %v2218_v2 = vld [vmem:[%s5284_s3 + $0x2c8] sm:$0xff]  ;;  %v2124_v32 = vsel %vm2060_vm13, %v4051_v58, %v2092_v57  ;;  %vm2059_vm15 = vcmp.gt.f32.partialorder %v4050_v27, 0.0  ;;  %v2203_v41 = vld [vmem:[%s5284_s3 + $0x250] sm:$0xff]  ;;  %v2204_v19 = vld [vmem:[%s5284_s3 + $0x258] sm:$0xff] }
 0x22a   :  { %3995 = vmatpush3.bf16.msra.mxu1 %v3994_v6  ;;  %3965 = vmatprep.subr.bf16.mxu0 %v3964_v1  ;;  %v3970_v40 = vpack.c.bf16 %v2200_v37, %v2199_v7  ;;  %v2121_v6 = vsel %vm2057_vm14, %v4042_v50, %v2089_v10  ;;  %v4002_v1 = vpack.c.bf16 %v2232_v25, %v2231_v62  ;;  %v2235_v0 = vld [vmem:[%s5284_s3 + $0x350] sm:$0xff]  ;;  %v2236_v3 = vld [vmem:[%s5284_s3 + $0x358] sm:$0xff]  ;;  %v2221_v58 = vld [vmem:[%s5284_s3 + $0x2e0] sm:$0xff]  ;;  %v947_v7 = vsub.s32 5, %v4779_v56 }
 0x22b   :  { %2339 = vmatmul.mubr.f32.gmra.mrb[20].mxu0 %v2113_v20  ;;  %3997 = vmatprep.subr.bf16.mxu1 %v3996_v9  ;;  %v3972_v43 = vpack.c.bf16 %v2218_v2, %v2217_v31  ;;  %v2123_v13 = vsel %vm2059_vm15, %v4050_v27, %v2091_v11  ;;  %v4004_v46 = vpack.c.bf16 %v2250_v38, %v2249_v33  ;;  %v2253_v9 = vld [vmem:[%s5284_s3 + $0x3e0] sm:$0xff]  ;;  %v2254_v42 = vld [vmem:[%s5284_s3 + $0x3e8] sm:$0xff]  ;;  %v2223_v27 = vld [vmem:[%s5284_s3 + $0x2f0] sm:$0xff]  ;;  %v955_v37 = vsub.s32 7, %v4779_v56 }
 0x22c   :  { %2424 = vmatmul.mubr.f32.gmra.mrb[20].mxu1 %v2115_v21  ;;  %2343 = vmatprep.mubr.f32.mxu0 %v2122_v24  ;;  %v3974_v55 = vpack.c.bf16 %v2202_v44, %v2201_v4  ;;  %v4006_v12 = vpack.c.bf16 %v2234_v23, %v2233_v18  ;;  %v3976_v35 = vpack.c.bf16 %v2220_v52, %v2219_v47  ;;  %v2205_v60 = vld [vmem:[%s5284_s3 + $0x260] sm:$0xff]  ;;  %v2206_v15 = vld [vmem:[%s5284_s3 + $0x268] sm:$0xff]  ;;  %v2224_v39 = vld [vmem:[%s5284_s3 + $0x2f8] sm:$0xff] }
 0x22d   :  { %2428 = vmatprep.mubr.f32.mxu1 %v2124_v32  ;;  %3967 = vmatpush3.bf16.msra.mxu0 %v3966_v34  ;;  %v4008_v48 = vpack.c.bf16 %v2252_v53, %v2251_v28  ;;  %v3978_v5 = vpack.c.bf16 %v2204_v19, %v2203_v41  ;;  %v4010_v54 = vpack.c.bf16 %v2236_v3, %v2235_v0  ;;  %v2237_v51 = vld [vmem:[%s5284_s3 + $0x360] sm:$0xff]  ;;  %v2238_v26 = vld [vmem:[%s5284_s3 + $0x368] sm:$0xff]  ;;  %v2255_v29 = vld [vmem:[%s5284_s3 + $0x3f0] sm:$0xff] }
 0x22e   :  { %3999 = vmatpush3.bf16.msra.mxu1 %v3998_v61  ;;  %3969 = vmatprep.subr.bf16.mxu0 %v3968_v49  ;;  %v3980_v16 = vpack.c.bf16 %v2222_v8, %v2221_v58  ;;  %v4012_v17 = vpack.c.bf16 %v2254_v42, %v2253_v9  ;;  %v3982_v50 = vpack.c.bf16 %v2206_v15, %v2205_v60  ;;  %v2256_v36 = vld [vmem:[%s5284_s3 + $0x3f8] sm:$0xff]  ;;  %v2207_v45 = vld [vmem:[%s5284_s3 + $0x270] sm:$0xff]  ;;  %v943_v49 = vsub.s32 4, %v4779_v56 }
 0x22f   :  { %2344 = vmatmul.mubr.f32.gmra.mrb[22].mxu0 %v2121_v6  ;;  %4001 = vmatprep.subr.bf16.mxu1 %v4000_v30  ;;  %v4014_v14 = vpack.c.bf16 %v2238_v26, %v2237_v51  ;;  %v3984_v22 = vpack.c.bf16 %v2224_v39, %v2223_v27  ;;  %v2208_v57 = vld [vmem:[%s5284_s3 + $0x278] sm:$0xff]  ;;  %v4016_v59 = vpack.c.bf16 %v2256_v36, %v2255_v29  ;;  %v2239_v61 = vld [vmem:[%s5284_s3 + $0x370] sm:$0xff]  ;;  %v951_v30 = vsub.s32 6, %v4779_v56 }
 0x230   :  { %2429 = vmatmul.mubr.f32.gmra.mrb[22].mxu1 %v2123_v13  ;;  %v3986_v34 = vpack.c.bf16 %v2208_v57, %v2207_v45  ;;  %v2240_v10 = vld [vmem:[%s5284_s3 + $0x378] sm:$0xff]  ;;  %v5232_v62 = vrot.slane %v4802_v63, %v943_v49  ;;  %v5238_v21 = vrot.slane %v4802_v63, %v947_v7  ;;  %v5241_v24 = vrot.slane %v4802_v63, %v955_v37 }
 0x231   :  { %3971 = vmatpush3.bf16.msra.mxu0 %v3970_v40  ;;  %v4018_v20 = vpack.c.bf16 %v2240_v10, %v2239_v61  ;;  %v5235_v11 = vrot.slane %v4802_v63, %v951_v30 }
 0x232   :  { %4003 = vmatpush3.bf16.msra.mxu1 %v4002_v1  ;;  %3973 = vmatprep.subr.bf16.mxu0 %v3972_v43 }
 0x233   :  { %4005 = vmatprep.subr.bf16.mxu1 %v4004_v46 }
 0x235   :  { %3975 = vmatpush3.bf16.msra.mxu0 %v3974_v55 }
 0x236   :  { %4007 = vmatpush3.bf16.msra.mxu1 %v4006_v12  ;;  %3977 = vmatprep.subr.bf16.mxu0 %v3976_v35 }
 0x237   :  { %4009 = vmatprep.subr.bf16.mxu1 %v4008_v48 }
 0x239   :  { %3979 = vmatpush3.bf16.msra.mxu0 %v3978_v5 }
 0x23a   :  { %4011 = vmatpush3.bf16.msra.mxu1 %v4010_v54  ;;  %3981 = vmatprep.subr.bf16.mxu0 %v3980_v16 }
 0x23b   :  { %4013 = vmatprep.subr.bf16.mxu1 %v4012_v17 }
 0x23d   :  { %3983 = vmatpush3.bf16.msra.mxu0 %v3982_v50 }
 0x23e   :  { %4015 = vmatpush3.bf16.msra.mxu1 %v4014_v14  ;;  %3985 = vmatprep.subr.bf16.mxu0 %v3984_v22 }
 0x23f   :  { %4017 = vmatprep.subr.bf16.mxu1 %v4016_v59 }
 0x241   :  { %3987 = vmatpush3.bf16.msra.mxu0 %v3986_v34 }
 0x242   :  { %4019 = vmatpush3.bf16.msra.mxu1 %v4018_v20 }
 0x2d6   :  { %v1743_v25 = vpop.f32.mrb[8].mxu0 }
 0x2d7   :  { %v4052_v31 = vadd.f32 %v1743_v25, %v5232_v62  ;;  %v2010_v2 = vpop.f32.mrb[8].mxu1  ;;  %v1745_v32 = vpop.f32.mrb[9].mxu0 }
 0x2d8   :  { %v4060_v33 = vadd.f32 %v2010_v2, %v5235_v11  ;;  %v4053_v56 = vadd.f32 %v1745_v32, %v5238_v21  ;;  %v2012_v38 = vpop.f32.mrb[9].mxu1  ;;  %v2893_v2 = vld [vmem:[#allocation6] ss:$0 sm:$0xff] }
 0x2d9   :  { %vm2037_vm0 = vcmp.gt.f32.partialorder %v4052_v31, 0.0  ;;  %v2069_v40 = vmul.f32 0.01, %v4052_v31  ;;  %v4061_v6 = vadd.f32 %v2012_v38, %v5241_v24 }
 0x2da   :  { %v2071_v1 = vmul.f32 0.01, %v4060_v33  ;;  %v2070_v43 = vmul.f32 0.01, %v4053_v56  ;;  %v1749_v4 = vpop.f32.mrb[10].mxu0  ;;  %vm2039_vm1 = vcmp.gt.f32.partialorder %v4060_v33, 0.0 }
 0x2db   :  { %v2072_v63 = vmul.f32 0.01, %v4061_v6  ;;  %v4054_v44 = vadd.f32 %v1749_v4, %v5232_v62  ;;  %v2016_v18 = vpop.f32.mrb[10].mxu1  ;;  %v1751_v13 = vpop.f32.mrb[11].mxu0  ;;  %vm2038_vm2 = vcmp.gt.f32.partialorder %v4053_v56, 0.0  ;;  %v2101_v46 = vsel %vm2037_vm0, %v4052_v31, %v2069_v40 }
 0x2dc   :  { %v4062_v23 = vadd.f32 %v2016_v18, %v5235_v11  ;;  %v4055_v47 = vadd.f32 %v1751_v13, %v5238_v21  ;;  %v2018_v52 = vpop.f32.mrb[11].mxu1  ;;  %v2102_v28 = vsel %vm2038_vm2, %v4053_v56, %v2070_v43  ;;  %vm2040_vm3 = vcmp.gt.f32.partialorder %v4061_v6, 0.0 }
 0x2dd   :  { %v2077_v53 = vmul.f32 0.01, %v4054_v44  ;;  %v4063_v55 = vadd.f32 %v2018_v52, %v5241_v24  ;;  %2498 = vmatprep.mubr.f32.mxu0 %v2102_v28  ;;  %vm2045_vm4 = vcmp.gt.f32.partialorder %v4054_v44, 0.0  ;;  %v2104_v41 = vsel %vm2040_vm3, %v4061_v6, %v2072_v63 }
 0x2de   :  { %v2079_v12 = vmul.f32 0.01, %v4062_v23  ;;  %v2078_v35 = vmul.f32 0.01, %v4055_v47  ;;  %v1755_v19 = vpop.f32.mrb[12].mxu0  ;;  %2499 = vmatmul.mubr.f32.vlgmr.msra.gmra.mrb[24].mxu0 %v2101_v46  ;;  %vm2046_vm5 = vcmp.gt.f32.partialorder %v4055_v47, 0.0  ;;  %v2103_v48 = vsel %vm2039_vm1, %v4060_v33, %v2071_v1  ;;  %2583 = vmatprep.mubr.f32.mxu1 %v2104_v41 }
 0x2df   :  { %v2080_v0 = vmul.f32 0.01, %v4063_v55  ;;  %v4056_v3 = vadd.f32 %v1755_v19, %v5232_v62  ;;  %v2022_v5 = vpop.f32.mrb[12].mxu1  ;;  %v1757_v54 = vpop.f32.mrb[13].mxu0  ;;  %vm2048_vm6 = vcmp.gt.f32.partialorder %v4063_v55, 0.0  ;;  %2584 = vmatmul.mubr.f32.vlgmr.msra.gmra.mrb[24].mxu1 %v2103_v48  ;;  %vm2047_vm7 = vcmp.gt.f32.partialorder %v4062_v23, 0.0 }
 0x2e0   :  { %v4064_v58 = vadd.f32 %v2022_v5, %v5235_v11  ;;  %v4057_v8 = vadd.f32 %v1757_v54, %v5238_v21  ;;  %v2024_v9 = vpop.f32.mrb[13].mxu1  ;;  %v2110_v16 = vsel %vm2046_vm5, %v4055_v47, %v2078_v35  ;;  %v2109_v17 = vsel %vm2045_vm4, %v4054_v44, %v2077_v53 }
 0x2e1   :  { %v2085_v42 = vmul.f32 0.01, %v4056_v3  ;;  %v4065_v60 = vadd.f32 %v2024_v9, %v5241_v24  ;;  %2503 = vmatprep.mubr.f32.mxu0 %v2110_v16  ;;  %v2112_v15 = vsel %vm2048_vm6, %v4063_v55, %v2080_v0  ;;  %v2111_v14 = vsel %vm2047_vm7, %v4062_v23, %v2079_v12  ;;  %v2617_v9 = vld [vmem:[#allocation7 + $0x8] sm:$0xff] }
 0x2e2   :  { %v2087_v50 = vmul.f32 0.01, %v4064_v58  ;;  %v2086_v51 = vmul.f32 0.01, %v4057_v8  ;;  %2588 = vmatprep.mubr.f32.mxu1 %v2112_v15  ;;  %v1761_v26 = vpop.f32.mrb[14].mxu0  ;;  %2504 = vmatmul.mubr.f32.gmra.mrb[26].mxu0 %v2109_v17  ;;  %vm2054_vm8 = vcmp.gt.f32.partialorder %v4057_v8, 0.0 }
 0x2e3   :  { %v2088_v27 = vmul.f32 0.01, %v4065_v60  ;;  %v4058_v39 = vadd.f32 %v1761_v26, %v5232_v62  ;;  %v2028_v29 = vpop.f32.mrb[14].mxu1  ;;  %v1763_v22 = vpop.f32.mrb[15].mxu0  ;;  %vm2056_vm9 = vcmp.gt.f32.partialorder %v4065_v60, 0.0  ;;  %vm2053_vm10 = vcmp.gt.f32.partialorder %v4056_v3, 0.0  ;;  %2589 = vmatmul.mubr.f32.gmra.mrb[26].mxu1 %v2111_v14 }
 0x2e4   :  { %v4066_v36 = vadd.f32 %v2028_v29, %v5235_v11  ;;  %v4059_v45 = vadd.f32 %v1763_v22, %v5238_v21  ;;  %v2030_v57 = vpop.f32.mrb[15].mxu1  ;;  %v2118_v59 = vsel %vm2054_vm8, %v4057_v8, %v2086_v51  ;;  %v2117_v34 = vsel %vm2053_vm10, %v4056_v3, %v2085_v42  ;;  %v2616_v8 = vld [vmem:[#allocation7] sm:$0xff]  ;;  %v2618_v42 = vld [vmem:[#allocation7 + $0x10] sm:$0xff] }
 0x2e5   :  { %v2093_v61 = vmul.f32 0.01, %v4058_v39  ;;  %v4067_v10 = vadd.f32 %v2030_v57, %v5241_v24  ;;  %2508 = vmatprep.mubr.f32.mxu0 %v2118_v59  ;;  %v2120_v20 = vsel %vm2056_vm9, %v4065_v60, %v2088_v27  ;;  %vm2055_vm11 = vcmp.gt.f32.partialorder %v4064_v58, 0.0  ;;  %v2619_v60 = vld [vmem:[#allocation7 + $0x18] sm:$0xff]  ;;  %v2737_v17 = vld [vmem:[#allocation10] sm:$0xff] }
 0x2e6   :  { %v2095_v49 = vmul.f32 0.01, %v4066_v36  ;;  %v2094_v30 = vmul.f32 0.01, %v4059_v45  ;;  %2593 = vmatprep.mubr.f32.mxu1 %v2120_v20  ;;  %2509 = vmatmul.mubr.f32.gmra.mrb[28].mxu0 %v2117_v34  ;;  %vm2062_vm12 = vcmp.gt.f32.partialorder %v4059_v45, 0.0  ;;  %v2119_v37 = vsel %vm2055_vm11, %v4064_v58, %v2087_v50  ;;  %v2738_v50 = vld [vmem:[#allocation10 + $0x8] sm:$0xff] }
 0x2e7   :  { %v2096_v7 = vmul.f32 0.01, %v4067_v10  ;;  %vm2064_vm13 = vcmp.gt.f32.partialorder %v4067_v10, 0.0  ;;  %vm2061_vm14 = vcmp.gt.f32.partialorder %v4058_v39, 0.0  ;;  %2594 = vmatmul.mubr.f32.gmra.mrb[28].mxu1 %v2119_v37  ;;  %vm2063_vm15 = vcmp.gt.f32.partialorder %v4066_v36, 0.0 }
 0x2e8   :  { %v2126_v62 = vsel %vm2062_vm12, %v4059_v45, %v2094_v30  ;;  %v2125_v21 = vsel %vm2061_vm14, %v4058_v39, %v2093_v61  ;;  %v2127_v24 = vsel %vm2063_vm15, %v4066_v36, %v2095_v49  ;;  %v4020_v16 = vpack.c.bf16 %v2617_v9, %v2616_v8 }
 0x2e9   :  { %2513 = vmatprep.mubr.f32.mxu0 %v2126_v62  ;;  %v2128_v11 = vsel %vm2064_vm13, %v4067_v10, %v2096_v7  ;;  %v4024_v15 = vpack.c.bf16 %v2619_v60, %v2618_v42  ;;  %v4028_v51 = vpack.c.bf16 %v2738_v50, %v2737_v17  ;;  %vm2627_vm0 = vcmask 261120  }
 0x2ea   :  { %2598 = vmatprep.mubr.f32.mxu1 %v2128_v11  ;;  %2514 = vmatmul.mubr.f32.gmra.mrb[30].mxu0 %v2125_v21 }
 0x2eb   :  { %2599 = vmatmul.mubr.f32.gmra.mrb[30].mxu1 %v2127_v24  ;;  %4021 = vmatprep.subr.bf16.mxu0 %v4020_v16 }
 0x2ec   :  { %4023 = vmatpush3.bf16.msra.mxu0 %v4020_v16  ;;  %4029 = vmatprep.subr.bf16.mxu1 %v4028_v51 }
 0x2ed   :  { %4025 = vmatprep.subr.bf16.mxu0 %v4024_v15  ;;  %4031 = vmatpush3.bf16.msra.mxu1 %v4028_v51 }
 0x2f0   :  { %4027 = vmatpush3.bf16.msra.mxu0 %v4024_v15  ;;  %v2899_v15 = vld [vmem:[#allocation12] ss:$0 sm:$0xff] }
 0x2f6   :  { %v2936_v25 = vpop.f32.mrb[16].mxu0 }
 0x2f7   :  { %v2980_v31 = vpop.f32.mrb[16].mxu1  ;;  %v2937_v32 = vpop.f32.mrb[17].mxu0 }
 0x2f8   :  { %v2938_v33 = vadd.f32 %v2937_v32, %v2936_v25  ;;  %v2981_v56 = vpop.f32.mrb[17].mxu1 }
 0x2f9   :  { %v2982_v38 = vadd.f32 %v2981_v56, %v2980_v31 }
 0x2fa   :  { %v2331_v40 = vadd.f32 %v2938_v33, %v2893_v2  ;;  %v2939_v6 = vpop.f32.mrb[18].mxu0 }
 0x2fb   :  { %v2983_v1 = vpop.f32.mrb[18].mxu1  ;;  %v2940_v43 = vpop.f32.mrb[19].mxu0 }
 0x2fc   :  { %v2416_v4 = vadd.f32 %v2982_v38, %v2331_v40  ;;  %v2941_v63 = vadd.f32 %v2940_v43, %v2939_v6  ;;  %v2984_v44 = vpop.f32.mrb[19].mxu1 }
 0x2fd   :  { %v2985_v18 = vadd.f32 %v2984_v44, %v2983_v1 }
 0x2fe   :  { %v2336_v13 = vadd.f32 %v2941_v63, %v2893_v2  ;;  %v2942_v46 = vpop.f32.mrb[20].mxu0 }
 0x2ff   :  { %v2986_v23 = vpop.f32.mrb[20].mxu1  ;;  %v2943_v47 = vpop.f32.mrb[21].mxu0 }
 0x300   :  { %v2421_v52 = vadd.f32 %v2985_v18, %v2336_v13  ;;  %v2944_v28 = vadd.f32 %v2943_v47, %v2942_v46  ;;  %v2987_v53 = vpop.f32.mrb[21].mxu1  ;;  %v2739_v47 = vld [vmem:[#allocation10 + $0x10] sm:$0xff] }
 0x301   :  { %v2988_v55 = vadd.f32 %v2987_v53, %v2986_v23  ;;  %v2894_v53 = vld [vmem:[#allocation9] ss:$0 sm:$0xff] }
 0x302   :  { %v2341_v12 = vadd.f32 %v2944_v28, %v2893_v2  ;;  %v2945_v35 = vpop.f32.mrb[22].mxu0 }
 0x303   :  { %v2989_v41 = vpop.f32.mrb[22].mxu1  ;;  %v2946_v19 = vpop.f32.mrb[23].mxu0 }
 0x304   :  { %v2426_v48 = vadd.f32 %v2988_v55, %v2341_v12  ;;  %v2947_v0 = vadd.f32 %v2946_v19, %v2945_v35  ;;  %v2990_v3 = vpop.f32.mrb[23].mxu1 }
 0x305   :  { %v2991_v5 = vadd.f32 %v2990_v3, %v2989_v41 }
 0x306   :  { %v2346_v54 = vadd.f32 %v2947_v0, %v2893_v2 }
 0x308   :  { %v2431_v58 = vadd.f32 %v2991_v5, %v2346_v54 }
 0x3b1   :  { %v3024_v26 = vpop.f32.mrb[24].mxu0 }
 0x3b2   :  { %v3025_v14 = vpop.f32.mrb[25].mxu0  ;;  %v3068_v27 = vpop.f32.mrb[24].mxu1 }
 0x3b3   :  { %v3026_v39 = vadd.f32 %v3025_v14, %v3024_v26  ;;  %v3069_v29 = vpop.f32.mrb[25].mxu1 }
 0x3b4   :  { %v3070_v36 = vadd.f32 %v3069_v29, %v3068_v27 }
 0x3b5   :  { %v2501_v22 = vadd.f32 %v3026_v39, %v2416_v4  ;;  %v3027_v45 = vpop.f32.mrb[26].mxu0 }
 0x3b6   :  { %v3028_v57 = vpop.f32.mrb[27].mxu0  ;;  %v3071_v34 = vpop.f32.mrb[26].mxu1 }
 0x3b7   :  { %v2586_v59 = vadd.f32 %v3070_v36, %v2501_v22  ;;  %v3029_v61 = vadd.f32 %v3028_v57, %v3027_v45  ;;  %v3072_v10 = vpop.f32.mrb[27].mxu1 }
 0x3b8   :  { %v3073_v30 = vadd.f32 %v3072_v10, %v3071_v34 }
 0x3b9   :  { %v2608_v20 = vmul.f32 0.01, %v2586_v59  ;;  %v2506_v49 = vadd.f32 %v3029_v61, %v2421_v52  ;;  %v3030_v7 = vpop.f32.mrb[28].mxu0  ;;  %vm2604_vm1 = vcmp.gt.f32.partialorder %v2586_v59, 0.0  ;;  %v2740_v52 = vld [vmem:[#allocation10 + $0x18] sm:$0xff] }
 0x3ba   :  { %v3031_v37 = vpop.f32.mrb[29].mxu0  ;;  %v3074_v11 = vpop.f32.mrb[28].mxu1  ;;  %v4032_v28 = vpack.c.bf16 %v2740_v52, %v2739_v47 }
 0x3bb   :  { %v2591_v62 = vadd.f32 %v3073_v30, %v2506_v49  ;;  %v3032_v21 = vadd.f32 %v3031_v37, %v3030_v7  ;;  %v2612_v24 = vsel %vm2604_vm1, %v2586_v59, %v2608_v20  ;;  %v3075_v25 = vpop.f32.mrb[29].mxu1 }
 0x3bc   :  { %3104 = vmatprep.mubr.msk.f32.mxu0 %vm2627_vm0, %v2612_v24  ;;  %v3076_v32 = vadd.f32 %v3075_v25, %v3074_v11  ;;  %4033 = vmatprep.subr.bf16.mxu1 %v4032_v28 }
 0x3bd   :  { %vm2605_vm2 = vcmp.gt.f32.partialorder %v2591_v62, 0.0  ;;  %v2609_v31 = vmul.f32 0.01, %v2591_v62  ;;  %v2511_v2 = vadd.f32 %v3032_v21, %v2426_v48  ;;  %v3033_v33 = vpop.f32.mrb[30].mxu0  ;;  %4035 = vmatpush3.bf16.msra.mxu1 %v4032_v28 }
 0x3be   :  { %v3034_v56 = vpop.f32.mrb[31].mxu0  ;;  %v3077_v6 = vpop.f32.mrb[30].mxu1 }
 0x3bf   :  { %v2613_v38 = vsel %vm2605_vm2, %v2591_v62, %v2609_v31  ;;  %v2596_v40 = vadd.f32 %v3076_v32, %v2511_v2  ;;  %v3035_v1 = vadd.f32 %v3034_v56, %v3033_v33  ;;  %v3078_v43 = vpop.f32.mrb[31].mxu1 }
 0x3c0   :  { %3105 = vmatmul.mubr.msk.f32.vlgmr.msra.gmra.mrb[32].mxu0 %vm2627_vm0, %v2613_v38  ;;  %v3079_v44 = vadd.f32 %v3078_v43, %v3077_v6 }
 0x3c1   :  { %v2610_v4 = vmul.f32 0.01, %v2596_v40  ;;  %v2516_v63 = vadd.f32 %v3035_v1, %v2431_v58  ;;  %vm2606_vm3 = vcmp.gt.f32.partialorder %v2596_v40, 0.0 }
 0x3c3   :  { %v2601_v18 = vadd.f32 %v3079_v44, %v2516_v63  ;;  %v2614_v13 = vsel %vm2606_vm3, %v2596_v40, %v2610_v4 }
 0x3c4   :  { %3107 = vmatprep.mubr.msk.f32.mxu0 %vm2627_vm0, %v2614_v13 }
 0x3c5   :  { %v2611_v46 = vmul.f32 0.01, %v2601_v18  ;;  %vm2607_vm4 = vcmp.gt.f32.partialorder %v2601_v18, 0.0 }
 0x3c7   :  { %v2615_v23 = vsel %vm2607_vm4, %v2601_v18, %v2611_v46 }
 0x3c8   :  { %3108 = vmatmul.mubr.msk.f32.gmra.mrb[34].mxu0 %vm2627_vm0, %v2615_v23 }
 0x493   :  { %v3106_v55 = vpop.f32.mrb[32].mxu0 }
 0x494   :  { %v2712_v12 = vadd.f32 %v3106_v55, %v2894_v53  ;;  %v2706_v35 = vpop.f32.mrb[33].mxu0 }
 0x495   :  { %v2707_v41 = vadd.f32 %v2894_v53, %v2706_v35 }
 0x496   :  { %v2730_v19 = vmul.f32 0.01, %v2712_v12  ;;  %vm2726_vm5 = vcmp.gt.f32.partialorder %v2712_v12, 0.0 }
 0x497   :  { %vm2725_vm6 = vcmp.gt.f32.partialorder %v2707_v41, 0.0  ;;  %v2729_v48 = vmul.f32 0.01, %v2707_v41 }
 0x498   :  { %v2734_v3 = vsel %vm2726_vm5, %v2712_v12, %v2730_v19 }
 0x499   :  { %v2733_v0 = vsel %vm2725_vm6, %v2707_v41, %v2729_v48 }
 0x49a   :  { %3118 = vmatprep.mubr.msk.f32.mxu1 %vm2627_vm0, %v2733_v0 }
 0x49b   :  { %v3109_v5 = vpop.f32.mrb[34].mxu0  ;;  %3119 = vmatmul.mubr.msk.f32.vlgmr.msra.gmra.mrb[32].mxu1 %vm2627_vm0, %v2734_v3 }
 0x49c   :  { %v2722_v54 = vadd.f32 %v3109_v5, %v2894_v53  ;;  %v2716_v58 = vpop.f32.mrb[35].mxu0 }
 0x49d   :  { %v2717_v8 = vadd.f32 %v2894_v53, %v2716_v58 }
 0x49e   :  { %v2732_v9 = vmul.f32 0.01, %v2722_v54  ;;  %vm2728_vm7 = vcmp.gt.f32.partialorder %v2722_v54, 0.0 }
 0x49f   :  { %vm2727_vm8 = vcmp.gt.f32.partialorder %v2717_v8, 0.0  ;;  %v2731_v16 = vmul.f32 0.01, %v2717_v8 }
 0x4a0   :  { %v2736_v60 = vsel %vm2728_vm7, %v2722_v54, %v2732_v9 }
 0x4a1   :  { %v2735_v42 = vsel %vm2727_vm8, %v2717_v8, %v2731_v16 }
 0x4a2   :  { %3121 = vmatprep.mubr.msk.f32.mxu1 %vm2627_vm0, %v2735_v42 }
 0x4a3   :  { %3122 = vmatmul.mubr.msk.f32.gmra.mrb[34].mxu1 %vm2627_vm0, %v2736_v60 }
 0x56e   :  { %v3120_v17 = vpop.f32.mrb[32].mxu1 }
 0x56f   :  { %v2826_v50 = vpop.f32.mrb[33].mxu1  ;;  %v2832_v26 = vadd.f32 %v3120_v17, %v2899_v15 }
 0x570   :  { %v2827_v51 = vadd.f32 %v2899_v15, %v2826_v50 }
 0x572   :  { %2845 = vmax.xlane.f32.xlu0 %v2827_v51 }
 0x576   :  { %v3123_v14 = vpop.f32.mrb[34].mxu1  ;;  %2847 = vmax.xlane.f32.xlu0 %v2832_v26 }
 0x577   :  { %v2836_v27 = vpop.f32.mrb[35].mxu1  ;;  %v2842_v29 = vadd.f32 %v3123_v14, %v2899_v15 }
 0x578   :  { %v2837_v39 = vadd.f32 %v2899_v15, %v2836_v27 }
 0x57a   :  { %2849 = vmax.xlane.f32.xlu1 %v2837_v39 }
 0x57e   :  { %2851 = vmax.xlane.f32.xlu1 %v2842_v29 }
 0x5ff   :  { %v2846_v22 = vpop.xlane.xlu0 %2845 }
 0x600   :  { %v2853_v36 = vsub.f32 %v2827_v51, %v2846_v22 }
 0x602   :  { %v2857_v45 = vmul.f32 1.442695, %v2853_v36 }
 0x603   :  { %v2848_v57 = vpop.xlane.xlu0 %2847 }
 0x604   :  { %4143 = vpow2.f32 %v2857_v45  ;;  %v2854_v59 = vsub.f32 %v2832_v26, %v2848_v57 }
 0x606   :  { %v2859_v34 = vmul.f32 1.442695, %v2854_v59 }
 0x607   :  { %v2850_v61 = vpop.xlane.xlu1 %2849 }
 0x608   :  { %4145 = vpow2.f32 %v2859_v34  ;;  %v2855_v10 = vsub.f32 %v2837_v39, %v2850_v61 }
 0x60a   :  { %v2861_v20 = vmul.f32 1.442695, %v2855_v10 }
 0x60b   :  { %v2852_v49 = vpop.xlane.xlu1 %2851 }
 0x60c   :  { %4147 = vpow2.f32 %v2861_v20  ;;  %v2856_v30 = vsub.f32 %v2842_v29, %v2852_v49 }
 0x60e   :  { %v4144_v7 = vpop.eup %4143  ;;  %v2863_v37 = vmul.f32 1.442695, %v2856_v30 }
 0x60f   :  { %2865 = vadd.xlane.f32.xlu0 %v4144_v7 }
 0x610   :  { %4149 = vpow2.f32 %v2863_v37 }
 0x612   :  { %v4146_v62 = vpop.eup %4145 }
 0x613   :  { %2867 = vadd.xlane.f32.xlu1 %v4146_v62 }
 0x616   :  { %v4148_v11 = vpop.eup %4147 }
 0x617   :  { %2869 = vadd.xlane.f32.xlu0 %v4148_v11 }
 0x61a   :  { %v4150_v21 = vpop.eup %4149 }
 0x61b   :  { %2871 = vadd.xlane.f32.xlu1 %v4150_v21 }
 0x69c   :  { %v2866_v24 = vpop.xlane.xlu0 %2865 }
 0x69d   :  { %4151 = vrcp.f32 %v2866_v24 }
 0x6a0   :  { %v2868_v25 = vpop.xlane.xlu1 %2867 }
 0x6a1   :  { %4153 = vrcp.f32 %v2868_v25 }
 0x6a4   :  { %v2870_v31 = vpop.xlane.xlu0 %2869 }
 0x6a5   :  { %4155 = vrcp.f32 %v2870_v31 }
 0x6a7   :  { %v4152_v2 = vpop.eup %4151 }
 0x6a8   :  { %v2877_v32 = vmul.f32 %v4152_v2, %v4144_v7  ;;  %v2872_v33 = vpop.xlane.xlu1 %2871 }
 0x6a9   :  { %4157 = vrcp.f32 %v2872_v33 }
 0x6aa   :  { %2881 = vst [vmem:[%s5290_s9] sm:$0xff] %v2877_v32 }
 0x6ab   :  { %v4154_v56 = vpop.eup %4153 }
 0x6ac   :  { %v2878_v38 = vmul.f32 %v4154_v56, %v4146_v62 }
 0x6ae   :  { %2882 = vst [vmem:[%s5290_s9 + $0x8] sm:$0xff] %v2878_v38 }
 0x6af   :  { %v4156_v40 = vpop.eup %4155 }
 0x6b0   :  { %v2879_v6 = vmul.f32 %v4156_v40, %v4148_v11 }
 0x6b2   :  { %2883 = vst [vmem:[%s5290_s9 + $0x10] sm:$0xff] %v2879_v6 }
 0x6b3   :  { %v4158_v1 = vpop.eup %4157 }
 0x6b4   :  { %v2880_v43 = vmul.f32 %v4158_v1, %v4150_v21 }
 0x6b6   :  { %2884 = vst [vmem:[%s5290_s9 + $0x18] sm:$0xff] %v2880_v43 }
 0x6b7   :  { %2889 = vsyncpa [#allocation3], 1 }
 0x6b8   :  { %2890 = vsyncpa [#allocation5], 1 }
 0x6b9   :  { %2891 = vsyncpa [#allocation8], 1 }
 0x6ba   :  { %2892 = vsyncpa [#allocation11], 1 }

</bundles_post_ra>
